<compile_context>
chip_gen: v7x
topology: tpu7x:2x2x1
jax: 0.10.0
libtpu: 0.0.40
codegen_flags: <defaults>
</compile_context>

<pallas_src>
import functools

import jax
import jax.numpy as jnp
import numpy as np
from jax.experimental import pallas as pl
from jax.experimental.pallas import tpu as pltpu


# ---------------- fused conv3x3 + GroupNorm helper (runs inside the kernel) -------------
def _conv3x3_gn(pad_ref, acc_ref, w_ref, b_row, gamma_row, beta_row,
                gmat, gmatt, maskrow, *, H, W, groups, eps, compute_dtype):
    """3x3 conv (padding=1) + GroupNorm over the flattened 'wide' layout.

    pad_ref : ((H+2)*Wr + 4, C_in) f32 scratch already holding the padded input; data
              occupies columns 0..W-1 of each Wr-row group starting at row Wr+2, all
              other rows in the accessed range are zero.
    acc_ref : (H*Wr, C_out) f32 scratch used as the MXU accumulator.
    Returns the GroupNorm-ed conv output as an (H*Wr, C_out) f32 value (the 2 trailing
    columns of each group are garbage; `maskrow` excludes them from the statistics).
    """
    Wr = W + 2
    Hw = H * Wr
    C_out = acc_ref.shape[-1]

    # 9 shifted MXU matmuls; each tap is a contiguous row-offset slice of the flat
    # padded ref -> no per-tap (H, W, C) -> (H*W, C) relayout.
    for k in range(9):
        ky, kx = divmod(k, 3)
        start = ky * Wr + kx + 1
        tap = jnp.dot(pad_ref[start:start + Hw, :].astype(compute_dtype), w_ref[k],
                      preferred_element_type=jnp.float32)
        if k == 0:
            acc_ref[...] = tap + b_row            # bias folded into the first tap
        else:
            acc_ref[...] += tap

    acc = acc_ref[...]                            # (Hw, C_out) f32

    # GroupNorm statistics over valid columns only: masked ones-row matmuls keep the
    # big row reduction on the MXU and skip the garbage columns.
    n = float(H * W * (C_out // groups))
    sum_c = jnp.dot(maskrow, acc, preferred_element_type=jnp.float32)         # (1, C)
    sq_c = jnp.dot(maskrow, acc * acc, preferred_element_type=jnp.float32)    # (1, C)
    sum_g = jnp.dot(sum_c, gmat, preferred_element_type=jnp.float32)          # (1, G)
    sq_g = jnp.dot(sq_c, gmat, preferred_element_type=jnp.float32)            # (1, G)
    mean_g = sum_g / n
    var_g = jnp.maximum(sq_g / n - mean_g * mean_g, 0.0)                      # clamp >= 0
    inv_g = jax.lax.rsqrt(var_g + eps)
    mean_c = jnp.dot(mean_g, gmatt, preferred_element_type=jnp.float32)       # (1, C)
    inv_c = jnp.dot(inv_g, gmatt, preferred_element_type=jnp.float32)         # (1, C)
    return (acc - mean_c) * (inv_c * gamma_row) + beta_row


# ------------------------------ fused ResnetBlock kernel --------------------------------
def _make_resnet_kernel(*, H, W, groups, use_res_conv, compute_dtype, eps=1e-5):
    # eps=1e-5 matches WeightStandardizedConv2d / GroupNorm for float32 inputs.
    Wr = W + 2                 # padded row width (2 halo columns per image row)
    Hw = H * Wr                # rows of the "wide" conv output
    base = Wr + 2              # first data row inside the flat padded scratch

    def kernel(x_ref, w1_ref, b1_ref, g1_ref, be1_ref, scale_ref, shift_ref,
               w2_ref, b2_ref, g2_ref, be2_ref, gmat_ref, gmatt_ref, *rest):
        if use_res_conv:
            rw_ref, rb_ref, o_ref, pad1_ref, pad2_ref, acc_ref = rest
        else:
            o_ref, pad1_ref, pad2_ref, acc_ref = rest
        C_in = x_ref.shape[-1]
        C_out = o_ref.shape[-1]

        # Validity of the Wr-wide rows: the last 2 rows of each group are garbage.
        lane_idx = jax.lax.broadcasted_iota(jnp.int32, (1, Hw), 1)
        maskrow = (lane_idx % Wr < W).astype(jnp.float32)     # (1, Hw) for stat matmuls
        sub_idx = jax.lax.broadcasted_iota(jnp.int32, (Hw, 1), 0)
        valid_col = sub_idx % Wr < W                          # (Hw, 1) for zero-masking

        gmat = gmat_ref[...]
        gmatt = gmatt_ref[...]

        # ---- conv1 input: zero ONLY the borders, then write x rows into the flat pad.
        pad1_ref[0:base, :] = jnp.zeros((base, C_in), jnp.float32)
        pad1_ref[base + Hw:, :] = jnp.zeros((Wr + 2, C_in), jnp.float32)
        zrow = jnp.zeros((2, C_in), jnp.float32)
        for i in range(H):                        # static loop -> compile-time offsets
            dst = base + i * Wr
            pad1_ref[dst:dst + W, :] = x_ref[0, i * W:(i + 1) * W, :]
            pad1_ref[dst + W:dst + Wr, :] = zrow  # per-row halo columns

        # ---- block1: WS-conv3x3 + GroupNorm + FiLM scale/shift + SiLU ----------------
        y = _conv3x3_gn(pad1_ref, acc_ref, w1_ref, b1_ref[...], g1_ref[...],
                        be1_ref[...], gmat, gmatt, maskrow,
                        H=H, W=W, groups=groups, eps=eps, compute_dtype=compute_dtype)
        y = y * (scale_ref[0] + 1.0) + shift_ref[0]
        y = y * jax.nn.sigmoid(y)

        # ---- conv2 input straight from VMEM: borders + ONE contiguous masked store ---
        pad2_ref[0:base, :] = jnp.zeros((base, C_out), jnp.float32)
        pad2_ref[base + Hw:, :] = jnp.zeros((Wr + 2, C_out), jnp.float32)
        pad2_ref[base:base + Hw, :] = jnp.where(valid_col, y, 0.0)

        # ---- block2: WS-conv3x3 + GroupNorm + SiLU ------------------------------------
        y2 = _conv3x3_gn(pad2_ref, acc_ref, w2_ref, b2_ref[...], g2_ref[...],
                         be2_ref[...], gmat, gmatt, maskrow,
                         H=H, W=W, groups=groups, eps=eps, compute_dtype=compute_dtype)
        y2 = y2 * jax.nn.sigmoid(y2)

        # ---- residual path in the same wide layout (conv1 pad scratch is still intact)
        xw = pad1_ref[base:base + Hw, :]
        if use_res_conv:
            res = jnp.dot(xw.astype(compute_dtype), rw_ref[...],
                          preferred_element_type=jnp.float32) + rb_ref[...]
        else:
            res = xw                                                    # identity (f32)
        acc_ref[...] = y2 + res                   # stage the wide sum in VMEM

        # ---- compact extraction: drop the 2 garbage columns per image row ------------
        for i in range(H):
            o_ref[0, i] = acc_ref[i * Wr:i * Wr + W, :].astype(o_ref.dtype)

    return kernel


# ------------------------------------ wrapper -------------------------------------------
def _standardize_conv_weight(w, eps=1e-5):
    # per-output-channel mean/var over (kh, kw, C_in), unbiased=False (matches PyTorch)
    mean = jnp.mean(w, axis=(0, 1, 2), keepdims=True)
    var = jnp.mean(jnp.square(w - mean), axis=(0, 1, 2), keepdims=True)
    return (w - mean) * jax.lax.rsqrt(var + eps)


def _vmem_limit_bytes():
    # ~80% of physical VMEM: ~51 MiB on v7x (64 MiB/TC), ~102 MiB on v5e/v6e (128 MiB).
    try:
        return int(pltpu.get_tpu_info().vmem_capacity_bytes * 0.8)
    except Exception:
        return 64 * 1024 * 1024


@functools.partial(jax.jit, static_argnames=("groups", "compute_dtype", "out_dtype"))
def resnet_block_forward(params, x_nhwc, time_emb, *, groups=8,
                         compute_dtype=jnp.bfloat16, out_dtype=None):
    """Fused ResnetBlock forward.  NHWC in -> NHWC out (channels on lanes): keeping the
    whole network NHWC removes the NCHW<->NHWC transposes from the data path."""
    B, H, W, C_in = x_nhwc.shape
    C_out = params["conv1_w"].shape[-1]
    if C_out % groups != 0:
        raise ValueError("GroupNorm requires dim_out % groups == 0")
    use_res_conv = "res_w" in params
    if not use_res_conv and C_in != C_out:
        raise ValueError("identity residual path requires dim == dim_out")
    out_dtype = x_nhwc.dtype if out_dtype is None else out_dtype

    # time MLP (SiLU -> Linear) in plain JAX: tiny, overhead-dominated as a kernel.
    t = time_emb * jax.nn.sigmoid(time_emb)
    t2 = (t @ params["mlp_w"] + params["mlp_b"]).astype(jnp.float32)     # (B, 2*C_out)
    scale = t2[:, :C_out].reshape(B, 1, C_out)
    shift = t2[:, C_out:].reshape(B, 1, C_out)

    # weight standardization hoisted out of the per-batch grid (f32), cast for the MXU.
    w1 = _standardize_conv_weight(params["conv1_w"]).reshape(9, C_in, C_out)
    w2 = _standardize_conv_weight(params["conv2_w"]).reshape(9, C_out, C_out)
    w1 = w1.astype(compute_dtype)
    w2 = w2.astype(compute_dtype)

    # group-membership matrices for the lane-friendly GroupNorm reduction.
    cg = C_out // groups
    gmat = (jnp.arange(C_out)[:, None] // cg ==
            jnp.arange(groups)[None, :]).astype(jnp.float32)             # (C_out, G)
    gmatt = gmat.T                                                        # (G, C_out)

    x2d = x_nhwc.reshape(B, H * W, C_in)      # free row-major merge, no extra HBM pass

    row = lambda v: v.reshape(1, C_out).astype(jnp.float32)
    args = [x2d, w1, row(params["conv1_b"]), row(params["gn1_g"]), row(params["gn1_b"]),
            scale, shift,
            w2, row(params["conv2_b"]), row(params["gn2_g"]), row(params["gn2_b"]),
            gmat, gmatt]
    in_specs = [
        pl.BlockSpec((1, H * W, C_in), lambda b: (b, 0, 0)),
        pl.BlockSpec((9, C_in, C_out), lambda b: (0, 0, 0)),
        pl.BlockSpec((1, C_out), lambda b: (0, 0)),
        pl.BlockSpec((1, C_out), lambda b: (0, 0)),
        pl.BlockSpec((1, C_out), lambda b: (0, 0)),
        pl.BlockSpec((1, 1, C_out), lambda b: (b, 0, 0)),      # per-batch FiLM scale
        pl.BlockSpec((1, 1, C_out), lambda b: (b, 0, 0)),      # per-batch FiLM shift
        pl.BlockSpec((9, C_out, C_out), lambda b: (0, 0, 0)),
        pl.BlockSpec((1, C_out), lambda b: (0, 0)),
        pl.BlockSpec((1, C_out), lambda b: (0, 0)),
        pl.BlockSpec((1, C_out), lambda b: (0, 0)),
        pl.BlockSpec((C_out, groups), lambda b: (0, 0)),
        pl.BlockSpec((groups, C_out), lambda b: (0, 0)),
    ]
    if use_res_conv:
        args += [params["res_w"].astype(compute_dtype),
                 params["res_b"].reshape(1, C_out).astype(jnp.float32)]
        in_specs += [pl.BlockSpec((C_in, C_out), lambda b: (0, 0)),
                     pl.BlockSpec((1, C_out), lambda b: (0, 0))]

    Wr = W + 2
    kernel = _make_resnet_kernel(H=H, W=W, groups=groups, use_res_conv=use_res_conv,
                                 compute_dtype=compute_dtype)
    out = pl.pallas_call(
        kernel,
        out_shape=jax.ShapeDtypeStruct((B, H, W, C_out), out_dtype),
        grid=(B,),
        in_specs=in_specs,
        out_specs=pl.BlockSpec((1, H, W, C_out), lambda b: (b, 0, 0, 0)),
        scratch_shapes=[
            pltpu.VMEM(((H + 2) * Wr + 4, C_in), jnp.float32),    # flat padded conv1 in
            pltpu.VMEM(((H + 2) * Wr + 4, C_out), jnp.float32),   # flat padded conv2 in
            pltpu.VMEM((H * Wr, C_out), jnp.float32),             # MXU accumulator/stage
        ],
        compiler_params=pltpu.CompilerParams(
            dimension_semantics=("parallel",),            # batch axis -> megacore split
            vmem_limit_bytes=_vmem_limit_bytes()),
    )(*args)
    return out


# ------------------------------- pure-JAX reference (NHWC) ------------------------------
def _ref_block(x, w, b, gamma, beta, scale, shift, groups):
    eps = 1e-5
    wm = jnp.mean(w, axis=(0, 1, 2), keepdims=True)
    wv = jnp.mean((w - wm) ** 2, axis=(0, 1, 2), keepdims=True)
    wn = (w - wm) * jax.lax.rsqrt(wv + eps)
    y = jax.lax.conv_general_dilated(
        x, wn, window_strides=(1, 1), padding="SAME",
        dimension_numbers=("NHWC", "HWIO", "NHWC")) + b
    B, H, W, C = y.shape
    yg = y.reshape(B, H, W, groups, C // groups)
    m = jnp.mean(yg, axis=(1, 2, 4), keepdims=True)
    v = jnp.mean((yg - m) ** 2, axis=(1, 2, 4), keepdims=True)
    y = ((yg - m) * jax.lax.rsqrt(v + eps)).reshape(B, H, W, C)
    y = y * gamma + beta
    if scale is not None:
        y = y * (scale[:, None, None, :] + 1.0) + shift[:, None, None, :]
    return y * jax.nn.sigmoid(y)


def ref_forward(params, x_nhwc, time_emb, groups):
    C_out = params["conv1_w"].shape[-1]
    t = time_emb * jax.nn.sigmoid(time_emb)
    t2 = t @ params["mlp_w"] + params["mlp_b"]
    scale, shift = t2[:, :C_out], t2[:, C_out:]
    h = _ref_block(x_nhwc, params["conv1_w"], params["conv1_b"],
                   params["gn1_g"], params["gn1_b"], scale, shift, groups)
    h = _ref_block(h, params["conv2_w"], params["conv2_b"],
                   params["gn2_g"], params["gn2_b"], None, None, groups)
    if "res_w" in params:
        res = jnp.einsum("bhwc,cd->bhwd", x_nhwc, params["res_w"]) + params["res_b"]
    else:
        res = x_nhwc
    return h + res


# ---------------------------------------- main ------------------------------------------
if __name__ == "__main__":
    B, dim, dim_out, H, W = 2, 8, 16, 8, 8
    time_emb_dim, groups = 32, 8

    ks = jax.random.split(jax.random.PRNGKey(0), 16)
    params = {
        "mlp_w": 0.2 * jax.random.normal(ks[0], (time_emb_dim, 2 * dim_out), jnp.float32),
        "mlp_b": 0.1 * jax.random.normal(ks[1], (2 * dim_out,), jnp.float32),
        "conv1_w": 0.2 * jax.random.normal(ks[2], (3, 3, dim, dim_out), jnp.float32),
        "conv1_b": 0.1 * jax.random.normal(ks[3], (dim_out,), jnp.float32),
        "gn1_g": 1.0 + 0.1 * jax.random.normal(ks[4], (dim_out,), jnp.float32),
        "gn1_b": 0.1 * jax.random.normal(ks[5], (dim_out,), jnp.float32),
        "conv2_w": 0.2 * jax.random.normal(ks[6], (3, 3, dim_out, dim_out), jnp.float32),
        "conv2_b": 0.1 * jax.random.normal(ks[7], (dim_out,), jnp.float32),
        "gn2_g": 1.0 + 0.1 * jax.random.normal(ks[8], (dim_out,), jnp.float32),
        "gn2_b": 0.1 * jax.random.normal(ks[9], (dim_out,), jnp.float32),
        "res_w": 0.2 * jax.random.normal(ks[10], (dim, dim_out), jnp.float32),
        "res_b": 0.1 * jax.random.normal(ks[11], (dim_out,), jnp.float32),
    }
    x = jax.random.normal(ks[12], (B, H, W, dim), jnp.float32)          # NHWC input
    time_emb = jax.random.normal(ks[13], (B, time_emb_dim), jnp.float32)

    ref = ref_forward(params, x, time_emb, groups)

    # 1) exact-semantics check: f32 operands everywhere, f32 output
    out = jax.block_until_ready(
        resnet_block_forward(params, x, time_emb, groups=groups,
                             compute_dtype=jnp.float32, out_dtype=jnp.float32))
    assert out.shape == (B, H, W, dim_out)
    assert np.isfinite(np.asarray(out)).all()
    err = float(jnp.max(jnp.abs(out - ref)))
    assert err < 5e-3, f"f32 kernel mismatch vs reference: {err}"

    # 2) fast path: bf16 MXU operands + bf16 output, f32 accumulation / statistics
    out_bf16 = jax.block_until_ready(
        resnet_block_forward(params, x, time_emb, groups=groups,
                             compute_dtype=jnp.bfloat16, out_dtype=jnp.bfloat16))
    assert out_bf16.shape == (B, H, W, dim_out)
    out_bf16_f32 = np.asarray(out_bf16.astype(jnp.float32))
    assert np.isfinite(out_bf16_f32).all()
    err_bf16 = float(np.max(np.abs(out_bf16_f32 - np.asarray(ref))))
    assert err_bf16 < 2e-1, f"bf16 kernel mismatch vs reference: {err_bf16}"

    # 3) identity residual path (dim == dim_out -> fused `h + x`, no 1x1 conv)
    params_id = {k: v for k, v in params.items() if k not in ("res_w", "res_b")}
    params_id["conv1_w"] = 0.2 * jax.random.normal(
        ks[14], (3, 3, dim_out, dim_out), jnp.float32)
    x_id = jax.random.normal(ks[15], (B, H, W, dim_out), jnp.float32)
    out_id = jax.block_until_ready(
        resnet_block_forward(params_id, x_id, time_emb, groups=groups,
                             compute_dtype=jnp.float32, out_dtype=jnp.float32))
    ref_id = ref_forward(params_id, x_id, time_emb, groups)
    err_id = float(jnp.max(jnp.abs(out_id - ref_id)))
    assert err_id < 5e-3, f"identity-path kernel mismatch vs reference: {err_id}"

    print("KERNEL_OK")
</pallas_src>

<mosaic_0001>
module attributes {stable_mosaic.version = 11 : i64} {
  func.func @kernel(%arg0: i32, %arg1: memref<1x64x8xf32, #tpu.memory_space<vmem>>, %arg2: memref<9x8x16xf32, #tpu.memory_space<vmem>>, %arg3: memref<1x16xf32, #tpu.memory_space<vmem>>, %arg4: memref<1x16xf32, #tpu.memory_space<vmem>>, %arg5: memref<1x16xf32, #tpu.memory_space<vmem>>, %arg6: memref<1x1x16xf32, #tpu.memory_space<vmem>>, %arg7: memref<1x1x16xf32, #tpu.memory_space<vmem>>, %arg8: memref<9x16x16xf32, #tpu.memory_space<vmem>>, %arg9: memref<1x16xf32, #tpu.memory_space<vmem>>, %arg10: memref<1x16xf32, #tpu.memory_space<vmem>>, %arg11: memref<1x16xf32, #tpu.memory_space<vmem>>, %arg12: memref<16x8xf32, #tpu.memory_space<vmem>>, %arg13: memref<8x16xf32, #tpu.memory_space<vmem>>, %arg14: memref<8x16xf32, #tpu.memory_space<vmem>>, %arg15: memref<1x16xf32, #tpu.memory_space<vmem>>, %arg16: memref<1x8x8x16xf32, #tpu.memory_space<vmem>>, %arg17: memref<104x8xf32, #tpu.memory_space<vmem>>, %arg18: memref<104x16xf32, #tpu.memory_space<vmem>>, %arg19: memref<80x16xf32, #tpu.memory_space<vmem>>) attributes {dimension_semantics = [#tpu.dimension_semantics<parallel>], iteration_bounds = array<i64: 2>, scalar_prefetch = 0 : i64, scratch_operands = 3 : i64, tpu.core_type = #tpu.core_type<tc>, window_params = [{transform_indices = @transform_0, window_bounds = array<i64: 1, 64, 8>}, {pipeline_mode = #tpu.pipeline_mode<synchronous>, transform_indices = @transform_1, window_bounds = array<i64: 9, 8, 16>}, {pipeline_mode = #tpu.pipeline_mode<synchronous>, transform_indices = @transform_2, window_bounds = array<i64: 1, 16>}, {pipeline_mode = #tpu.pipeline_mode<synchronous>, transform_indices = @transform_3, window_bounds = array<i64: 1, 16>}, {pipeline_mode = #tpu.pipeline_mode<synchronous>, transform_indices = @transform_4, window_bounds = array<i64: 1, 16>}, {transform_indices = @transform_5, window_bounds = array<i64: 1, 1, 16>}, {transform_indices = @transform_6, window_bounds = array<i64: 1, 1, 16>}, {pipeline_mode = #tpu.pipeline_mode<synchronous>, transform_indices = @transform_7, window_bounds = array<i64: 9, 16, 16>}, {pipeline_mode = #tpu.pipeline_mode<synchronous>, transform_indices = @transform_8, window_bounds = array<i64: 1, 16>}, {pipeline_mode = #tpu.pipeline_mode<synchronous>, transform_indices = @transform_9, window_bounds = array<i64: 1, 16>}, {pipeline_mode = #tpu.pipeline_mode<synchronous>, transform_indices = @transform_10, window_bounds = array<i64: 1, 16>}, {pipeline_mode = #tpu.pipeline_mode<synchronous>, transform_indices = @transform_11, window_bounds = array<i64: 16, 8>}, {pipeline_mode = #tpu.pipeline_mode<synchronous>, transform_indices = @transform_12, window_bounds = array<i64: 8, 16>}, {pipeline_mode = #tpu.pipeline_mode<synchronous>, transform_indices = @transform_13, window_bounds = array<i64: 8, 16>}, {pipeline_mode = #tpu.pipeline_mode<synchronous>, transform_indices = @transform_14, window_bounds = array<i64: 1, 16>}, {transform_indices = @transform_15, window_bounds = array<i64: 1, 8, 8, 16>}]} {
    %0 = tpu.iota {dimensions = array<i32: 1>} : vector<1x80xi32>
    %c10_i32 = arith.constant 10 : i32
    %c0_i32 = arith.constant 0 : i32
    %1 = arith.cmpi eq, %c10_i32, %c0_i32 : i32
    %c1_i32 = arith.constant 1 : i32
    %2 = arith.select %1, %c1_i32, %c10_i32 : i32
    %3 = vector.broadcast %2 : i32 to vector<1x80xi32>
    %4 = arith.remsi %0, %3 : vector<1x80xi32>
    %c0_i32_0 = arith.constant 0 : i32
    %5 = vector.broadcast %c0_i32_0 : i32 to vector<1x80xi32>
    %6 = arith.cmpi ne, %4, %5 : vector<1x80xi32>
    %c0_i32_1 = arith.constant 0 : i32
    %7 = vector.broadcast %c0_i32_1 : i32 to vector<1x80xi32>
    %8 = arith.cmpi slt, %4, %7 : vector<1x80xi32>
    %c0_i32_2 = arith.constant 0 : i32
    %9 = arith.cmpi slt, %2, %c0_i32_2 : i32
    %10 = vector.broadcast %9 : i1 to vector<1x80xi1>
    %11 = vector.broadcast %10 : vector<1x80xi1> to vector<1x80xi1>
    %12 = arith.xori %8, %11 : vector<1x80xi1>
    %13 = arith.andi %12, %6 : vector<1x80xi1>
    %14 = vector.broadcast %2 : i32 to vector<1x80xi32>
    %15 = arith.addi %4, %14 : vector<1x80xi32>
    %16 = arith.select %13, %15, %4 : vector<1x80xi1>, vector<1x80xi32>
    %c8_i32 = arith.constant 8 : i32
    %17 = vector.broadcast %c8_i32 : i32 to vector<1x80xi32>
    %18 = arith.cmpi slt, %16, %17 : vector<1x80xi32>
    %19 = arith.extui %18 : vector<1x80xi1> to vector<1x80xi32>
    %20 = arith.sitofp %19 : vector<1x80xi32> to vector<1x80xf32>
    %21 = tpu.iota {dimensions = array<i32: 0>} : vector<80x1xi32>
    %c10_i32_3 = arith.constant 10 : i32
    %c0_i32_4 = arith.constant 0 : i32
    %22 = arith.cmpi eq, %c10_i32_3, %c0_i32_4 : i32
    %c1_i32_5 = arith.constant 1 : i32
    %23 = arith.select %22, %c1_i32_5, %c10_i32_3 : i32
    %24 = vector.broadcast %23 : i32 to vector<80x1xi32>
    %25 = arith.remsi %21, %24 : vector<80x1xi32>
    %c0_i32_6 = arith.constant 0 : i32
    %26 = vector.broadcast %c0_i32_6 : i32 to vector<80x1xi32>
    %27 = arith.cmpi ne, %25, %26 : vector<80x1xi32>
    %c0_i32_7 = arith.constant 0 : i32
    %28 = vector.broadcast %c0_i32_7 : i32 to vector<80x1xi32>
    %29 = arith.cmpi slt, %25, %28 : vector<80x1xi32>
    %c0_i32_8 = arith.constant 0 : i32
    %30 = arith.cmpi slt, %23, %c0_i32_8 : i32
    %31 = vector.broadcast %30 : i1 to vector<80x1xi1>
    %32 = vector.broadcast %31 : vector<80x1xi1> to vector<80x1xi1>
    %33 = arith.xori %29, %32 : vector<80x1xi1>
    %34 = arith.andi %33, %27 : vector<80x1xi1>
    %35 = vector.broadcast %23 : i32 to vector<80x1xi32>
    %36 = arith.addi %25, %35 : vector<80x1xi32>
    %37 = arith.select %34, %36, %25 : vector<80x1xi1>, vector<80x1xi32>
    %c8_i32_9 = arith.constant 8 : i32
    %38 = vector.broadcast %c8_i32_9 : i32 to vector<80x1xi32>
    %39 = arith.cmpi slt, %37, %38 : vector<80x1xi32>
    %c0 = arith.constant 0 : index
    %c0_10 = arith.constant 0 : index
    %40 = vector.load %arg12[%c0, %c0_10] : memref<16x8xf32, #tpu.memory_space<vmem>>, vector<16x8xf32>
    %c0_11 = arith.constant 0 : index
    %c0_12 = arith.constant 0 : index
    %41 = vector.load %arg13[%c0_11, %c0_12] : memref<8x16xf32, #tpu.memory_space<vmem>>, vector<8x16xf32>
    %cst = arith.constant 0.000000e+00 : f32
    %42 = vector.broadcast %cst : f32 to vector<12x8xf32>
    %c0_13 = arith.constant 0 : index
    %c0_14 = arith.constant 0 : index
    %43 = vector.load %arg17[%c0_13, %c0_14] : memref<104x8xf32, #tpu.memory_space<vmem>>, vector<12x8xf32>
    tpu.vector_store %arg17[%c0_13, %c0_14], %42 {strides = array<i32>} : memref<104x8xf32, #tpu.memory_space<vmem>>, vector<12x8xf32>,
    %cst_15 = arith.constant 0.000000e+00 : f32
    %44 = vector.broadcast %cst_15 : f32 to vector<12x8xf32>
    %c92 = arith.constant 92 : index
    %c0_16 = arith.constant 0 : index
    %45 = vector.load %arg17[%c92, %c0_16] : memref<104x8xf32, #tpu.memory_space<vmem>>, vector<12x8xf32>
    tpu.vector_store %arg17[%c92, %c0_16], %44 {strides = array<i32>} : memref<104x8xf32, #tpu.memory_space<vmem>>, vector<12x8xf32>,
    %cst_17 = arith.constant 0.000000e+00 : f32
    %46 = vector.broadcast %cst_17 : f32 to vector<2x8xf32>
    %c0_18 = arith.constant 0 : index
    %c0_19 = arith.constant 0 : index
    %c0_20 = arith.constant 0 : index
    %47 = vector.load %arg1[%c0_18, %c0_19, %c0_20] : memref<1x64x8xf32, #tpu.memory_space<vmem>>, vector<1x8x8xf32>
    %48 = vector.shape_cast %47 : vector<1x8x8xf32> to vector<8x8xf32>
    %c12 = arith.constant 12 : index
    %c0_21 = arith.constant 0 : index
    %49 = vector.load %arg17[%c12, %c0_21] : memref<104x8xf32, #tpu.memory_space<vmem>>, vector<8x8xf32>
    tpu.vector_store %arg17[%c12, %c0_21], %48 {strides = array<i32>} : memref<104x8xf32, #tpu.memory_space<vmem>>, vector<8x8xf32>,
    %c20 = arith.constant 20 : index
    %c0_22 = arith.constant 0 : index
    %50 = vector.load %arg17[%c20, %c0_22] : memref<104x8xf32, #tpu.memory_space<vmem>>, vector<2x8xf32>
    tpu.vector_store %arg17[%c20, %c0_22], %46 {strides = array<i32>} : memref<104x8xf32, #tpu.memory_space<vmem>>, vector<2x8xf32>,
    %c0_23 = arith.constant 0 : index
    %c8 = arith.constant 8 : index
    %c0_24 = arith.constant 0 : index
    %51 = vector.load %arg1[%c0_23, %c8, %c0_24] : memref<1x64x8xf32, #tpu.memory_space<vmem>>, vector<1x8x8xf32>
    %52 = vector.shape_cast %51 : vector<1x8x8xf32> to vector<8x8xf32>
    %c22 = arith.constant 22 : index
    %c0_25 = arith.constant 0 : index
    %53 = vector.load %arg17[%c22, %c0_25] : memref<104x8xf32, #tpu.memory_space<vmem>>, vector<8x8xf32>
    tpu.vector_store %arg17[%c22, %c0_25], %52 {strides = array<i32>} : memref<104x8xf32, #tpu.memory_space<vmem>>, vector<8x8xf32>,
    %c30 = arith.constant 30 : index
    %c0_26 = arith.constant 0 : index
    %54 = vector.load %arg17[%c30, %c0_26] : memref<104x8xf32, #tpu.memory_space<vmem>>, vector<2x8xf32>
    tpu.vector_store %arg17[%c30, %c0_26], %46 {strides = array<i32>} : memref<104x8xf32, #tpu.memory_space<vmem>>, vector<2x8xf32>,
    %c0_27 = arith.constant 0 : index
    %c16 = arith.constant 16 : index
    %c0_28 = arith.constant 0 : index
    %55 = vector.load %arg1[%c0_27, %c16, %c0_28] : memref<1x64x8xf32, #tpu.memory_space<vmem>>, vector<1x8x8xf32>
    %56 = vector.shape_cast %55 : vector<1x8x8xf32> to vector<8x8xf32>
    %c32 = arith.constant 32 : index
    %c0_29 = arith.constant 0 : index
    %57 = vector.load %arg17[%c32, %c0_29] : memref<104x8xf32, #tpu.memory_space<vmem>>, vector<8x8xf32>
    tpu.vector_store %arg17[%c32, %c0_29], %56 {strides = array<i32>} : memref<104x8xf32, #tpu.memory_space<vmem>>, vector<8x8xf32>,
    %c40 = arith.constant 40 : index
    %c0_30 = arith.constant 0 : index
    %58 = vector.load %arg17[%c40, %c0_30] : memref<104x8xf32, #tpu.memory_space<vmem>>, vector<2x8xf32>
    tpu.vector_store %arg17[%c40, %c0_30], %46 {strides = array<i32>} : memref<104x8xf32, #tpu.memory_space<vmem>>, vector<2x8xf32>,
    %c0_31 = arith.constant 0 : index
    %c24 = arith.constant 24 : index
    %c0_32 = arith.constant 0 : index
    %59 = vector.load %arg1[%c0_31, %c24, %c0_32] : memref<1x64x8xf32, #tpu.memory_space<vmem>>, vector<1x8x8xf32>
    %60 = vector.shape_cast %59 : vector<1x8x8xf32> to vector<8x8xf32>
    %c42 = arith.constant 42 : index
    %c0_33 = arith.constant 0 : index
    %61 = vector.load %arg17[%c42, %c0_33] : memref<104x8xf32, #tpu.memory_space<vmem>>, vector<8x8xf32>
    tpu.vector_store %arg17[%c42, %c0_33], %60 {strides = array<i32>} : memref<104x8xf32, #tpu.memory_space<vmem>>, vector<8x8xf32>,
    %c50 = arith.constant 50 : index
    %c0_34 = arith.constant 0 : index
    %62 = vector.load %arg17[%c50, %c0_34] : memref<104x8xf32, #tpu.memory_space<vmem>>, vector<2x8xf32>
    tpu.vector_store %arg17[%c50, %c0_34], %46 {strides = array<i32>} : memref<104x8xf32, #tpu.memory_space<vmem>>, vector<2x8xf32>,
    %c0_35 = arith.constant 0 : index
    %c32_36 = arith.constant 32 : index
    %c0_37 = arith.constant 0 : index
    %63 = vector.load %arg1[%c0_35, %c32_36, %c0_37] : memref<1x64x8xf32, #tpu.memory_space<vmem>>, vector<1x8x8xf32>
    %64 = vector.shape_cast %63 : vector<1x8x8xf32> to vector<8x8xf32>
    %c52 = arith.constant 52 : index
    %c0_38 = arith.constant 0 : index
    %65 = vector.load %arg17[%c52, %c0_38] : memref<104x8xf32, #tpu.memory_space<vmem>>, vector<8x8xf32>
    tpu.vector_store %arg17[%c52, %c0_38], %64 {strides = array<i32>} : memref<104x8xf32, #tpu.memory_space<vmem>>, vector<8x8xf32>,
    %c60 = arith.constant 60 : index
    %c0_39 = arith.constant 0 : index
    %66 = vector.load %arg17[%c60, %c0_39] : memref<104x8xf32, #tpu.memory_space<vmem>>, vector<2x8xf32>
    tpu.vector_store %arg17[%c60, %c0_39], %46 {strides = array<i32>} : memref<104x8xf32, #tpu.memory_space<vmem>>, vector<2x8xf32>,
    %c0_40 = arith.constant 0 : index
    %c40_41 = arith.constant 40 : index
    %c0_42 = arith.constant 0 : index
    %67 = vector.load %arg1[%c0_40, %c40_41, %c0_42] : memref<1x64x8xf32, #tpu.memory_space<vmem>>, vector<1x8x8xf32>
    %68 = vector.shape_cast %67 : vector<1x8x8xf32> to vector<8x8xf32>
    %c62 = arith.constant 62 : index
    %c0_43 = arith.constant 0 : index
    %69 = vector.load %arg17[%c62, %c0_43] : memref<104x8xf32, #tpu.memory_space<vmem>>, vector<8x8xf32>
    tpu.vector_store %arg17[%c62, %c0_43], %68 {strides = array<i32>} : memref<104x8xf32, #tpu.memory_space<vmem>>, vector<8x8xf32>,
    %c70 = arith.constant 70 : index
    %c0_44 = arith.constant 0 : index
    %70 = vector.load %arg17[%c70, %c0_44] : memref<104x8xf32, #tpu.memory_space<vmem>>, vector<2x8xf32>
    tpu.vector_store %arg17[%c70, %c0_44], %46 {strides = array<i32>} : memref<104x8xf32, #tpu.memory_space<vmem>>, vector<2x8xf32>,
    %c0_45 = arith.constant 0 : index
    %c48 = arith.constant 48 : index
    %c0_46 = arith.constant 0 : index
    %71 = vector.load %arg1[%c0_45, %c48, %c0_46] : memref<1x64x8xf32, #tpu.memory_space<vmem>>, vector<1x8x8xf32>
    %72 = vector.shape_cast %71 : vector<1x8x8xf32> to vector<8x8xf32>
    %c72 = arith.constant 72 : index
    %c0_47 = arith.constant 0 : index
    %73 = vector.load %arg17[%c72, %c0_47] : memref<104x8xf32, #tpu.memory_space<vmem>>, vector<8x8xf32>
    tpu.vector_store %arg17[%c72, %c0_47], %72 {strides = array<i32>} : memref<104x8xf32, #tpu.memory_space<vmem>>, vector<8x8xf32>,
    %c80 = arith.constant 80 : index
    %c0_48 = arith.constant 0 : index
    %74 = vector.load %arg17[%c80, %c0_48] : memref<104x8xf32, #tpu.memory_space<vmem>>, vector<2x8xf32>
    tpu.vector_store %arg17[%c80, %c0_48], %46 {strides = array<i32>} : memref<104x8xf32, #tpu.memory_space<vmem>>, vector<2x8xf32>,
    %c0_49 = arith.constant 0 : index
    %c56 = arith.constant 56 : index
    %c0_50 = arith.constant 0 : index
    %75 = vector.load %arg1[%c0_49, %c56, %c0_50] : memref<1x64x8xf32, #tpu.memory_space<vmem>>, vector<1x8x8xf32>
    %76 = vector.shape_cast %75 : vector<1x8x8xf32> to vector<8x8xf32>
    %c82 = arith.constant 82 : index
    %c0_51 = arith.constant 0 : index
    %77 = vector.load %arg17[%c82, %c0_51] : memref<104x8xf32, #tpu.memory_space<vmem>>, vector<8x8xf32>
    tpu.vector_store %arg17[%c82, %c0_51], %76 {strides = array<i32>} : memref<104x8xf32, #tpu.memory_space<vmem>>, vector<8x8xf32>,
    %c90 = arith.constant 90 : index
    %c0_52 = arith.constant 0 : index
    %78 = vector.load %arg17[%c90, %c0_52] : memref<104x8xf32, #tpu.memory_space<vmem>>, vector<2x8xf32>
    tpu.vector_store %arg17[%c90, %c0_52], %46 {strides = array<i32>} : memref<104x8xf32, #tpu.memory_space<vmem>>, vector<2x8xf32>,
    %c0_53 = arith.constant 0 : index
    %c0_54 = arith.constant 0 : index
    %79 = vector.load %arg3[%c0_53, %c0_54] : memref<1x16xf32, #tpu.memory_space<vmem>>, vector<1x16xf32>
    %c0_55 = arith.constant 0 : index
    %c0_56 = arith.constant 0 : index
    %80 = vector.load %arg4[%c0_55, %c0_56] : memref<1x16xf32, #tpu.memory_space<vmem>>, vector<1x16xf32>
    %c0_57 = arith.constant 0 : index
    %c0_58 = arith.constant 0 : index
    %81 = vector.load %arg5[%c0_57, %c0_58] : memref<1x16xf32, #tpu.memory_space<vmem>>, vector<1x16xf32>
    %c1 = arith.constant 1 : index
    %c0_59 = arith.constant 0 : index
    %82 = vector.load %arg17[%c1, %c0_59] : memref<104x8xf32, #tpu.memory_space<vmem>>, vector<80x8xf32>
    %c0_60 = arith.constant 0 : index
    %c0_61 = arith.constant 0 : index
    %c0_62 = arith.constant 0 : index
    %83 = vector.load %arg2[%c0_60, %c0_61, %c0_62] : memref<9x8x16xf32, #tpu.memory_space<vmem>>, vector<1x8x16xf32>
    %84 = vector.shape_cast %83 : vector<1x8x16xf32> to vector<8x16xf32>
    %cst_63 = arith.constant dense<0.000000e+00> : vector<80x16xf32>
    %85 = tpu.matmul %82, %84, %cst_63 {dimension_numbers = #tpu.dot_dimension_numbers<[1], [0], [0], [1], [0, 0, 1, 1], [], []>} : vector<80x8xf32>, vector<8x16xf32>, vector<80x16xf32> -> vector<80x16xf32>
    %86 = vector.broadcast %79 : vector<1x16xf32> to vector<80x16xf32>
    %87 = arith.addf %85, %86 : vector<80x16xf32>
    %c0_64 = arith.constant 0 : index
    %c0_65 = arith.constant 0 : index
    %88 = vector.load %arg19[%c0_64, %c0_65] : memref<80x16xf32, #tpu.memory_space<vmem>>, vector<80x16xf32>
    tpu.vector_store %arg19[%c0_64, %c0_65], %87 {strides = array<i32>} : memref<80x16xf32, #tpu.memory_space<vmem>>, vector<80x16xf32>,
    %c2 = arith.constant 2 : index
    %c0_66 = arith.constant 0 : index
    %89 = vector.load %arg17[%c2, %c0_66] : memref<104x8xf32, #tpu.memory_space<vmem>>, vector<80x8xf32>
    %c1_67 = arith.constant 1 : index
    %c0_68 = arith.constant 0 : index
    %c0_69 = arith.constant 0 : index
    %90 = vector.load %arg2[%c1_67, %c0_68, %c0_69] : memref<9x8x16xf32, #tpu.memory_space<vmem>>, vector<1x8x16xf32>
    %91 = vector.shape_cast %90 : vector<1x8x16xf32> to vector<8x16xf32>
    %cst_70 = arith.constant dense<0.000000e+00> : vector<80x16xf32>
    %92 = tpu.matmul %89, %91, %cst_70 {dimension_numbers = #tpu.dot_dimension_numbers<[1], [0], [0], [1], [0, 0, 1, 1], [], []>} : vector<80x8xf32>, vector<8x16xf32>, vector<80x16xf32> -> vector<80x16xf32>
    %c0_71 = arith.constant 0 : index
    %c0_72 = arith.constant 0 : index
    %93 = vector.load %arg19[%c0_71, %c0_72] : memref<80x16xf32, #tpu.memory_space<vmem>>, vector<80x16xf32>
    %94 = arith.addf %93, %92 : vector<80x16xf32>
    %c0_73 = arith.constant 0 : index
    %c0_74 = arith.constant 0 : index
    %95 = vector.load %arg19[%c0_73, %c0_74] : memref<80x16xf32, #tpu.memory_space<vmem>>, vector<80x16xf32>
    tpu.vector_store %arg19[%c0_73, %c0_74], %94 {strides = array<i32>} : memref<80x16xf32, #tpu.memory_space<vmem>>, vector<80x16xf32>,
    %c3 = arith.constant 3 : index
    %c0_75 = arith.constant 0 : index
    %96 = vector.load %arg17[%c3, %c0_75] : memref<104x8xf32, #tpu.memory_space<vmem>>, vector<80x8xf32>
    %c2_76 = arith.constant 2 : index
    %c0_77 = arith.constant 0 : index
    %c0_78 = arith.constant 0 : index
    %97 = vector.load %arg2[%c2_76, %c0_77, %c0_78] : memref<9x8x16xf32, #tpu.memory_space<vmem>>, vector<1x8x16xf32>
    %98 = vector.shape_cast %97 : vector<1x8x16xf32> to vector<8x16xf32>
    %cst_79 = arith.constant dense<0.000000e+00> : vector<80x16xf32>
    %99 = tpu.matmul %96, %98, %cst_79 {dimension_numbers = #tpu.dot_dimension_numbers<[1], [0], [0], [1], [0, 0, 1, 1], [], []>} : vector<80x8xf32>, vector<8x16xf32>, vector<80x16xf32> -> vector<80x16xf32>
    %c0_80 = arith.constant 0 : index
    %c0_81 = arith.constant 0 : index
    %100 = vector.load %arg19[%c0_80, %c0_81] : memref<80x16xf32, #tpu.memory_space<vmem>>, vector<80x16xf32>
    %101 = arith.addf %100, %99 : vector<80x16xf32>
    %c0_82 = arith.constant 0 : index
    %c0_83 = arith.constant 0 : index
    %102 = vector.load %arg19[%c0_82, %c0_83] : memref<80x16xf32, #tpu.memory_space<vmem>>, vector<80x16xf32>
    tpu.vector_store %arg19[%c0_82, %c0_83], %101 {strides = array<i32>} : memref<80x16xf32, #tpu.memory_space<vmem>>, vector<80x16xf32>,
    %c11 = arith.constant 11 : index
    %c0_84 = arith.constant 0 : index
    %103 = vector.load %arg17[%c11, %c0_84] : memref<104x8xf32, #tpu.memory_space<vmem>>, vector<80x8xf32>
    %c3_85 = arith.constant 3 : index
    %c0_86 = arith.constant 0 : index
    %c0_87 = arith.constant 0 : index
    %104 = vector.load %arg2[%c3_85, %c0_86, %c0_87] : memref<9x8x16xf32, #tpu.memory_space<vmem>>, vector<1x8x16xf32>
    %105 = vector.shape_cast %104 : vector<1x8x16xf32> to vector<8x16xf32>
    %cst_88 = arith.constant dense<0.000000e+00> : vector<80x16xf32>
    %106 = tpu.matmul %103, %105, %cst_88 {dimension_numbers = #tpu.dot_dimension_numbers<[1], [0], [0], [1], [0, 0, 1, 1], [], []>} : vector<80x8xf32>, vector<8x16xf32>, vector<80x16xf32> -> vector<80x16xf32>
    %c0_89 = arith.constant 0 : index
    %c0_90 = arith.constant 0 : index
    %107 = vector.load %arg19[%c0_89, %c0_90] : memref<80x16xf32, #tpu.memory_space<vmem>>, vector<80x16xf32>
    %108 = arith.addf %107, %106 : vector<80x16xf32>
    %c0_91 = arith.constant 0 : index
    %c0_92 = arith.constant 0 : index
    %109 = vector.load %arg19[%c0_91, %c0_92] : memref<80x16xf32, #tpu.memory_space<vmem>>, vector<80x16xf32>
    tpu.vector_store %arg19[%c0_91, %c0_92], %108 {strides = array<i32>} : memref<80x16xf32, #tpu.memory_space<vmem>>, vector<80x16xf32>,
    %c12_93 = arith.constant 12 : index
    %c0_94 = arith.constant 0 : index
    %110 = vector.load %arg17[%c12_93, %c0_94] : memref<104x8xf32, #tpu.memory_space<vmem>>, vector<80x8xf32>
    %c4 = arith.constant 4 : index
    %c0_95 = arith.constant 0 : index
    %c0_96 = arith.constant 0 : index
    %111 = vector.load %arg2[%c4, %c0_95, %c0_96] : memref<9x8x16xf32, #tpu.memory_space<vmem>>, vector<1x8x16xf32>
    %112 = vector.shape_cast %111 : vector<1x8x16xf32> to vector<8x16xf32>
    %cst_97 = arith.constant dense<0.000000e+00> : vector<80x16xf32>
    %113 = tpu.matmul %110, %112, %cst_97 {dimension_numbers = #tpu.dot_dimension_numbers<[1], [0], [0], [1], [0, 0, 1, 1], [], []>} : vector<80x8xf32>, vector<8x16xf32>, vector<80x16xf32> -> vector<80x16xf32>
    %c0_98 = arith.constant 0 : index
    %c0_99 = arith.constant 0 : index
    %114 = vector.load %arg19[%c0_98, %c0_99] : memref<80x16xf32, #tpu.memory_space<vmem>>, vector<80x16xf32>
    %115 = arith.addf %114, %113 : vector<80x16xf32>
    %c0_100 = arith.constant 0 : index
    %c0_101 = arith.constant 0 : index
    %116 = vector.load %arg19[%c0_100, %c0_101] : memref<80x16xf32, #tpu.memory_space<vmem>>, vector<80x16xf32>
    tpu.vector_store %arg19[%c0_100, %c0_101], %115 {strides = array<i32>} : memref<80x16xf32, #tpu.memory_space<vmem>>, vector<80x16xf32>,
    %c13 = arith.constant 13 : index
    %c0_102 = arith.constant 0 : index
    %117 = vector.load %arg17[%c13, %c0_102] : memref<104x8xf32, #tpu.memory_space<vmem>>, vector<80x8xf32>
    %c5 = arith.constant 5 : index
    %c0_103 = arith.constant 0 : index
    %c0_104 = arith.constant 0 : index
    %118 = vector.load %arg2[%c5, %c0_103, %c0_104] : memref<9x8x16xf32, #tpu.memory_space<vmem>>, vector<1x8x16xf32>
    %119 = vector.shape_cast %118 : vector<1x8x16xf32> to vector<8x16xf32>
    %cst_105 = arith.constant dense<0.000000e+00> : vector<80x16xf32>
    %120 = tpu.matmul %117, %119, %cst_105 {dimension_numbers = #tpu.dot_dimension_numbers<[1], [0], [0], [1], [0, 0, 1, 1], [], []>} : vector<80x8xf32>, vector<8x16xf32>, vector<80x16xf32> -> vector<80x16xf32>
    %c0_106 = arith.constant 0 : index
    %c0_107 = arith.constant 0 : index
    %121 = vector.load %arg19[%c0_106, %c0_107] : memref<80x16xf32, #tpu.memory_space<vmem>>, vector<80x16xf32>
    %122 = arith.addf %121, %120 : vector<80x16xf32>
    %c0_108 = arith.constant 0 : index
    %c0_109 = arith.constant 0 : index
    %123 = vector.load %arg19[%c0_108, %c0_109] : memref<80x16xf32, #tpu.memory_space<vmem>>, vector<80x16xf32>
    tpu.vector_store %arg19[%c0_108, %c0_109], %122 {strides = array<i32>} : memref<80x16xf32, #tpu.memory_space<vmem>>, vector<80x16xf32>,
    %c21 = arith.constant 21 : index
    %c0_110 = arith.constant 0 : index
    %124 = vector.load %arg17[%c21, %c0_110] : memref<104x8xf32, #tpu.memory_space<vmem>>, vector<80x8xf32>
    %c6 = arith.constant 6 : index
    %c0_111 = arith.constant 0 : index
    %c0_112 = arith.constant 0 : index
    %125 = vector.load %arg2[%c6, %c0_111, %c0_112] : memref<9x8x16xf32, #tpu.memory_space<vmem>>, vector<1x8x16xf32>
    %126 = vector.shape_cast %125 : vector<1x8x16xf32> to vector<8x16xf32>
    %cst_113 = arith.constant dense<0.000000e+00> : vector<80x16xf32>
    %127 = tpu.matmul %124, %126, %cst_113 {dimension_numbers = #tpu.dot_dimension_numbers<[1], [0], [0], [1], [0, 0, 1, 1], [], []>} : vector<80x8xf32>, vector<8x16xf32>, vector<80x16xf32> -> vector<80x16xf32>
    %c0_114 = arith.constant 0 : index
    %c0_115 = arith.constant 0 : index
    %128 = vector.load %arg19[%c0_114, %c0_115] : memref<80x16xf32, #tpu.memory_space<vmem>>, vector<80x16xf32>
    %129 = arith.addf %128, %127 : vector<80x16xf32>
    %c0_116 = arith.constant 0 : index
    %c0_117 = arith.constant 0 : index
    %130 = vector.load %arg19[%c0_116, %c0_117] : memref<80x16xf32, #tpu.memory_space<vmem>>, vector<80x16xf32>
    tpu.vector_store %arg19[%c0_116, %c0_117], %129 {strides = array<i32>} : memref<80x16xf32, #tpu.memory_space<vmem>>, vector<80x16xf32>,
    %c22_118 = arith.constant 22 : index
    %c0_119 = arith.constant 0 : index
    %131 = vector.load %arg17[%c22_118, %c0_119] : memref<104x8xf32, #tpu.memory_space<vmem>>, vector<80x8xf32>
    %c7 = arith.constant 7 : index
    %c0_120 = arith.constant 0 : index
    %c0_121 = arith.constant 0 : index
    %132 = vector.load %arg2[%c7, %c0_120, %c0_121] : memref<9x8x16xf32, #tpu.memory_space<vmem>>, vector<1x8x16xf32>
    %133 = vector.shape_cast %132 : vector<1x8x16xf32> to vector<8x16xf32>
    %cst_122 = arith.constant dense<0.000000e+00> : vector<80x16xf32>
    %134 = tpu.matmul %131, %133, %cst_122 {dimension_numbers = #tpu.dot_dimension_numbers<[1], [0], [0], [1], [0, 0, 1, 1], [], []>} : vector<80x8xf32>, vector<8x16xf32>, vector<80x16xf32> -> vector<80x16xf32>
    %c0_123 = arith.constant 0 : index
    %c0_124 = arith.constant 0 : index
    %135 = vector.load %arg19[%c0_123, %c0_124] : memref<80x16xf32, #tpu.memory_space<vmem>>, vector<80x16xf32>
    %136 = arith.addf %135, %134 : vector<80x16xf32>
    %c0_125 = arith.constant 0 : index
    %c0_126 = arith.constant 0 : index
    %137 = vector.load %arg19[%c0_125, %c0_126] : memref<80x16xf32, #tpu.memory_space<vmem>>, vector<80x16xf32>
    tpu.vector_store %arg19[%c0_125, %c0_126], %136 {strides = array<i32>} : memref<80x16xf32, #tpu.memory_space<vmem>>, vector<80x16xf32>,
    %c23 = arith.constant 23 : index
    %c0_127 = arith.constant 0 : index
    %138 = vector.load %arg17[%c23, %c0_127] : memref<104x8xf32, #tpu.memory_space<vmem>>, vector<80x8xf32>
    %c8_128 = arith.constant 8 : index
    %c0_129 = arith.constant 0 : index
    %c0_130 = arith.constant 0 : index
    %139 = vector.load %arg2[%c8_128, %c0_129, %c0_130] : memref<9x8x16xf32, #tpu.memory_space<vmem>>, vector<1x8x16xf32>
    %140 = vector.shape_cast %139 : vector<1x8x16xf32> to vector<8x16xf32>
    %cst_131 = arith.constant dense<0.000000e+00> : vector<80x16xf32>
    %141 = tpu.matmul %138, %140, %cst_131 {dimension_numbers = #tpu.dot_dimension_numbers<[1], [0], [0], [1], [0, 0, 1, 1], [], []>} : vector<80x8xf32>, vector<8x16xf32>, vector<80x16xf32> -> vector<80x16xf32>
    %c0_132 = arith.constant 0 : index
    %c0_133 = arith.constant 0 : index
    %142 = vector.load %arg19[%c0_132, %c0_133] : memref<80x16xf32, #tpu.memory_space<vmem>>, vector<80x16xf32>
    %143 = arith.addf %142, %141 : vector<80x16xf32>
    %c0_134 = arith.constant 0 : index
    %c0_135 = arith.constant 0 : index
    %144 = vector.load %arg19[%c0_134, %c0_135] : memref<80x16xf32, #tpu.memory_space<vmem>>, vector<80x16xf32>
    tpu.vector_store %arg19[%c0_134, %c0_135], %143 {strides = array<i32>} : memref<80x16xf32, #tpu.memory_space<vmem>>, vector<80x16xf32>,
    %c0_136 = arith.constant 0 : index
    %c0_137 = arith.constant 0 : index
    %145 = vector.load %arg19[%c0_136, %c0_137] : memref<80x16xf32, #tpu.memory_space<vmem>>, vector<80x16xf32>
    %cst_138 = arith.constant dense<0.000000e+00> : vector<1x16xf32>
    %146 = tpu.matmul %20, %145, %cst_138 {dimension_numbers = #tpu.dot_dimension_numbers<[1], [0], [0], [1], [0, 0, 1, 1], [], []>} : vector<1x80xf32>, vector<80x16xf32>, vector<1x16xf32> -> vector<1x16xf32>
    %147 = arith.mulf %145, %145 : vector<80x16xf32>
    %cst_139 = arith.constant dense<0.000000e+00> : vector<1x16xf32>
    %148 = tpu.matmul %20, %147, %cst_139 {dimension_numbers = #tpu.dot_dimension_numbers<[1], [0], [0], [1], [0, 0, 1, 1], [], []>} : vector<1x80xf32>, vector<80x16xf32>, vector<1x16xf32> -> vector<1x16xf32>
    %cst_140 = arith.constant dense<0.000000e+00> : vector<1x8xf32>
    %149 = tpu.matmul %146, %40, %cst_140 {dimension_numbers = #tpu.dot_dimension_numbers<[1], [0], [0], [1], [0, 0, 1, 1], [], []>} : vector<1x16xf32>, vector<16x8xf32>, vector<1x8xf32> -> vector<1x8xf32>
    %cst_141 = arith.constant dense<0.000000e+00> : vector<1x8xf32>
    %150 = tpu.matmul %148, %40, %cst_141 {dimension_numbers = #tpu.dot_dimension_numbers<[1], [0], [0], [1], [0, 0, 1, 1], [], []>} : vector<1x16xf32>, vector<16x8xf32>, vector<1x8xf32> -> vector<1x8xf32>
    %cst_142 = arith.constant 1.280000e+02 : f32
    %151 = vector.broadcast %cst_142 : f32 to vector<1x8xf32>
    %152 = arith.divf %149, %151 : vector<1x8xf32>
    %cst_143 = arith.constant 1.280000e+02 : f32
    %153 = vector.broadcast %cst_143 : f32 to vector<1x8xf32>
    %154 = arith.divf %150, %153 : vector<1x8xf32>
    %155 = arith.mulf %152, %152 : vector<1x8xf32>
    %156 = arith.subf %154, %155 : vector<1x8xf32>
    %cst_144 = arith.constant 0.000000e+00 : f32
    %157 = vector.broadcast %cst_144 : f32 to vector<1x8xf32>
    %158 = arith.maximumf %156, %157 : vector<1x8xf32>
    %cst_145 = arith.constant 9.99999974E-6 : f32
    %159 = vector.broadcast %cst_145 : f32 to vector<1x8xf32>
    %160 = arith.addf %158, %159 : vector<1x8xf32>
    %161 = math.rsqrt %160 : vector<1x8xf32>
    %cst_146 = arith.constant dense<0.000000e+00> : vector<1x16xf32>
    %162 = tpu.matmul %152, %41, %cst_146 {dimension_numbers = #tpu.dot_dimension_numbers<[1], [0], [0], [1], [0, 0, 1, 1], [], []>} : vector<1x8xf32>, vector<8x16xf32>, vector<1x16xf32> -> vector<1x16xf32>
    %cst_147 = arith.constant dense<0.000000e+00> : vector<1x16xf32>
    %163 = tpu.matmul %161, %41, %cst_147 {dimension_numbers = #tpu.dot_dimension_numbers<[1], [0], [0], [1], [0, 0, 1, 1], [], []>} : vector<1x8xf32>, vector<8x16xf32>, vector<1x16xf32> -> vector<1x16xf32>
    %164 = vector.broadcast %162 : vector<1x16xf32> to vector<80x16xf32>
    %165 = arith.subf %145, %164 : vector<80x16xf32>
    %166 = arith.mulf %163, %80 : vector<1x16xf32>
    %167 = vector.broadcast %166 : vector<1x16xf32> to vector<80x16xf32>
    %168 = arith.mulf %165, %167 : vector<80x16xf32>
    %169 = vector.broadcast %81 : vector<1x16xf32> to vector<80x16xf32>
    %170 = arith.addf %168, %169 : vector<80x16xf32>
    %c0_148 = arith.constant 0 : index
    %c0_149 = arith.constant 0 : index
    %c0_150 = arith.constant 0 : index
    %171 = vector.load %arg6[%c0_148, %c0_149, %c0_150] : memref<1x1x16xf32, #tpu.memory_space<vmem>>, vector<1x1x16xf32>
    %172 = vector.shape_cast %171 : vector<1x1x16xf32> to vector<1x16xf32>
    %cst_151 = arith.constant 1.000000e+00 : f32
    %173 = vector.broadcast %cst_151 : f32 to vector<1x16xf32>
    %174 = arith.addf %172, %173 : vector<1x16xf32>
    %175 = vector.broadcast %174 : vector<1x16xf32> to vector<80x16xf32>
    %176 = arith.mulf %170, %175 : vector<80x16xf32>
    %c0_152 = arith.constant 0 : index
    %c0_153 = arith.constant 0 : index
    %c0_154 = arith.constant 0 : index
    %177 = vector.load %arg7[%c0_152, %c0_153, %c0_154] : memref<1x1x16xf32, #tpu.memory_space<vmem>>, vector<1x1x16xf32>
    %178 = vector.shape_cast %177 : vector<1x1x16xf32> to vector<1x16xf32>
    %179 = vector.broadcast %178 : vector<1x16xf32> to vector<80x16xf32>
    %180 = arith.addf %176, %179 : vector<80x16xf32>
    %181 = arith.negf %180 : vector<80x16xf32>
    %182 = math.exp %181 : vector<80x16xf32>
    %cst_155 = arith.constant 1.000000e+00 : f32
    %183 = vector.broadcast %cst_155 : f32 to vector<80x16xf32>
    %184 = arith.addf %183, %182 : vector<80x16xf32>
    %185 = arith.divf %183, %184 : vector<80x16xf32>
    %186 = arith.mulf %180, %185 : vector<80x16xf32>
    %cst_156 = arith.constant 0.000000e+00 : f32
    %187 = vector.broadcast %cst_156 : f32 to vector<12x16xf32>
    %c0_157 = arith.constant 0 : index
    %c0_158 = arith.constant 0 : index
    %188 = vector.load %arg18[%c0_157, %c0_158] : memref<104x16xf32, #tpu.memory_space<vmem>>, vector<12x16xf32>
    tpu.vector_store %arg18[%c0_157, %c0_158], %187 {strides = array<i32>} : memref<104x16xf32, #tpu.memory_space<vmem>>, vector<12x16xf32>,
    %cst_159 = arith.constant 0.000000e+00 : f32
    %189 = vector.broadcast %cst_159 : f32 to vector<12x16xf32>
    %c92_160 = arith.constant 92 : index
    %c0_161 = arith.constant 0 : index
    %190 = vector.load %arg18[%c92_160, %c0_161] : memref<104x16xf32, #tpu.memory_space<vmem>>, vector<12x16xf32>
    tpu.vector_store %arg18[%c92_160, %c0_161], %189 {strides = array<i32>} : memref<104x16xf32, #tpu.memory_space<vmem>>, vector<12x16xf32>,
    %cst_162 = arith.constant 0.000000e+00 : f32
    %191 = vector.shape_cast %39 : vector<80x1xi1> to vector<80x1xi1>
    %192 = vector.broadcast %191 : vector<80x1xi1> to vector<80x16xi1>
    %193 = vector.broadcast %cst_162 : f32 to vector<80x16xf32>
    %194 = arith.select %192, %186, %193 : vector<80x16xi1>, vector<80x16xf32>
    %c12_163 = arith.constant 12 : index
    %c0_164 = arith.constant 0 : index
    %195 = vector.load %arg18[%c12_163, %c0_164] : memref<104x16xf32, #tpu.memory_space<vmem>>, vector<80x16xf32>
    tpu.vector_store %arg18[%c12_163, %c0_164], %194 {strides = array<i32>} : memref<104x16xf32, #tpu.memory_space<vmem>>, vector<80x16xf32>,
    %c0_165 = arith.constant 0 : index
    %c0_166 = arith.constant 0 : index
    %196 = vector.load %arg9[%c0_165, %c0_166] : memref<1x16xf32, #tpu.memory_space<vmem>>, vector<1x16xf32>
    %c0_167 = arith.constant 0 : index
    %c0_168 = arith.constant 0 : index
    %197 = vector.load %arg10[%c0_167, %c0_168] : memref<1x16xf32, #tpu.memory_space<vmem>>, vector<1x16xf32>
    %c0_169 = arith.constant 0 : index
    %c0_170 = arith.constant 0 : index
    %198 = vector.load %arg11[%c0_169, %c0_170] : memref<1x16xf32, #tpu.memory_space<vmem>>, vector<1x16xf32>
    %c1_171 = arith.constant 1 : index
    %c0_172 = arith.constant 0 : index
    %199 = vector.load %arg18[%c1_171, %c0_172] : memref<104x16xf32, #tpu.memory_space<vmem>>, vector<80x16xf32>
    %c0_173 = arith.constant 0 : index
    %c0_174 = arith.constant 0 : index
    %c0_175 = arith.constant 0 : index
    %200 = vector.load %arg8[%c0_173, %c0_174, %c0_175] : memref<9x16x16xf32, #tpu.memory_space<vmem>>, vector<1x16x16xf32>
    %201 = vector.shape_cast %200 : vector<1x16x16xf32> to vector<16x16xf32>
    %cst_176 = arith.constant dense<0.000000e+00> : vector<80x16xf32>
    %202 = tpu.matmul %199, %201, %cst_176 {dimension_numbers = #tpu.dot_dimension_numbers<[1], [0], [0], [1], [0, 0, 1, 1], [], []>} : vector<80x16xf32>, vector<16x16xf32>, vector<80x16xf32> -> vector<80x16xf32>
    %203 = vector.broadcast %196 : vector<1x16xf32> to vector<80x16xf32>
    %204 = arith.addf %202, %203 : vector<80x16xf32>
    %c0_177 = arith.constant 0 : index
    %c0_178 = arith.constant 0 : index
    %205 = vector.load %arg19[%c0_177, %c0_178] : memref<80x16xf32, #tpu.memory_space<vmem>>, vector<80x16xf32>
    tpu.vector_store %arg19[%c0_177, %c0_178], %204 {strides = array<i32>} : memref<80x16xf32, #tpu.memory_space<vmem>>, vector<80x16xf32>,
    %c2_179 = arith.constant 2 : index
    %c0_180 = arith.constant 0 : index
    %206 = vector.load %arg18[%c2_179, %c0_180] : memref<104x16xf32, #tpu.memory_space<vmem>>, vector<80x16xf32>
    %c1_181 = arith.constant 1 : index
    %c0_182 = arith.constant 0 : index
    %c0_183 = arith.constant 0 : index
    %207 = vector.load %arg8[%c1_181, %c0_182, %c0_183] : memref<9x16x16xf32, #tpu.memory_space<vmem>>, vector<1x16x16xf32>
    %208 = vector.shape_cast %207 : vector<1x16x16xf32> to vector<16x16xf32>
    %cst_184 = arith.constant dense<0.000000e+00> : vector<80x16xf32>
    %209 = tpu.matmul %206, %208, %cst_184 {dimension_numbers = #tpu.dot_dimension_numbers<[1], [0], [0], [1], [0, 0, 1, 1], [], []>} : vector<80x16xf32>, vector<16x16xf32>, vector<80x16xf32> -> vector<80x16xf32>
    %c0_185 = arith.constant 0 : index
    %c0_186 = arith.constant 0 : index
    %210 = vector.load %arg19[%c0_185, %c0_186] : memref<80x16xf32, #tpu.memory_space<vmem>>, vector<80x16xf32>
    %211 = arith.addf %210, %209 : vector<80x16xf32>
    %c0_187 = arith.constant 0 : index
    %c0_188 = arith.constant 0 : index
    %212 = vector.load %arg19[%c0_187, %c0_188] : memref<80x16xf32, #tpu.memory_space<vmem>>, vector<80x16xf32>
    tpu.vector_store %arg19[%c0_187, %c0_188], %211 {strides = array<i32>} : memref<80x16xf32, #tpu.memory_space<vmem>>, vector<80x16xf32>,
    %c3_189 = arith.constant 3 : index
    %c0_190 = arith.constant 0 : index
    %213 = vector.load %arg18[%c3_189, %c0_190] : memref<104x16xf32, #tpu.memory_space<vmem>>, vector<80x16xf32>
    %c2_191 = arith.constant 2 : index
    %c0_192 = arith.constant 0 : index
    %c0_193 = arith.constant 0 : index
    %214 = vector.load %arg8[%c2_191, %c0_192, %c0_193] : memref<9x16x16xf32, #tpu.memory_space<vmem>>, vector<1x16x16xf32>
    %215 = vector.shape_cast %214 : vector<1x16x16xf32> to vector<16x16xf32>
    %cst_194 = arith.constant dense<0.000000e+00> : vector<80x16xf32>
    %216 = tpu.matmul %213, %215, %cst_194 {dimension_numbers = #tpu.dot_dimension_numbers<[1], [0], [0], [1], [0, 0, 1, 1], [], []>} : vector<80x16xf32>, vector<16x16xf32>, vector<80x16xf32> -> vector<80x16xf32>
    %c0_195 = arith.constant 0 : index
    %c0_196 = arith.constant 0 : index
    %217 = vector.load %arg19[%c0_195, %c0_196] : memref<80x16xf32, #tpu.memory_space<vmem>>, vector<80x16xf32>
    %218 = arith.addf %217, %216 : vector<80x16xf32>
    %c0_197 = arith.constant 0 : index
    %c0_198 = arith.constant 0 : index
    %219 = vector.load %arg19[%c0_197, %c0_198] : memref<80x16xf32, #tpu.memory_space<vmem>>, vector<80x16xf32>
    tpu.vector_store %arg19[%c0_197, %c0_198], %218 {strides = array<i32>} : memref<80x16xf32, #tpu.memory_space<vmem>>, vector<80x16xf32>,
    %c11_199 = arith.constant 11 : index
    %c0_200 = arith.constant 0 : index
    %220 = vector.load %arg18[%c11_199, %c0_200] : memref<104x16xf32, #tpu.memory_space<vmem>>, vector<80x16xf32>
    %c3_201 = arith.constant 3 : index
    %c0_202 = arith.constant 0 : index
    %c0_203 = arith.constant 0 : index
    %221 = vector.load %arg8[%c3_201, %c0_202, %c0_203] : memref<9x16x16xf32, #tpu.memory_space<vmem>>, vector<1x16x16xf32>
    %222 = vector.shape_cast %221 : vector<1x16x16xf32> to vector<16x16xf32>
    %cst_204 = arith.constant dense<0.000000e+00> : vector<80x16xf32>
    %223 = tpu.matmul %220, %222, %cst_204 {dimension_numbers = #tpu.dot_dimension_numbers<[1], [0], [0], [1], [0, 0, 1, 1], [], []>} : vector<80x16xf32>, vector<16x16xf32>, vector<80x16xf32> -> vector<80x16xf32>
    %c0_205 = arith.constant 0 : index
    %c0_206 = arith.constant 0 : index
    %224 = vector.load %arg19[%c0_205, %c0_206] : memref<80x16xf32, #tpu.memory_space<vmem>>, vector<80x16xf32>
    %225 = arith.addf %224, %223 : vector<80x16xf32>
    %c0_207 = arith.constant 0 : index
    %c0_208 = arith.constant 0 : index
    %226 = vector.load %arg19[%c0_207, %c0_208] : memref<80x16xf32, #tpu.memory_space<vmem>>, vector<80x16xf32>
    tpu.vector_store %arg19[%c0_207, %c0_208], %225 {strides = array<i32>} : memref<80x16xf32, #tpu.memory_space<vmem>>, vector<80x16xf32>,
    %c12_209 = arith.constant 12 : index
    %c0_210 = arith.constant 0 : index
    %227 = vector.load %arg18[%c12_209, %c0_210] : memref<104x16xf32, #tpu.memory_space<vmem>>, vector<80x16xf32>
    %c4_211 = arith.constant 4 : index
    %c0_212 = arith.constant 0 : index
    %c0_213 = arith.constant 0 : index
    %228 = vector.load %arg8[%c4_211, %c0_212, %c0_213] : memref<9x16x16xf32, #tpu.memory_space<vmem>>, vector<1x16x16xf32>
    %229 = vector.shape_cast %228 : vector<1x16x16xf32> to vector<16x16xf32>
    %cst_214 = arith.constant dense<0.000000e+00> : vector<80x16xf32>
    %230 = tpu.matmul %227, %229, %cst_214 {dimension_numbers = #tpu.dot_dimension_numbers<[1], [0], [0], [1], [0, 0, 1, 1], [], []>} : vector<80x16xf32>, vector<16x16xf32>, vector<80x16xf32> -> vector<80x16xf32>
    %c0_215 = arith.constant 0 : index
    %c0_216 = arith.constant 0 : index
    %231 = vector.load %arg19[%c0_215, %c0_216] : memref<80x16xf32, #tpu.memory_space<vmem>>, vector<80x16xf32>
    %232 = arith.addf %231, %230 : vector<80x16xf32>
    %c0_217 = arith.constant 0 : index
    %c0_218 = arith.constant 0 : index
    %233 = vector.load %arg19[%c0_217, %c0_218] : memref<80x16xf32, #tpu.memory_space<vmem>>, vector<80x16xf32>
    tpu.vector_store %arg19[%c0_217, %c0_218], %232 {strides = array<i32>} : memref<80x16xf32, #tpu.memory_space<vmem>>, vector<80x16xf32>,
    %c13_219 = arith.constant 13 : index
    %c0_220 = arith.constant 0 : index
    %234 = vector.load %arg18[%c13_219, %c0_220] : memref<104x16xf32, #tpu.memory_space<vmem>>, vector<80x16xf32>
    %c5_221 = arith.constant 5 : index
    %c0_222 = arith.constant 0 : index
    %c0_223 = arith.constant 0 : index
    %235 = vector.load %arg8[%c5_221, %c0_222, %c0_223] : memref<9x16x16xf32, #tpu.memory_space<vmem>>, vector<1x16x16xf32>
    %236 = vector.shape_cast %235 : vector<1x16x16xf32> to vector<16x16xf32>
    %cst_224 = arith.constant dense<0.000000e+00> : vector<80x16xf32>
    %237 = tpu.matmul %234, %236, %cst_224 {dimension_numbers = #tpu.dot_dimension_numbers<[1], [0], [0], [1], [0, 0, 1, 1], [], []>} : vector<80x16xf32>, vector<16x16xf32>, vector<80x16xf32> -> vector<80x16xf32>
    %c0_225 = arith.constant 0 : index
    %c0_226 = arith.constant 0 : index
    %238 = vector.load %arg19[%c0_225, %c0_226] : memref<80x16xf32, #tpu.memory_space<vmem>>, vector<80x16xf32>
    %239 = arith.addf %238, %237 : vector<80x16xf32>
    %c0_227 = arith.constant 0 : index
    %c0_228 = arith.constant 0 : index
    %240 = vector.load %arg19[%c0_227, %c0_228] : memref<80x16xf32, #tpu.memory_space<vmem>>, vector<80x16xf32>
    tpu.vector_store %arg19[%c0_227, %c0_228], %239 {strides = array<i32>} : memref<80x16xf32, #tpu.memory_space<vmem>>, vector<80x16xf32>,
    %c21_229 = arith.constant 21 : index
    %c0_230 = arith.constant 0 : index
    %241 = vector.load %arg18[%c21_229, %c0_230] : memref<104x16xf32, #tpu.memory_space<vmem>>, vector<80x16xf32>
    %c6_231 = arith.constant 6 : index
    %c0_232 = arith.constant 0 : index
    %c0_233 = arith.constant 0 : index
    %242 = vector.load %arg8[%c6_231, %c0_232, %c0_233] : memref<9x16x16xf32, #tpu.memory_space<vmem>>, vector<1x16x16xf32>
    %243 = vector.shape_cast %242 : vector<1x16x16xf32> to vector<16x16xf32>
    %cst_234 = arith.constant dense<0.000000e+00> : vector<80x16xf32>
    %244 = tpu.matmul %241, %243, %cst_234 {dimension_numbers = #tpu.dot_dimension_numbers<[1], [0], [0], [1], [0, 0, 1, 1], [], []>} : vector<80x16xf32>, vector<16x16xf32>, vector<80x16xf32> -> vector<80x16xf32>
    %c0_235 = arith.constant 0 : index
    %c0_236 = arith.constant 0 : index
    %245 = vector.load %arg19[%c0_235, %c0_236] : memref<80x16xf32, #tpu.memory_space<vmem>>, vector<80x16xf32>
    %246 = arith.addf %245, %244 : vector<80x16xf32>
    %c0_237 = arith.constant 0 : index
    %c0_238 = arith.constant 0 : index
    %247 = vector.load %arg19[%c0_237, %c0_238] : memref<80x16xf32, #tpu.memory_space<vmem>>, vector<80x16xf32>
    tpu.vector_store %arg19[%c0_237, %c0_238], %246 {strides = array<i32>} : memref<80x16xf32, #tpu.memory_space<vmem>>, vector<80x16xf32>,
    %c22_239 = arith.constant 22 : index
    %c0_240 = arith.constant 0 : index
    %248 = vector.load %arg18[%c22_239, %c0_240] : memref<104x16xf32, #tpu.memory_space<vmem>>, vector<80x16xf32>
    %c7_241 = arith.constant 7 : index
    %c0_242 = arith.constant 0 : index
    %c0_243 = arith.constant 0 : index
    %249 = vector.load %arg8[%c7_241, %c0_242, %c0_243] : memref<9x16x16xf32, #tpu.memory_space<vmem>>, vector<1x16x16xf32>
    %250 = vector.shape_cast %249 : vector<1x16x16xf32> to vector<16x16xf32>
    %cst_244 = arith.constant dense<0.000000e+00> : vector<80x16xf32>
    %251 = tpu.matmul %248, %250, %cst_244 {dimension_numbers = #tpu.dot_dimension_numbers<[1], [0], [0], [1], [0, 0, 1, 1], [], []>} : vector<80x16xf32>, vector<16x16xf32>, vector<80x16xf32> -> vector<80x16xf32>
    %c0_245 = arith.constant 0 : index
    %c0_246 = arith.constant 0 : index
    %252 = vector.load %arg19[%c0_245, %c0_246] : memref<80x16xf32, #tpu.memory_space<vmem>>, vector<80x16xf32>
    %253 = arith.addf %252, %251 : vector<80x16xf32>
    %c0_247 = arith.constant 0 : index
    %c0_248 = arith.constant 0 : index
    %254 = vector.load %arg19[%c0_247, %c0_248] : memref<80x16xf32, #tpu.memory_space<vmem>>, vector<80x16xf32>
    tpu.vector_store %arg19[%c0_247, %c0_248], %253 {strides = array<i32>} : memref<80x16xf32, #tpu.memory_space<vmem>>, vector<80x16xf32>,
    %c23_249 = arith.constant 23 : index
    %c0_250 = arith.constant 0 : index
    %255 = vector.load %arg18[%c23_249, %c0_250] : memref<104x16xf32, #tpu.memory_space<vmem>>, vector<80x16xf32>
    %c8_251 = arith.constant 8 : index
    %c0_252 = arith.constant 0 : index
    %c0_253 = arith.constant 0 : index
    %256 = vector.load %arg8[%c8_251, %c0_252, %c0_253] : memref<9x16x16xf32, #tpu.memory_space<vmem>>, vector<1x16x16xf32>
    %257 = vector.shape_cast %256 : vector<1x16x16xf32> to vector<16x16xf32>
    %cst_254 = arith.constant dense<0.000000e+00> : vector<80x16xf32>
    %258 = tpu.matmul %255, %257, %cst_254 {dimension_numbers = #tpu.dot_dimension_numbers<[1], [0], [0], [1], [0, 0, 1, 1], [], []>} : vector<80x16xf32>, vector<16x16xf32>, vector<80x16xf32> -> vector<80x16xf32>
    %c0_255 = arith.constant 0 : index
    %c0_256 = arith.constant 0 : index
    %259 = vector.load %arg19[%c0_255, %c0_256] : memref<80x16xf32, #tpu.memory_space<vmem>>, vector<80x16xf32>
    %260 = arith.addf %259, %258 : vector<80x16xf32>
    %c0_257 = arith.constant 0 : index
    %c0_258 = arith.constant 0 : index
    %261 = vector.load %arg19[%c0_257, %c0_258] : memref<80x16xf32, #tpu.memory_space<vmem>>, vector<80x16xf32>
    tpu.vector_store %arg19[%c0_257, %c0_258], %260 {strides = array<i32>} : memref<80x16xf32, #tpu.memory_space<vmem>>, vector<80x16xf32>,
    %c0_259 = arith.constant 0 : index
    %c0_260 = arith.constant 0 : index
    %262 = vector.load %arg19[%c0_259, %c0_260] : memref<80x16xf32, #tpu.memory_space<vmem>>, vector<80x16xf32>
    %cst_261 = arith.constant dense<0.000000e+00> : vector<1x16xf32>
    %263 = tpu.matmul %20, %262, %cst_261 {dimension_numbers = #tpu.dot_dimension_numbers<[1], [0], [0], [1], [0, 0, 1, 1], [], []>} : vector<1x80xf32>, vector<80x16xf32>, vector<1x16xf32> -> vector<1x16xf32>
    %264 = arith.mulf %262, %262 : vector<80x16xf32>
    %cst_262 = arith.constant dense<0.000000e+00> : vector<1x16xf32>
    %265 = tpu.matmul %20, %264, %cst_262 {dimension_numbers = #tpu.dot_dimension_numbers<[1], [0], [0], [1], [0, 0, 1, 1], [], []>} : vector<1x80xf32>, vector<80x16xf32>, vector<1x16xf32> -> vector<1x16xf32>
    %cst_263 = arith.constant dense<0.000000e+00> : vector<1x8xf32>
    %266 = tpu.matmul %263, %40, %cst_263 {dimension_numbers = #tpu.dot_dimension_numbers<[1], [0], [0], [1], [0, 0, 1, 1], [], []>} : vector<1x16xf32>, vector<16x8xf32>, vector<1x8xf32> -> vector<1x8xf32>
    %cst_264 = arith.constant dense<0.000000e+00> : vector<1x8xf32>
    %267 = tpu.matmul %265, %40, %cst_264 {dimension_numbers = #tpu.dot_dimension_numbers<[1], [0], [0], [1], [0, 0, 1, 1], [], []>} : vector<1x16xf32>, vector<16x8xf32>, vector<1x8xf32> -> vector<1x8xf32>
    %cst_265 = arith.constant 1.280000e+02 : f32
    %268 = vector.broadcast %cst_265 : f32 to vector<1x8xf32>
    %269 = arith.divf %266, %268 : vector<1x8xf32>
    %cst_266 = arith.constant 1.280000e+02 : f32
    %270 = vector.broadcast %cst_266 : f32 to vector<1x8xf32>
    %271 = arith.divf %267, %270 : vector<1x8xf32>
    %272 = arith.mulf %269, %269 : vector<1x8xf32>
    %273 = arith.subf %271, %272 : vector<1x8xf32>
    %cst_267 = arith.constant 0.000000e+00 : f32
    %274 = vector.broadcast %cst_267 : f32 to vector<1x8xf32>
    %275 = arith.maximumf %273, %274 : vector<1x8xf32>
    %cst_268 = arith.constant 9.99999974E-6 : f32
    %276 = vector.broadcast %cst_268 : f32 to vector<1x8xf32>
    %277 = arith.addf %275, %276 : vector<1x8xf32>
    %278 = math.rsqrt %277 : vector<1x8xf32>
    %cst_269 = arith.constant dense<0.000000e+00> : vector<1x16xf32>
    %279 = tpu.matmul %269, %41, %cst_269 {dimension_numbers = #tpu.dot_dimension_numbers<[1], [0], [0], [1], [0, 0, 1, 1], [], []>} : vector<1x8xf32>, vector<8x16xf32>, vector<1x16xf32> -> vector<1x16xf32>
    %cst_270 = arith.constant dense<0.000000e+00> : vector<1x16xf32>
    %280 = tpu.matmul %278, %41, %cst_270 {dimension_numbers = #tpu.dot_dimension_numbers<[1], [0], [0], [1], [0, 0, 1, 1], [], []>} : vector<1x8xf32>, vector<8x16xf32>, vector<1x16xf32> -> vector<1x16xf32>
    %281 = vector.broadcast %279 : vector<1x16xf32> to vector<80x16xf32>
    %282 = arith.subf %262, %281 : vector<80x16xf32>
    %283 = arith.mulf %280, %197 : vector<1x16xf32>
    %284 = vector.broadcast %283 : vector<1x16xf32> to vector<80x16xf32>
    %285 = arith.mulf %282, %284 : vector<80x16xf32>
    %286 = vector.broadcast %198 : vector<1x16xf32> to vector<80x16xf32>
    %287 = arith.addf %285, %286 : vector<80x16xf32>
    %288 = arith.negf %287 : vector<80x16xf32>
    %289 = math.exp %288 : vector<80x16xf32>
    %cst_271 = arith.constant 1.000000e+00 : f32
    %290 = vector.broadcast %cst_271 : f32 to vector<80x16xf32>
    %291 = arith.addf %290, %289 : vector<80x16xf32>
    %292 = arith.divf %290, %291 : vector<80x16xf32>
    %293 = arith.mulf %287, %292 : vector<80x16xf32>
    %c12_272 = arith.constant 12 : index
    %c0_273 = arith.constant 0 : index
    %294 = vector.load %arg17[%c12_272, %c0_273] : memref<104x8xf32, #tpu.memory_space<vmem>>, vector<80x8xf32>
    %c0_274 = arith.constant 0 : index
    %c0_275 = arith.constant 0 : index
    %295 = vector.load %arg14[%c0_274, %c0_275] : memref<8x16xf32, #tpu.memory_space<vmem>>, vector<8x16xf32>
    %cst_276 = arith.constant dense<0.000000e+00> : vector<80x16xf32>
    %296 = tpu.matmul %294, %295, %cst_276 {dimension_numbers = #tpu.dot_dimension_numbers<[1], [0], [0], [1], [0, 0, 1, 1], [], []>} : vector<80x8xf32>, vector<8x16xf32>, vector<80x16xf32> -> vector<80x16xf32>
    %c0_277 = arith.constant 0 : index
    %c0_278 = arith.constant 0 : index
    %297 = vector.load %arg15[%c0_277, %c0_278] : memref<1x16xf32, #tpu.memory_space<vmem>>, vector<1x16xf32>
    %298 = vector.broadcast %297 : vector<1x16xf32> to vector<80x16xf32>
    %299 = arith.addf %296, %298 : vector<80x16xf32>
    %300 = arith.addf %293, %299 : vector<80x16xf32>
    %c0_279 = arith.constant 0 : index
    %c0_280 = arith.constant 0 : index
    %301 = vector.load %arg19[%c0_279, %c0_280] : memref<80x16xf32, #tpu.memory_space<vmem>>, vector<80x16xf32>
    tpu.vector_store %arg19[%c0_279, %c0_280], %300 {strides = array<i32>} : memref<80x16xf32, #tpu.memory_space<vmem>>, vector<80x16xf32>,
    %c0_281 = arith.constant 0 : index
    %c0_282 = arith.constant 0 : index
    %302 = vector.load %arg19[%c0_281, %c0_282] : memref<80x16xf32, #tpu.memory_space<vmem>>, vector<8x16xf32>
    %c0_283 = arith.constant 0 : index
    %c0_284 = arith.constant 0 : index
    %c0_285 = arith.constant 0 : index
    %c0_286 = arith.constant 0 : index
    %303 = vector.load %arg16[%c0_283, %c0_284, %c0_285, %c0_286] : memref<1x8x8x16xf32, #tpu.memory_space<vmem>>, vector<1x1x8x16xf32>
    %304 = vector.shape_cast %303 : vector<1x1x8x16xf32> to vector<8x16xf32>
    %305 = vector.shape_cast %302 : vector<8x16xf32> to vector<1x1x8x16xf32>
    tpu.vector_store %arg16[%c0_283, %c0_284, %c0_285, %c0_286], %305 {strides = array<i32>} : memref<1x8x8x16xf32, #tpu.memory_space<vmem>>, vector<1x1x8x16xf32>,
    %c10 = arith.constant 10 : index
    %c0_287 = arith.constant 0 : index
    %306 = vector.load %arg19[%c10, %c0_287] : memref<80x16xf32, #tpu.memory_space<vmem>>, vector<8x16xf32>
    %c0_288 = arith.constant 0 : index
    %c1_289 = arith.constant 1 : index
    %c0_290 = arith.constant 0 : index
    %c0_291 = arith.constant 0 : index
    %307 = vector.load %arg16[%c0_288, %c1_289, %c0_290, %c0_291] : memref<1x8x8x16xf32, #tpu.memory_space<vmem>>, vector<1x1x8x16xf32>
    %308 = vector.shape_cast %307 : vector<1x1x8x16xf32> to vector<8x16xf32>
    %309 = vector.shape_cast %306 : vector<8x16xf32> to vector<1x1x8x16xf32>
    tpu.vector_store %arg16[%c0_288, %c1_289, %c0_290, %c0_291], %309 {strides = array<i32>} : memref<1x8x8x16xf32, #tpu.memory_space<vmem>>, vector<1x1x8x16xf32>,
    %c20_292 = arith.constant 20 : index
    %c0_293 = arith.constant 0 : index
    %310 = vector.load %arg19[%c20_292, %c0_293] : memref<80x16xf32, #tpu.memory_space<vmem>>, vector<8x16xf32>
    %c0_294 = arith.constant 0 : index
    %c2_295 = arith.constant 2 : index
    %c0_296 = arith.constant 0 : index
    %c0_297 = arith.constant 0 : index
    %311 = vector.load %arg16[%c0_294, %c2_295, %c0_296, %c0_297] : memref<1x8x8x16xf32, #tpu.memory_space<vmem>>, vector<1x1x8x16xf32>
    %312 = vector.shape_cast %311 : vector<1x1x8x16xf32> to vector<8x16xf32>
    %313 = vector.shape_cast %310 : vector<8x16xf32> to vector<1x1x8x16xf32>
    tpu.vector_store %arg16[%c0_294, %c2_295, %c0_296, %c0_297], %313 {strides = array<i32>} : memref<1x8x8x16xf32, #tpu.memory_space<vmem>>, vector<1x1x8x16xf32>,
    %c30_298 = arith.constant 30 : index
    %c0_299 = arith.constant 0 : index
    %314 = vector.load %arg19[%c30_298, %c0_299] : memref<80x16xf32, #tpu.memory_space<vmem>>, vector<8x16xf32>
    %c0_300 = arith.constant 0 : index
    %c3_301 = arith.constant 3 : index
    %c0_302 = arith.constant 0 : index
    %c0_303 = arith.constant 0 : index
    %315 = vector.load %arg16[%c0_300, %c3_301, %c0_302, %c0_303] : memref<1x8x8x16xf32, #tpu.memory_space<vmem>>, vector<1x1x8x16xf32>
    %316 = vector.shape_cast %315 : vector<1x1x8x16xf32> to vector<8x16xf32>
    %317 = vector.shape_cast %314 : vector<8x16xf32> to vector<1x1x8x16xf32>
    tpu.vector_store %arg16[%c0_300, %c3_301, %c0_302, %c0_303], %317 {strides = array<i32>} : memref<1x8x8x16xf32, #tpu.memory_space<vmem>>, vector<1x1x8x16xf32>,
    %c40_304 = arith.constant 40 : index
    %c0_305 = arith.constant 0 : index
    %318 = vector.load %arg19[%c40_304, %c0_305] : memref<80x16xf32, #tpu.memory_space<vmem>>, vector<8x16xf32>
    %c0_306 = arith.constant 0 : index
    %c4_307 = arith.constant 4 : index
    %c0_308 = arith.constant 0 : index
    %c0_309 = arith.constant 0 : index
    %319 = vector.load %arg16[%c0_306, %c4_307, %c0_308, %c0_309] : memref<1x8x8x16xf32, #tpu.memory_space<vmem>>, vector<1x1x8x16xf32>
    %320 = vector.shape_cast %319 : vector<1x1x8x16xf32> to vector<8x16xf32>
    %321 = vector.shape_cast %318 : vector<8x16xf32> to vector<1x1x8x16xf32>
    tpu.vector_store %arg16[%c0_306, %c4_307, %c0_308, %c0_309], %321 {strides = array<i32>} : memref<1x8x8x16xf32, #tpu.memory_space<vmem>>, vector<1x1x8x16xf32>,
    %c50_310 = arith.constant 50 : index
    %c0_311 = arith.constant 0 : index
    %322 = vector.load %arg19[%c50_310, %c0_311] : memref<80x16xf32, #tpu.memory_space<vmem>>, vector<8x16xf32>
    %c0_312 = arith.constant 0 : index
    %c5_313 = arith.constant 5 : index
    %c0_314 = arith.constant 0 : index
    %c0_315 = arith.constant 0 : index
    %323 = vector.load %arg16[%c0_312, %c5_313, %c0_314, %c0_315] : memref<1x8x8x16xf32, #tpu.memory_space<vmem>>, vector<1x1x8x16xf32>
    %324 = vector.shape_cast %323 : vector<1x1x8x16xf32> to vector<8x16xf32>
    %325 = vector.shape_cast %322 : vector<8x16xf32> to vector<1x1x8x16xf32>
    tpu.vector_store %arg16[%c0_312, %c5_313, %c0_314, %c0_315], %325 {strides = array<i32>} : memref<1x8x8x16xf32, #tpu.memory_space<vmem>>, vector<1x1x8x16xf32>,
    %c60_316 = arith.constant 60 : index
    %c0_317 = arith.constant 0 : index
    %326 = vector.load %arg19[%c60_316, %c0_317] : memref<80x16xf32, #tpu.memory_space<vmem>>, vector<8x16xf32>
    %c0_318 = arith.constant 0 : index
    %c6_319 = arith.constant 6 : index
    %c0_320 = arith.constant 0 : index
    %c0_321 = arith.constant 0 : index
    %327 = vector.load %arg16[%c0_318, %c6_319, %c0_320, %c0_321] : memref<1x8x8x16xf32, #tpu.memory_space<vmem>>, vector<1x1x8x16xf32>
    %328 = vector.shape_cast %327 : vector<1x1x8x16xf32> to vector<8x16xf32>
    %329 = vector.shape_cast %326 : vector<8x16xf32> to vector<1x1x8x16xf32>
    tpu.vector_store %arg16[%c0_318, %c6_319, %c0_320, %c0_321], %329 {strides = array<i32>} : memref<1x8x8x16xf32, #tpu.memory_space<vmem>>, vector<1x1x8x16xf32>,
    %c70_322 = arith.constant 70 : index
    %c0_323 = arith.constant 0 : index
    %330 = vector.load %arg19[%c70_322, %c0_323] : memref<80x16xf32, #tpu.memory_space<vmem>>, vector<8x16xf32>
    %c0_324 = arith.constant 0 : index
    %c7_325 = arith.constant 7 : index
    %c0_326 = arith.constant 0 : index
    %c0_327 = arith.constant 0 : index
    %331 = vector.load %arg16[%c0_324, %c7_325, %c0_326, %c0_327] : memref<1x8x8x16xf32, #tpu.memory_space<vmem>>, vector<1x1x8x16xf32>
    %332 = vector.shape_cast %331 : vector<1x1x8x16xf32> to vector<8x16xf32>
    %333 = vector.shape_cast %330 : vector<8x16xf32> to vector<1x1x8x16xf32>
    tpu.vector_store %arg16[%c0_324, %c7_325, %c0_326, %c0_327], %333 {strides = array<i32>} : memref<1x8x8x16xf32, #tpu.memory_space<vmem>>, vector<1x1x8x16xf32>,
    return
  }
  func.func @transform_0(%arg0: i32) -> (i32, i32, i32) {
    %c0_i32 = arith.constant 0 : i32
    %c0_i32_0 = arith.constant 0 : i32
    %c0_i32_1 = arith.constant 0 : i32
    return %arg0, %c0_i32, %c0_i32_0 : i32, i32, i32
  }
  func.func @transform_1(%arg0: i32) -> (i32, i32, i32) {
    %c0_i32 = arith.constant 0 : i32
    %c0_i32_0 = arith.constant 0 : i32
    %c0_i32_1 = arith.constant 0 : i32
    %c0_i32_2 = arith.constant 0 : i32
    return %c0_i32, %c0_i32_0, %c0_i32_1 : i32, i32, i32
  }
  func.func @transform_2(%arg0: i32) -> (i32, i32) {
    %c0_i32 = arith.constant 0 : i32
    %c0_i32_0 = arith.constant 0 : i32
    %c0_i32_1 = arith.constant 0 : i32
    return %c0_i32, %c0_i32_0 : i32, i32
  }
  func.func @transform_3(%arg0: i32) -> (i32, i32) {
    %c0_i32 = arith.constant 0 : i32
    %c0_i32_0 = arith.constant 0 : i32
    %c0_i32_1 = arith.constant 0 : i32
    return %c0_i32, %c0_i32_0 : i32, i32
  }
  func.func @transform_4(%arg0: i32) -> (i32, i32) {
    %c0_i32 = arith.constant 0 : i32
    %c0_i32_0 = arith.constant 0 : i32
    %c0_i32_1 = arith.constant 0 : i32
    return %c0_i32, %c0_i32_0 : i32, i32
  }
  func.func @transform_5(%arg0: i32) -> (i32, i32, i32) {
    %c0_i32 = arith.constant 0 : i32
    %c0_i32_0 = arith.constant 0 : i32
    %c0_i32_1 = arith.constant 0 : i32
    return %arg0, %c0_i32, %c0_i32_0 : i32, i32, i32
  }
  func.func @transform_6(%arg0: i32) -> (i32, i32, i32) {
    %c0_i32 = arith.constant 0 : i32
    %c0_i32_0 = arith.constant 0 : i32
    %c0_i32_1 = arith.constant 0 : i32
    return %arg0, %c0_i32, %c0_i32_0 : i32, i32, i32
  }
  func.func @transform_7(%arg0: i32) -> (i32, i32, i32) {
    %c0_i32 = arith.constant 0 : i32
    %c0_i32_0 = arith.constant 0 : i32
    %c0_i32_1 = arith.constant 0 : i32
    %c0_i32_2 = arith.constant 0 : i32
    return %c0_i32, %c0_i32_0, %c0_i32_1 : i32, i32, i32
  }
  func.func @transform_8(%arg0: i32) -> (i32, i32) {
    %c0_i32 = arith.constant 0 : i32
    %c0_i32_0 = arith.constant 0 : i32
    %c0_i32_1 = arith.constant 0 : i32
    return %c0_i32, %c0_i32_0 : i32, i32
  }
  func.func @transform_9(%arg0: i32) -> (i32, i32) {
    %c0_i32 = arith.constant 0 : i32
    %c0_i32_0 = arith.constant 0 : i32
    %c0_i32_1 = arith.constant 0 : i32
    return %c0_i32, %c0_i32_0 : i32, i32
  }
  func.func @transform_10(%arg0: i32) -> (i32, i32) {
    %c0_i32 = arith.constant 0 : i32
    %c0_i32_0 = arith.constant 0 : i32
    %c0_i32_1 = arith.constant 0 : i32
    return %c0_i32, %c0_i32_0 : i32, i32
  }
  func.func @transform_11(%arg0: i32) -> (i32, i32) {
    %c0_i32 = arith.constant 0 : i32
    %c0_i32_0 = arith.constant 0 : i32
    %c0_i32_1 = arith.constant 0 : i32
    return %c0_i32, %c0_i32_0 : i32, i32
  }
  func.func @transform_12(%arg0: i32) -> (i32, i32) {
    %c0_i32 = arith.constant 0 : i32
    %c0_i32_0 = arith.constant 0 : i32
    %c0_i32_1 = arith.constant 0 : i32
    return %c0_i32, %c0_i32_0 : i32, i32
  }
  func.func @transform_13(%arg0: i32) -> (i32, i32) {
    %c0_i32 = arith.constant 0 : i32
    %c0_i32_0 = arith.constant 0 : i32
    %c0_i32_1 = arith.constant 0 : i32
    return %c0_i32, %c0_i32_0 : i32, i32
  }
  func.func @transform_14(%arg0: i32) -> (i32, i32) {
    %c0_i32 = arith.constant 0 : i32
    %c0_i32_0 = arith.constant 0 : i32
    %c0_i32_1 = arith.constant 0 : i32
    return %c0_i32, %c0_i32_0 : i32, i32
  }
  func.func @transform_15(%arg0: i32) -> (i32, i32, i32, i32) {
    %c0_i32 = arith.constant 0 : i32
    %c0_i32_0 = arith.constant 0 : i32
    %c0_i32_1 = arith.constant 0 : i32
    %c0_i32_2 = arith.constant 0 : i32
    return %arg0, %c0_i32, %c0_i32_0, %c0_i32_1 : i32, i32, i32, i32
  }
}

</mosaic_0001>

<bundles_post_ra>
// kernel: resnet_block_forward.1
= control target key start
LH: loop header
LB: loop body
LE: loop exit
PB: predicated region body
PF: predicated region fallthrough
CT: control target
= control target key end

     0   :  { %s9731_s0 = inlined_call_operand.hbm [shape: f32[2,64,8], index: 0, kind: input, shape index: {}]   ;;  %s9732_s1 = inlined_call_operand.hbm [shape: f32[9,8,16], index: 1, kind: input, shape index: {}]   ;;  %s9733_s2 = inlined_call_operand.hbm [shape: f32[1,16], index: 2, kind: input, shape index: {}]   ;;  %s9734_s3 = inlined_call_operand.hbm [shape: f32[1,16], index: 3, kind: input, shape index: {}]   ;;  %s9735_s4 = inlined_call_operand.hbm [shape: f32[1,16], index: 4, kind: input, shape index: {}]   ;;  %s9736_s5 = inlined_call_operand.hbm [shape: f32[2,1,16], index: 5, kind: input, shape index: {}]   ;;  %s9737_s6 = inlined_call_operand.hbm [shape: f32[2,1,16], index: 6, kind: input, shape index: {}]   ;;  %s9738_s7 = inlined_call_operand.hbm [shape: f32[9,16,16], index: 7, kind: input, shape index: {}]   ;;  %s9739_s8 = inlined_call_operand.hbm [shape: f32[1,16], index: 8, kind: input, shape index: {}]   ;;  %s9740_s9 = inlined_call_operand.hbm [shape: f32[1,16], index: 9, kind: input, shape index: {}]   ;;  %s9741_s10 = inlined_call_operand.hbm [shape: f32[1,16], index: 10, kind: input, shape index: {}]   ;;  %s9742_s11 = inlined_call_operand.hbm [shape: f32[16,8], index: 11, kind: input, shape index: {}]   ;;  %s9743_s12 = inlined_call_operand.hbm [shape: f32[8,16], index: 12, kind: input, shape index: {}]   ;;  %s9744_s13 = inlined_call_operand.hbm [shape: f32[8,16], index: 13, kind: input, shape index: {}]   ;;  %s9745_s14 = inlined_call_operand.hbm [shape: f32[1,16], index: 14, kind: input, shape index: {}]   ;;  %s9746_s15 = inlined_call_operand.hbm [shape: f32[2,8,8,16], index: 15, kind: output, shape index: {}]  }
   0x1   :  { %9772 = sst [smem:[#allocation41_spill]] %s9731_s0 }
   0x2   :  { %9773 = sst [smem:[#allocation42_spill]] %s9732_s1 }
   0x3   :  { %9774 = sst [smem:[#allocation43_spill]] %s9733_s2 }
   0x4   :  { %9775 = sst [smem:[#allocation44_spill]] %s9734_s3 }
   0x5   :  { %9776 = sst [smem:[#allocation45_spill]] %s9735_s4 }
   0x6   :  { %9777 = sst [smem:[#allocation46_spill]] %s9736_s5 }
   0x7   :  { %9778 = sst [smem:[#allocation47_spill]] %s9738_s7 }
   0x8   :  { %9779 = sst [smem:[#allocation48_spill]] %s9739_s8 }
   0x9   :  { %9780 = sst [smem:[#allocation49_spill]] %s9740_s9 }
   0xa   :  { %9781 = sst [smem:[#allocation50_spill]] %s9741_s10 }
   0xb   :  { %9782 = sst [smem:[#allocation51_spill]] %s9742_s11 }
   0xc   :  { %9783 = sst [smem:[#allocation52_spill]] %s9743_s12 }
   0xd   :  { %9784 = sst [smem:[#allocation53_spill]] %s9744_s13 }
   0xe   :  { %9785 = sst [smem:[#allocation54_spill]] %s9745_s14 }
   0xf   :  { %9786 = sst [smem:[#allocation55_spill]] %s9746_s15 }
  0x10   :  { %20 = vsyncpa [#allocation6], 0 }
  0x11   :  { %22 = vsyncpa [#allocation6 + $0x1], 0 }
  0x12   :  { %23 = vsyncpa [#allocation9], 0 }
  0x13   :  { %24 = vsyncpa [#allocation12], 0 }
  0x14   :  { %25 = vsyncpa [#allocation15], 0 }
  0x15   :  { %27 = vsyncpa [#allocation15 + $0x1], 0 }
  0x16   :  { %28 = vsyncpa [#allocation18], 0 }
  0x17   :  { %29 = vsyncpa [#allocation21], 0 }
  0x18   :  { %30 = vsyncpa [#allocation24], 0 }
  0x19   :  { %31 = vsyncpa [#allocation27], 0 }
  0x1a   :  { %32 = vsyncpa [#allocation7], 0 }
  0x1b   :  { %34 = vsyncpa [#allocation7 + $0x1], 0  ;;  %s8066_s18 = smov 0   ;;  %s8068_s19 = smov 0  }
  0x1c   :  { %s8070_s20 = smov 0   ;;  %s8072_s21 = smov 0  }
  0x1d LB: > { %s7963_s22 = smov [#allocation8]   ;;  %s8087_s24 = sadd.s32 4294967295, %s7961_s21   ;;  %s7961_s21 = sphi %s8072_s21, %s9898_s21   ;;  %s7957_s20 = sphi %s8070_s20, %s9897_s20   ;;  %s7953_s19 = sphi %s8068_s19, %s9896_s19   ;;  %s7949_s18 = sphi %s8066_s18, %s9895_s18  }
  0x1e   : > { %s413_s23 = sshll.u32 %s7963_s22, 4  ;;  %p6000_p0 = scmp.ge.s32.totalorder %s7961_s21, 1  ;;  %s8092_s23 = int_to_ptr.vmem [resolvable:$true] %s413_s23 }
  0x1f   : > { %p9754_p1 = scmp.eq.s32.totalorder %s8087_s24, 0  ;;  %p401_p2 = scmp.lt.s32.totalorder %s7961_s21, 3 }
  0x20   : > { %s7964_s26 = smov [#allocation11]   ;;  %s7965_s29 = smov [#allocation17]  }
  0x21   : > { %p8094_p3 = pnand %p6000_p0, %p401_p2  ;;  %s438_s27 = sshll.u32 %s7964_s26, 4  ;;  %s8107_s27 = int_to_ptr.vmem [resolvable:$true] %s438_s27 }
  0x22   : > { %s459_s30 = sshll.u32 %s7965_s29, 4  ;;  %s9790_s1 = sld [smem:[#allocation42_spill]]  ;;  %s8109_s30 = int_to_ptr.vmem [resolvable:$true] %s459_s30 }
  0x23   : > { %s9787_s25 = scalar_select %p8094_p3, 1, 0 }
  0x24   : > { %p7228_p5 = pneg %p8094_p3 }
  0x25   : > { %9788 = sst [smem:[#allocation39_spill]] %s9787_s25 }
  0x26   : > { %p8103_p6 = pnand %p7228_p5, %p9754_p1 }
  0x28   : > { %s9789_s28 = scalar_select %p8103_p6, 1, 0 }
  0x29   : > { %s7441_s22 = scalar_lea.hbm %s9790_s1, 1152  ;;  %p8119_p8 = pneg %p8103_p6 }
  0x2a   : > { %p7442_p7 = scmp.ne.s32.totalorder %s9790_s1, %s7441_s22  ;;  %p7448_p11 = scmp.lt.u32.totalorder %s7441_s22, %s9790_s1 }
  0x2b   : > { %s9791_s26 = scalar_select %p8119_p8, 1, 0 }
  0x2c   : > { %p7444_p9 = pnand %p8119_p8, %p7442_p7 }
  0x2e   : > { %p7445_p10 = pneg %p7444_p9 }
  0x30   : > { %p7450_p12 = pnand %p7448_p11, %p7445_p10 }
  0x32   : > { %7453 = shalt.err (!%p7450_p12)
}
  0x33   : > { %s7454_s15 = scalar_lea.vmem %s8092_s23, 1152  ;;  %p7462_p5 = scmp.lt.s32.totalorder %s8092_s23, %s8092_s23 }
  0x34   : > { %p7455_p13 = scmp.ne.s32.totalorder %s8092_s23, %s7454_s15  ;;  %p7463_p4 = scmp.lt.s32.totalorder %s7454_s15, %s7454_s15 }
  0x36   : > { %p7457_p0 = pnand %p7455_p13, %p8119_p8  ;;  %p7464_p7 = por %p7463_p4, %p7462_p5 }
  0x38   : > { %p7458_p2 = pneg %p7457_p0 }
  0x3a   : > { %p7465_p9 = pnand %p7464_p7, %p7458_p2 }
  0x3c   : > { %7468 = shalt.err (!%p7465_p9)
}
  0x3d   : > { %s9756_s25 = smov 128   ;;  %s9757_s0 = smov 8  }
  0x3e   : > { %7231 = dma.hbm_to_vmem [thread:$0]  (!%p8103_p6), %s9790_s1, 1152, %s8092_s23, [#allocation9], %s9756_s25, %s9756_s25, %s9757_s0  }
  0x3f   : > { %s9792_s3 = sld [smem:[#allocation44_spill]] }
  0x45   : > { %s7469_s15 = scalar_lea.hbm %s9792_s3, 16 }
  0x46   : > { %p7470_p4 = scmp.ne.s32.totalorder %s9792_s3, %s7469_s15  ;;  %p7476_p12 = scmp.lt.u32.totalorder %s7469_s15, %s9792_s3 }
  0x48   : > { %p7472_p10 = pnand %p7470_p4, %p8119_p8 }
  0x4a   : > { %p7473_p11 = pneg %p7472_p10 }
  0x4c   : > { %p7478_p13 = pnand %p7476_p12, %p7473_p11 }
  0x4e   : > { %7481 = shalt.err (!%p7478_p13)
}
  0x4f   : > { %s7482_s23 = scalar_lea.vmem %s8107_s27, 16  ;;  %s7489_s12 = scalar_lea.vmem %s8107_s27, 32 }
  0x50   : > { %p7483_p0 = scmp.ne.s32.totalorder %s8107_s27, %s7482_s23  ;;  %p7490_p7 = scmp.lt.s32.totalorder %s8107_s27, %s8107_s27 }
  0x51   : > { %p7491_p9 = scmp.lt.s32.totalorder %s7489_s12, %s7482_s23 }
  0x52   : > { %p7485_p2 = pnand %p7483_p0, %p8119_p8 }
  0x53   : > { %p7492_p4 = por %p7491_p9, %p7490_p7 }
  0x54   : > { %p7486_p5 = pneg %p7485_p2 }
  0x56   : > { %p7493_p10 = pnand %p7492_p4, %p7486_p5 }
  0x58   : > { %7496 = shalt.err (!%p7493_p10)
}
  0x59   : > { %7237 = dma.hbm_to_vmem [thread:$0]  (!%p8103_p6), %s9792_s3, 16, %s8107_s27, [#allocation12]  }
  0x5a   : > { %s9793_s7 = sld [smem:[#allocation47_spill]] }
  0x60   : > { %s7497_s17 = scalar_lea.hbm %s9793_s7, 2304 }
  0x61   : > { %p7498_p11 = scmp.ne.s32.totalorder %s9793_s7, %s7497_s17  ;;  %p7504_p0 = scmp.lt.u32.totalorder %s7497_s17, %s9793_s7 }
  0x63   : > { %p7500_p12 = pnand %p7498_p11, %p8119_p8 }
  0x65   : > { %p7501_p13 = pneg %p7500_p12 }
  0x67   : > { %p7506_p2 = pnand %p7504_p0, %p7501_p13 }
  0x69   : > { %7509 = shalt.err (!%p7506_p2)
}
  0x6a   : > { %s7510_s27 = scalar_lea.vmem %s8109_s30, 2304  ;;  %p7518_p4 = scmp.lt.s32.totalorder %s8109_s30, %s8109_s30 }
  0x6b   : > { %p7511_p5 = scmp.ne.s32.totalorder %s8109_s30, %s7510_s27  ;;  %p7519_p10 = scmp.lt.s32.totalorder %s7510_s27, %s7510_s27 }
  0x6d   : > { %p7513_p7 = pnand %p7511_p5, %p8119_p8  ;;  %p7520_p11 = por %p7519_p10, %p7518_p4 }
  0x6f   : > { %p7514_p9 = pneg %p7513_p7 }
  0x71   : > { %p7521_p12 = pnand %p7520_p11, %p7514_p9 }
  0x73   : > { %7524 = shalt.err (!%p7521_p12)
}
  0x74   : > { %7243 = dma.hbm_to_vmem [thread:$0]  (!%p8103_p6), %s9793_s7, 2304, %s8109_s30, [#allocation18], %s9756_s25, %s9756_s25, %s9757_s0  }
  0x75   : > { %s7968_s10 = smov [#allocation20]   ;;  %s7969_s16 = smov [#allocation23]  }
  0x76   : > { %s484_s14 = sshll.u32 %s7968_s10, 4  ;;  %s505_s17 = sshll.u32 %s7969_s16, 4  ;;  %s485_s14 = int_to_ptr.vmem [resolvable:$true] %s484_s14  ;;  %s506_s17 = int_to_ptr.vmem [resolvable:$true] %s505_s17 }
  0x77   : > { %s9794_s9 = sld [smem:[#allocation49_spill]] }
  0x7d   : > { %s7525_s15 = scalar_lea.hbm %s9794_s9, 16 }
  0x7e   : > { %p7526_p13 = scmp.ne.s32.totalorder %s9794_s9, %s7525_s15  ;;  %p7532_p5 = scmp.lt.u32.totalorder %s7525_s15, %s9794_s9 }
  0x80   : > { %p7528_p0 = pnand %p7526_p13, %p8119_p8 }
  0x82   : > { %p7529_p2 = pneg %p7528_p0 }
  0x84   : > { %p7534_p7 = pnand %p7532_p5, %p7529_p2 }
  0x86   : > { %7537 = shalt.err (!%p7534_p7)
}
  0x87   : > { %s7538_s30 = scalar_lea.vmem %s485_s14, 16  ;;  %s7545_s8 = scalar_lea.vmem %s485_s14, 32 }
  0x88   : > { %p7539_p9 = scmp.ne.s32.totalorder %s485_s14, %s7538_s30  ;;  %p7546_p11 = scmp.lt.s32.totalorder %s485_s14, %s485_s14 }
  0x89   : > { %p7547_p12 = scmp.lt.s32.totalorder %s7545_s8, %s7538_s30 }
  0x8a   : > { %p7541_p4 = pnand %p7539_p9, %p8119_p8 }
  0x8b   : > { %p7548_p1 = por %p7547_p12, %p7546_p11 }
  0x8c   : > { %p7542_p10 = pneg %p7541_p4 }
  0x8e   : > { %p7549_p3 = pnand %p7548_p1, %p7542_p10 }
  0x90   : > { %7552 = shalt.err (!%p7549_p3)
}
  0x91   : > { %7249 = dma.hbm_to_vmem [thread:$0]  (!%p8103_p6), %s9794_s9, 16, %s485_s14, [#allocation21]  }
  0x92   : > { %s9795_s11 = sld [smem:[#allocation51_spill]] }
  0x98   : > { %s7553_s29 = scalar_lea.hbm %s9795_s11, 256 }
  0x99   : > { %p7554_p13 = scmp.ne.s32.totalorder %s9795_s11, %s7553_s29  ;;  %p7560_p3 = scmp.lt.u32.totalorder %s7553_s29, %s9795_s11 }
  0x9b   : > { %p7556_p0 = pnand %p7554_p13, %p8119_p8 }
  0x9d   : > { %p7557_p1 = pneg %p7556_p0 }
  0x9f   : > { %p7562_p2 = pnand %p7560_p3, %p7557_p1 }
  0xa1   : > { %7565 = shalt.err (!%p7562_p2)
}
  0xa2   : > { %s7566_s30 = scalar_lea.vmem %s506_s17, 256  ;;  %p7574_p4 = scmp.lt.s32.totalorder %s506_s17, %s506_s17 }
  0xa3   : > { %p7567_p5 = scmp.ne.s32.totalorder %s506_s17, %s7566_s30  ;;  %p7575_p10 = scmp.lt.s32.totalorder %s7566_s30, %s7566_s30 }
  0xa5   : > { %p7569_p7 = pnand %p7567_p5, %p8119_p8  ;;  %p7576_p11 = por %p7575_p10, %p7574_p4 }
  0xa7   : > { %p7570_p9 = pneg %p7569_p7 }
  0xa9   : > { %p7577_p12 = pnand %p7576_p11, %p7570_p9 }
  0xab   : > { %7580 = shalt.err (!%p7577_p12)
}
  0xac   : > { %7255 = dma.hbm_to_vmem [thread:$0]  (!%p8103_p6), %s9795_s11, 256, %s506_s17, [#allocation24], %s9756_s25, %s9756_s25, %s9757_s0  }
  0xad   : > { %s7970_s10 = smov [#allocation26]   ;;  %s9796_s13 = sld [smem:[#allocation53_spill]] }
  0xae   : > { %s530_s16 = sshll.u32 %s7970_s10, 4  ;;  %s531_s16 = int_to_ptr.vmem [resolvable:$true] %s530_s16 }
  0xb3   : > { %s7581_s29 = scalar_lea.hbm %s9796_s13, 128 }
  0xb4   : > { %p7582_p13 = scmp.ne.s32.totalorder %s9796_s13, %s7581_s29  ;;  %p7588_p3 = scmp.lt.u32.totalorder %s7581_s29, %s9796_s13 }
  0xb6   : > { %p7584_p0 = pnand %p7582_p13, %p8119_p8 }
  0xb8   : > { %p7585_p1 = pneg %p7584_p0 }
  0xba   : > { %p7590_p2 = pnand %p7588_p3, %p7585_p1 }
  0xbc   : > { %7593 = shalt.err (!%p7590_p2)
}
  0xbd   : > { %s7594_s17 = scalar_lea.vmem %s531_s16, 128  ;;  %p7602_p4 = scmp.lt.s32.totalorder %s531_s16, %s531_s16 }
  0xbe   : > { %p7595_p5 = scmp.ne.s32.totalorder %s531_s16, %s7594_s17  ;;  %p7603_p10 = scmp.lt.s32.totalorder %s7594_s17, %s7594_s17 }
  0xc0   : > { %p7597_p7 = pnand %p7595_p5, %p8119_p8  ;;  %p7604_p11 = por %p7603_p10, %p7602_p4 }
  0xc2   : > { %p7598_p9 = pneg %p7597_p7 }
  0xc4   : > { %p7605_p12 = pnand %p7604_p11, %p7598_p9 }
  0xc6   : > { %7608 = shalt.err (!%p7605_p12)
}
  0xc7   : > { %7261 = dma.hbm_to_vmem [thread:$0]  (!%p8103_p6), %s9796_s13, 128, %s531_s16, [#allocation27]  }
  0xc8   : > { %s5999_s8 = sadd.s32 4294967294, %s7961_s21   ;;  %s8252_s10 = sadd.s32 1, %s7961_s21  }
  0xc9   : > { %s44_s1 = ssub.s32 %s7961_s21, %s8252_s10  ;;  %s47_s22 = sadd.s32 1, %s7957_s20 }
  0xca   : > { %p45_p13 = scmp.eq.s32.totalorder %s44_s1, 0  ;;  %p54_p0 = scmp.ne.s32.totalorder %s7957_s20, %s7953_s19 }
  0xcb   : > { %p55_p1 = scmp.eq.s32.totalorder %s7961_s21, 0  ;;  %p60_p3 = scmp.ne.s32.totalorder %s7953_s19, %s7949_s18 }
  0xcc   : > { %s8263_s29 = scalar_select %p45_p13, %s7957_s20, %s47_s22  }
  0xcd   : > { %p56_p2 = por %p55_p1, %p54_p0  ;;  %p9798_p5 = scmp.eq.s32.totalorder %s8087_s24, 0 }
  0xce   : > { %9797 = sst [smem:[#allocation40_spill]] %s8263_s29  ;;  %p388_p9 = scmp.eq.s32.totalorder %s8087_s24, 1 }
  0xcf   : > { %p8267_p7 = por %p9798_p5, %p60_p3  ;;  %p394_p4 = scmp.eq.s32.totalorder %s5999_s8, 1 }
  0xd0   : > { %p7291_p10 = scmp.lt.s32.totalorder %s7961_s21, 2  ;;  %s8274_s16 = sand.u32 1, %s7957_s20  }
  0xd1   : > { %s9799_s15 = scalar_select %p8267_p7, 1, 0 }
  0xd2   : > { %p8276_p11 = por %p388_p9, %p54_p0  ;;  %p8280_p12 = por %p394_p4, %p60_p3 }
  0xd3   : > { %p8284_p13 = pnand %p7291_p10, %p56_p2  ;;  %s573_s17 = sand.u32 1, %s7961_s21  }
  0xd4   : > { %s9800_s23 = scalar_select %p8276_p11, 1, 0 }
  0xd5   : > { %s9801_s27 = scalar_select %p8280_p12, 1, 0 }
  0xd6   : > { %s9802_s12 = scalar_select %p8284_p13, 1, 0 }
  0xd7   : > { %s6017_s30 = sshll.u32 %s7961_s21, 4  ;;  %s9803_s5 = sld [smem:[#allocation46_spill]] }
  0xd8   : > { %s576_s22 = scalar_lea.vmem [#allocation14], %s8274_s16  ;;  %s8301_s7 = scalar_lea.hbm %s9737_s6, %s6017_s30 }
  0xd9   : > { %s583_s25 = sshll.u32 %s576_s22, 4  ;;  %s8303_s9 = scalar_lea.sflag [#allocation15], %s573_s17  ;;  %s8296_s25 = int_to_ptr.vmem [resolvable:$true] %s583_s25 }
  0xda   : > { %p8309_p1 = pneg %p8284_p13 }
  0xdc   : > { %s9804_s14 = scalar_select %p8309_p1, 1, 0 }
  0xdd   : > { %s8293_s1 = scalar_lea.hbm %s9803_s5, %s6017_s30  ;;  %s7614_s13 = scalar_lea.hbm %s9803_s5, 32 }
  0xde   : > { %s7609_s11 = scalar_lea.hbm %s8293_s1, 16  ;;  %p7615_p5 = scmp.lt.u32.totalorder %s8293_s1, %s9803_s5 }
  0xdf   : > { %p7610_p0 = scmp.ne.s32.totalorder %s8293_s1, %s7609_s11  ;;  %p7616_p9 = scmp.lt.u32.totalorder %s7614_s13, %s7609_s11 }
  0xe0   : > { %p7618_p10 = scmp.lt.u32.totalorder %s7609_s11, %s8293_s1 }
  0xe1   : > { %p7612_p3 = pnand %p8309_p1, %p7610_p0  ;;  %p7617_p4 = por %p7616_p9, %p7615_p5 }
  0xe3   : > { %p7613_p2 = pneg %p7612_p3  ;;  %p7619_p12 = por %p7618_p10, %p7617_p4 }
  0xe5   : > { %p7620_p11 = pnand %p7619_p12, %p7613_p2 }
  0xe7   : > { %7623 = shalt.err (!%p7620_p11)
}
  0xe8   : > { %s7624_s17 = scalar_lea.vmem %s8296_s25, 16  ;;  %s7971_s30 = smov [#allocation14]  }
  0xe9   : > { %p7625_p0 = scmp.ne.s32.totalorder %s8296_s25, %s7624_s17  ;;  %s7629_s8 = sshll.u32 %s7971_s30, 4  ;;  %s7630_s8 = int_to_ptr.vmem [resolvable:$false] %s7629_s8 }
  0xea   : > { %s7631_s22 = scalar_lea.vmem %s7630_s8, 32  ;;  %p7632_p6 = scmp.lt.s32.totalorder %s8296_s25, %s7630_s8 }
  0xeb   : > { %p7627_p3 = pnand %p7625_p0, %p8309_p1  ;;  %p7633_p8 = scmp.lt.s32.totalorder %s7631_s22, %s7624_s17 }
  0xed   : > { %p7628_p7 = pneg %p7627_p3  ;;  %p7634_p5 = por %p7633_p8, %p7632_p6 }
  0xef   : > { %p7635_p9 = pnand %p7634_p5, %p7628_p7 }
  0xf1   : > { %7638 = shalt.err (!%p7635_p9)
}
  0xf2   : > { %7271 = dma.hbm_to_vmem [thread:$0]  (!%p8284_p13), %s8293_s1, 16, %s8296_s25, %s8303_s9  }
  0xf3   : > { %s7972_s11 = smov [#allocation10]   ;;  %s7973_s3 = smov [#allocation13]  }
  0xf4   : > { %s427_s13 = sshll.u32 %s7972_s11, 4  ;;  %s449_s0 = sshll.u32 %s7973_s3, 4  ;;  %s428_s13 = int_to_ptr.vmem [resolvable:$true] %s427_s13  ;;  %s8333_s0 = int_to_ptr.vmem [resolvable:$true] %s449_s0 }
  0xf5   : > { %s9805_s2 = sld [smem:[#allocation43_spill]]  ;;  %p9806_p8 = scmp.ne.s32.totalorder %s9791_s26, 0 }
  0xfb   : > { %s7639_s17 = scalar_lea.hbm %s9805_s2, 16 }
  0xfc   : > { %p7640_p6 = scmp.ne.s32.totalorder %s9805_s2, %s7639_s17  ;;  %p7646_p12 = scmp.lt.u32.totalorder %s7639_s17, %s9805_s2 }
  0xfe   : > { %p7642_p7 = pnand %p7640_p6, %p9806_p8 }
 0x100   : > { %p7643_p11 = pneg %p7642_p7 }
 0x102   : > { %p7648_p2 = pnand %p7646_p12, %p7643_p11 }
 0x104   : > { %7651 = shalt.err (!%p7648_p2)
}
 0x105   : > { %s7652_s1 = scalar_lea.vmem %s428_s13, 16  ;;  %s7659_s11 = scalar_lea.vmem %s428_s13, 32 }
 0x106   : > { %p7653_p4 = scmp.ne.s32.totalorder %s428_s13, %s7652_s1  ;;  %p7660_p3 = scmp.lt.s32.totalorder %s428_s13, %s428_s13 }
 0x107   : > { %p7661_p5 = scmp.lt.s32.totalorder %s7659_s11, %s7652_s1 }
 0x108   : > { %p7655_p10 = pnand %p7653_p4, %p9806_p8 }
 0x109   : > { %p7662_p9 = por %p7661_p5, %p7660_p3 }
 0x10a   : > { %p7656_p0 = pneg %p7655_p10 }
 0x10c   : > { %p7663_p13 = pnand %p7662_p9, %p7656_p0 }
 0x10e   : > { %7666 = shalt.err (!%p7663_p13)
}
 0x10f   : > { %p9807_p6 = scmp.ne.s32.totalorder %s9789_s28, 0  ;;  %s9808_s4 = sld [smem:[#allocation45_spill]] }
 0x111   : > { %7234 = dma.hbm_to_vmem [thread:$0]  (!%p9807_p6), %s9805_s2, 16, %s428_s13, [#allocation9]  }
 0x115   : > { %s7667_s8 = scalar_lea.hbm %s9808_s4, 16 }
 0x116   : > { %p7668_p7 = scmp.ne.s32.totalorder %s9808_s4, %s7667_s8  ;;  %p7674_p13 = scmp.lt.u32.totalorder %s7667_s8, %s9808_s4 }
 0x118   : > { %p7670_p11 = pnand %p7668_p7, %p9806_p8 }
 0x11a   : > { %p7671_p12 = pneg %p7670_p11 }
 0x11c   : > { %p7676_p2 = pnand %p7674_p13, %p7671_p12 }
 0x11e   : > { %7679 = shalt.err (!%p7676_p2)
}
 0x11f   : > { %s7680_s13 = scalar_lea.vmem %s8333_s0, 16  ;;  %s7687_s11 = scalar_lea.vmem %s8333_s0, 32 }
 0x120   : > { %p7681_p4 = scmp.ne.s32.totalorder %s8333_s0, %s7680_s13  ;;  %p7688_p3 = scmp.lt.s32.totalorder %s8333_s0, %s8333_s0 }
 0x121   : > { %p7689_p5 = scmp.lt.s32.totalorder %s7687_s11, %s7680_s13 }
 0x122   : > { %p7683_p10 = pnand %p7681_p4, %p9806_p8 }
 0x123   : > { %p7690_p9 = por %p7689_p5, %p7688_p3 }
 0x124   : > { %p7684_p0 = pneg %p7683_p10 }
 0x126   : > { %p7691_p7 = pnand %p7690_p9, %p7684_p0 }
 0x128   : > { %7694 = shalt.err (!%p7691_p7)
}
 0x129   : > { %7240 = dma.hbm_to_vmem [thread:$0]  (!%p9807_p6), %s9808_s4, 16, %s8333_s0, [#allocation12]  }
 0x12a   : > { %s7974_s29 = smov [#allocation19]   ;;  %s7975_s8 = smov [#allocation22]  }
 0x12b   : > { %s473_s30 = sshll.u32 %s7974_s29, 4  ;;  %s495_s17 = sshll.u32 %s7975_s8, 4  ;;  %s474_s30 = int_to_ptr.vmem [resolvable:$true] %s473_s30  ;;  %s8377_s17 = int_to_ptr.vmem [resolvable:$true] %s495_s17 }
 0x12c   : > { %s9809_s1 = sld [smem:[#allocation48_spill]] }
 0x132   : > { %s7695_s13 = scalar_lea.hbm %s9809_s1, 16 }
 0x133   : > { %p7696_p11 = scmp.ne.s32.totalorder %s9809_s1, %s7695_s13  ;;  %p7702_p2 = scmp.lt.u32.totalorder %s7695_s13, %s9809_s1 }
 0x135   : > { %p7698_p12 = pnand %p7696_p11, %p9806_p8 }
 0x137   : > { %p7699_p13 = pneg %p7698_p12 }
 0x139   : > { %p7704_p4 = pnand %p7702_p2, %p7699_p13 }
 0x13b   : > { %7707 = shalt.err (!%p7704_p4)
}
 0x13c   : > { %s7708_s3 = scalar_lea.vmem %s474_s30, 16  ;;  %s7715_s29 = scalar_lea.vmem %s474_s30, 32 }
 0x13d   : > { %p7709_p10 = scmp.ne.s32.totalorder %s474_s30, %s7708_s3  ;;  %p7716_p5 = scmp.lt.s32.totalorder %s474_s30, %s474_s30 }
 0x13e   : > { %p7717_p9 = scmp.lt.s32.totalorder %s7715_s29, %s7708_s3 }
 0x13f   : > { %p7711_p0 = pnand %p7709_p10, %p9806_p8 }
 0x140   : > { %p7718_p7 = por %p7717_p9, %p7716_p5 }
 0x141   : > { %p7712_p3 = pneg %p7711_p0 }
 0x143   : > { %p7719_p1 = pnand %p7718_p7, %p7712_p3 }
 0x145   : > { %7722 = shalt.err (!%p7719_p1)
}
 0x146   : > { %7246 = dma.hbm_to_vmem [thread:$0]  (!%p9807_p6), %s9809_s1, 16, %s474_s30, [#allocation18]  }
 0x147   : > { %s9810_s13 = sld [smem:[#allocation50_spill]] }
 0x14d   : > { %s7723_s11 = scalar_lea.hbm %s9810_s13, 16 }
 0x14e   : > { %p7724_p11 = scmp.ne.s32.totalorder %s9810_s13, %s7723_s11  ;;  %p7730_p1 = scmp.lt.u32.totalorder %s7723_s11, %s9810_s13 }
 0x150   : > { %p7726_p12 = pnand %p7724_p11, %p9806_p8 }
 0x152   : > { %p7727_p13 = pneg %p7726_p12 }
 0x154   : > { %p7732_p2 = pnand %p7730_p1, %p7727_p13 }
 0x156   : > { %7735 = shalt.err (!%p7732_p2)
}
 0x157   : > { %s7736_s30 = scalar_lea.vmem %s8377_s17, 16  ;;  %s7743_s2 = scalar_lea.vmem %s8377_s17, 32 }
 0x158   : > { %p7737_p4 = scmp.ne.s32.totalorder %s8377_s17, %s7736_s30  ;;  %p7744_p3 = scmp.lt.s32.totalorder %s8377_s17, %s8377_s17 }
 0x159   : > { %p7745_p5 = scmp.lt.s32.totalorder %s7743_s2, %s7736_s30 }
 0x15a   : > { %p7739_p10 = pnand %p7737_p4, %p9806_p8 }
 0x15b   : > { %p7746_p9 = por %p7745_p5, %p7744_p3 }
 0x15c   : > { %p7740_p0 = pneg %p7739_p10 }
 0x15e   : > { %p7747_p7 = pnand %p7746_p9, %p7740_p0 }
 0x160   : > { %7750 = shalt.err (!%p7747_p7)
}
 0x161   : > { %7252 = dma.hbm_to_vmem [thread:$0]  (!%p9807_p6), %s9810_s13, 16, %s8377_s17, [#allocation21]  }
 0x162   : > { %s7976_s25 = smov [#allocation25]   ;;  %s7977_s5 = smov [#allocation28]  }
 0x163   : > { %s519_s11 = sshll.u32 %s7976_s25, 4  ;;  %s541_s0 = sshll.u32 %s7977_s5, 4  ;;  %s520_s11 = int_to_ptr.vmem [resolvable:$true] %s519_s11  ;;  %s8421_s0 = int_to_ptr.vmem [resolvable:$true] %s541_s0 }
 0x164   : > { %s9811_s30 = sld [smem:[#allocation52_spill]] }
 0x16a   : > { %s7751_s2 = scalar_lea.hbm %s9811_s30, 128 }
 0x16b   : > { %p7752_p11 = scmp.ne.s32.totalorder %s9811_s30, %s7751_s2  ;;  %p7758_p1 = scmp.lt.u32.totalorder %s7751_s2, %s9811_s30 }
 0x16d   : > { %p7754_p12 = pnand %p7752_p11, %p9806_p8 }
 0x16f   : > { %p7755_p13 = pneg %p7754_p12 }
 0x171   : > { %p7760_p2 = pnand %p7758_p1, %p7755_p13 }
 0x173   : > { %7763 = shalt.err (!%p7760_p2)
}
 0x174   : > { %s7764_s22 = scalar_lea.vmem %s520_s11, 128  ;;  %p7772_p3 = scmp.lt.s32.totalorder %s520_s11, %s520_s11 }
 0x175   : > { %p7765_p4 = scmp.ne.s32.totalorder %s520_s11, %s7764_s22  ;;  %p7773_p5 = scmp.lt.s32.totalorder %s7764_s22, %s7764_s22 }
 0x177   : > { %p7767_p10 = pnand %p7765_p4, %p9806_p8  ;;  %p7774_p9 = por %p7773_p5, %p7772_p3 }
 0x179   : > { %p7768_p0 = pneg %p7767_p10 }
 0x17b   : > { %p7775_p7 = pnand %p7774_p9, %p7768_p0 }
 0x17d   : > { %7778 = shalt.err (!%p7775_p7)
}
 0x17e   : > { %7258 = dma.hbm_to_vmem [thread:$0]  (!%p9807_p6), %s9811_s30, 128, %s520_s11, [#allocation24]  }
 0x17f   : > { %s9812_s3 = sld [smem:[#allocation54_spill]] }
 0x185   : > { %s7779_s29 = scalar_lea.hbm %s9812_s3, 16 }
 0x186   : > { %p7780_p11 = scmp.ne.s32.totalorder %s9812_s3, %s7779_s29  ;;  %p7786_p1 = scmp.lt.u32.totalorder %s7779_s29, %s9812_s3 }
 0x188   : > { %p7782_p12 = pnand %p7780_p11, %p9806_p8 }
 0x18a   : > { %p7783_p13 = pneg %p7782_p12 }
 0x18c   : > { %p7788_p2 = pnand %p7786_p1, %p7783_p13 }
 0x18e   : > { %7791 = shalt.err (!%p7788_p2)
}
 0x18f   : > { %s7792_s11 = scalar_lea.vmem %s8421_s0, 16  ;;  %s7799_s4 = scalar_lea.vmem %s8421_s0, 32 }
 0x190   : > { %p7793_p4 = scmp.ne.s32.totalorder %s8421_s0, %s7792_s11  ;;  %p7800_p3 = scmp.lt.s32.totalorder %s8421_s0, %s8421_s0 }
 0x191   : > { %p7801_p5 = scmp.lt.s32.totalorder %s7799_s4, %s7792_s11 }
 0x192   : > { %p7795_p10 = pnand %p7793_p4, %p9806_p8 }
 0x193   : > { %p7802_p9 = por %p7801_p5, %p7800_p3 }
 0x194   : > { %p7796_p0 = pneg %p7795_p10 }
 0x196   : > { %p7803_p7 = pnand %p7802_p9, %p7796_p0 }
 0x198   : > { %7806 = shalt.err (!%p7803_p7)
}
 0x199   : > { %7264 = dma.hbm_to_vmem [thread:$0]  (!%p9807_p6), %s9812_s3, 16, %s8421_s0, [#allocation27]  }
 0x19a   : > { %s6014_s26 = sshll.u32 %s8274_s16, 6  ;;  %s6275_s5 = sshll.u32 %s7961_s21, 10 }
 0x19b   : > { %s9813_s8 = sld [smem:[#allocation41_spill]]  ;;  %s556_s28 = scalar_lea.vmem [#allocation5], %s6014_s26 }
 0x19c   : > { %s563_s22 = sshll.u32 %s556_s28, 4  ;;  %s553_s11 = scalar_lea.sflag [#allocation6], %s8274_s16  ;;  %s8472_s22 = int_to_ptr.vmem [resolvable:$true] %s563_s22 }
 0x19d   : > { %p9814_p11 = scmp.ne.s32.totalorder %s9804_s14, 0 }
 0x1a1   : > { %s8470_s17 = scalar_lea.hbm %s9813_s8, %s6275_s5  ;;  %s7812_s25 = scalar_lea.hbm %s9813_s8, 2048 }
 0x1a2   : > { %s7807_s4 = scalar_lea.hbm %s8470_s17, 1024  ;;  %p7813_p13 = scmp.lt.u32.totalorder %s8470_s17, %s9813_s8 }
 0x1a3   : > { %p7808_p8 = scmp.ne.s32.totalorder %s8470_s17, %s7807_s4  ;;  %p7814_p1 = scmp.lt.u32.totalorder %s7812_s25, %s7807_s4 }
 0x1a4   : > { %p7816_p4 = scmp.lt.u32.totalorder %s7807_s4, %s8470_s17 }
 0x1a5   : > { %p7810_p6 = pnand %p7808_p8, %p9814_p11  ;;  %p7815_p2 = por %p7814_p1, %p7813_p13 }
 0x1a7   : > { %p7811_p12 = pneg %p7810_p6  ;;  %p7817_p10 = por %p7816_p4, %p7815_p2 }
 0x1a9   : > { %p7818_p0 = pnand %p7817_p10, %p7811_p12 }
 0x1ab   : > { %7821 = shalt.err (!%p7818_p0)
}
 0x1ac   : > { %s7822_s26 = scalar_lea.vmem %s8472_s22, 1024  ;;  %s7978_s2 = smov [#allocation5]  }
 0x1ad   : > { %p7823_p3 = scmp.ne.s32.totalorder %s8472_s22, %s7822_s26  ;;  %s7827_s28 = sshll.u32 %s7978_s2, 4  ;;  %s7828_s28 = int_to_ptr.vmem [resolvable:$false] %s7827_s28 }
 0x1ae   : > { %s7829_s0 = scalar_lea.vmem %s7828_s28, 2048  ;;  %p7830_p7 = scmp.lt.s32.totalorder %s8472_s22, %s7828_s28 }
 0x1af   : > { %p7825_p5 = pnand %p7823_p3, %p9814_p11  ;;  %p7831_p8 = scmp.lt.s32.totalorder %s7829_s0, %s7822_s26 }
 0x1b1   : > { %p7826_p9 = pneg %p7825_p5  ;;  %p7832_p6 = por %p7831_p8, %p7830_p7 }
 0x1b3   : > { %p7833_p13 = pnand %p7832_p6, %p7826_p9 }
 0x1b5   : > { %7836 = shalt.err (!%p7833_p13)
}
 0x1b6   : > { %p9815_p12 = scmp.ne.s32.totalorder %s9802_s12, 0  ;;  %s9816_s4 = smov 8  }
 0x1b7   : > { %s9817_s1 = smov 128   ;;  %s593_s25 = scalar_lea.vmem [#allocation16], %s8274_s16 }
 0x1b8   : > { %7268 = dma.hbm_to_vmem [thread:$0]  (!%p9815_p12), %s8470_s17, 1024, %s8472_s22, %s553_s11, %s9817_s1, %s9817_s1, %s9816_s4  }
 0x1b9   : > { %s600_s5 = sshll.u32 %s593_s25, 4  ;;  %s7837_s29 = scalar_lea.hbm %s8301_s7, 16  ;;  %s601_s5 = int_to_ptr.vmem [resolvable:$true] %s600_s5 }
 0x1ba   : > { %p7838_p1 = scmp.ne.s32.totalorder %s8301_s7, %s7837_s29  ;;  %s7842_s28 = scalar_lea.hbm %s9737_s6, 32 }
 0x1bb   : > { %p7843_p10 = scmp.lt.u32.totalorder %s8301_s7, %s9737_s6  ;;  %p7844_p0 = scmp.lt.u32.totalorder %s7842_s28, %s7837_s29 }
 0x1bc   : > { %p7840_p2 = pnand %p7838_p1, %p9814_p11  ;;  %p7846_p5 = scmp.lt.u32.totalorder %s7837_s29, %s8301_s7 }
 0x1bd   : > { %p7845_p3 = por %p7844_p0, %p7843_p10 }
 0x1be   : > { %p7841_p4 = pneg %p7840_p2 }
 0x1bf   : > { %p7847_p9 = por %p7846_p5, %p7845_p3 }
 0x1c1   : > { %p7848_p7 = pnand %p7847_p9, %p7841_p4 }
 0x1c3   : > { %7851 = shalt.err (!%p7848_p7)
}
 0x1c4   : > { %s7852_s16 = scalar_lea.vmem %s601_s5, 16  ;;  %s7979_s17 = smov [#allocation16]  }
 0x1c5   : > { %p7853_p8 = scmp.ne.s32.totalorder %s601_s5, %s7852_s16  ;;  %s7857_s22 = sshll.u32 %s7979_s17, 4  ;;  %s7858_s22 = int_to_ptr.vmem [resolvable:$false] %s7857_s22 }
 0x1c6   : > { %s7859_s11 = scalar_lea.vmem %s7858_s22, 32  ;;  %p7860_p1 = scmp.lt.s32.totalorder %s601_s5, %s7858_s22 }
 0x1c7   : > { %p7855_p6 = pnand %p7853_p8, %p9814_p11  ;;  %p7861_p2 = scmp.lt.s32.totalorder %s7859_s11, %s7852_s16 }
 0x1c9   : > { %p7856_p13 = pneg %p7855_p6  ;;  %p7862_p12 = por %p7861_p2, %p7860_p1 }
 0x1cb   : > { %p7863_p0 = pnand %p7862_p12, %p7856_p13 }
 0x1cd   : > { %7866 = shalt.err (!%p7863_p0)
}
 0x1ce   : > { %p9818_p10 = scmp.ne.s32.totalorder %s9802_s12, 0  ;;  %s9819_s3 = sld [smem:[#allocation39_spill]] }
 0x1d0   : > { %7274 = dma.hbm_to_vmem [thread:$0]  (!%p9818_p10), %s8301_s7, 16, %s601_s5, %s8303_s9  }
 0x1d4   : > { %p9820_p4 = scmp.ne.s32.totalorder %s9819_s3, 0 }
 0x1d5   : > { %s8523_s14 = sand.u32 (!%p9820_p4), 1, %s7953_s19   ;;  %p9821_p11 = scmp.ne.s32.totalorder (!%p9820_p4), %s9799_s15, 0 }
 0x1d6   : > { %609 = sbr.rel (%p9820_p4) target bundleno = 2600 (0xa28), region = 80  ;;  %s6020_s4 = sshll.u32 (!%p9820_p4), %s8523_s14, 6 }
 0x1d7   : > { %s612_s1 = scalar_lea.sflag (!%p9820_p4), [#allocation6], %s8523_s14  ;;  %s8529_s25 = scalar_lea.vmem (!%p9820_p4), [#allocation5], %s6020_s4 }
 0x1dd   : > { %7912 = dma.done.wait (%p9821_p11), %s612_s1, 1024  }
 0x1de   : > { %7914 = vsyncadd (%p9821_p11), %s612_s1, 4294966272  ;;  %p9822_p12 = scmp.eq.s32.totalorder %s8087_s24, 0 }
 0x1e0   : > { %7916 = dma.done.wait (%p9822_p12), [#allocation9], 1168   ;;  %p9823_p3 = pmov %p9822_p12 }
 0x1e2   : > { %7918 = vsyncadd (%p9823_p3), [#allocation9], 4294966128  ;;  %p9824_p5 = pmov %p9823_p3 }
 0x1e3   : > { %p9825_p9 = pmov %p9823_p3 }
 0x1e4   : > { %7920 = dma.done.wait (%p9824_p5), [#allocation12], 32  }
 0x1e5   : > { %7922 = vsyncadd (%p9825_p9), [#allocation12], 4294967264  ;;  %s636_s7 = sand.u32 1, %s8087_s24   ;;  %s639_s12 = scalar_lea.vmem [#allocation14], %s8523_s14 }
 0x1e6   : > { %s637_s9 = scalar_lea.sflag [#allocation15], %s636_s7 }
 0x1e7   : > { %7924 = dma.done.wait (%p9821_p11), %s637_s9, 32  }
 0x1e8   : > { %7926 = vsyncadd (%p9821_p11), %s637_s9, 4294967264  ;;  %s647_s5 = scalar_lea.vmem [#allocation16], %s8523_s14  ;;  %p9826_p7 = pmov %p9823_p3 }
 0x1e9   : > { %p9827_p8 = pmov %p9823_p3 }
 0x1ea   : > { %7928 = dma.done.wait (%p9826_p7), [#allocation18], 2320  }
 0x1eb   : > { %7930 = vsyncadd (%p9827_p8), [#allocation18], 4294964976  ;;  %p9828_p6 = pmov %p9823_p3 }
 0x1ec   : > { %p9829_p13 = pmov %p9823_p3 }
 0x1ed   : > { %7932 = dma.done.wait (%p9828_p6), [#allocation21], 32  }
 0x1ee   : > { %7934 = vsyncadd (%p9829_p13), [#allocation21], 4294967264  ;;  %p9830_p1 = pmov %p9823_p3 }
 0x1f0   : > { %7936 = dma.done.wait (%p9830_p1), [#allocation24], 384   ;;  %p9831_p2 = pmov %p9830_p1 }
 0x1f1   : > { %p9832_p0 = pmov %p9830_p1 }
 0x1f2   : > { %7938 = vsyncadd (%p9831_p2), [#allocation24], 4294966912 }
 0x1f3   : > { %7940 = dma.done.wait (%p9832_p0), [#allocation27], 144   ;;  %p9833_p10 = pmov %p9832_p0 }
 0x1f4   : > { %vm9770_vm0 = vcmask 64512   ;;  %vm941_vm1 = vcmask 60416   ;;  %vm947_vm2 = vcmask 58368   ;;  %v7980_v0 = vmov 0.0   ;;  %v983_v1 = vld [vmem:[#allocation8] sm:$0xff]  ;;  %v955_v3 = vld [vmem:[%s8529_s25 + $0x18] sm:$0xff] }
 0x1f5   : > { %7942 = vsyncadd (%p9833_p10), [#allocation27], 4294967152  ;;  %940 = vst.msk [vmem:[#allocation2] sm:$0xff] %vm9770_vm0, %v7980_v0  ;;  %v945_v2 = vld [vmem:[%s8529_s25] sm:$0xff]  ;;  %6559 = vmatprep.subr.mxu0 %v983_v1  ;;  %7148 = vmatprep.subr.mxu1 %v983_v1  ;;  %v961_v6 = vld [vmem:[%s8529_s25 + $0x28] sm:$0xff]  ;;  %vm1135_vm3 = vcmask 130048  }
 0x1f6   : > { %942 = vst.msk [vmem:[#allocation2 + $0x8] sm:$0xf] %vm941_vm1, %v7980_v0  ;;  %944 = vst.msk [vmem:[#allocation2 + $0x64] sm:$0xf] %vm941_vm1, %v7980_v0  ;;  %v958_v5 = vld [vmem:[%s8529_s25 + $0x20] sm:$0xff]  ;;  %6560 = vmatpush3.msra.mxu0 %v983_v1  ;;  %v1157_v7 = vld [vmem:[#allocation8 + $0x8] sm:$0xff]  ;;  %7149 = vmatpush3.msra.mxu1 %v983_v1 }
 0x1f7   : > { %943 = vst.msk [vmem:[#allocation2 + $0x5c] sm:$0xff] %vm9770_vm0, %v7980_v0  ;;  %946 = vst.msk [vmem:[#allocation2 + $0xc] sm:$0xff] %vm9770_vm0, %v945_v2  ;;  %v949_v8 = vld [vmem:[%s8529_s25 + $0x8] sm:$0xff]  ;;  %v952_v9 = vld [vmem:[%s8529_s25 + $0x10] sm:$0xff]  ;;  %6576 = vmatprep.subr.mxu1 %v1157_v7  ;;  %vm7982_vm4 = vmmov 0   ;;  %vm9771_vm9 = vcmask 654336  }
 0x1f8   : > { %957 = vst.msk [vmem:[#allocation2 + $0x32] sm:$0x3] %vm947_vm2, %v7980_v0  ;;  %948 = vst.msk [vmem:[#allocation2 + $0x14] sm:$0x3] %vm947_vm2, %v7980_v0  ;;  %v964_v10 = vld [vmem:[%s8529_s25 + $0x30] sm:$0xff]  ;;  %v967_v12 = vld [vmem:[%s8529_s25 + $0x38] sm:$0xff] }
 0x1f9   : > { %951 = vst.msk [vmem:[#allocation2 + $0x1e] sm:$0x3] %vm947_vm2, %v7980_v0  ;;  %954 = vst.msk [vmem:[#allocation2 + $0x28] sm:$0x3] %vm947_vm2, %v7980_v0  ;;  %v1344_v11 = vld [vmem:[#allocation8 + $0x10] sm:$0xff]  ;;  %v1531_v18 = vld [vmem:[#allocation8 + $0x18] sm:$0xff] }
 0x1fa   : > { %960 = vst.msk [vmem:[#allocation2 + $0x3c] sm:$0x3] %vm947_vm2, %v7980_v0  ;;  %963 = vst.msk [vmem:[#allocation2 + $0x46] sm:$0x3] %vm947_vm2, %v7980_v0  ;;  %6593 = vmatprep.subr.mxu0 %v1344_v11  ;;  %v1718_v21 = vld [vmem:[#allocation8 + $0x20] sm:$0xff]  ;;  %v1905_v29 = vld [vmem:[#allocation8 + $0x28] sm:$0xff] }
 0x1fb   : > { %966 = vst.msk [vmem:[#allocation2 + $0x50] sm:$0x3] %vm947_vm2, %v7980_v0  ;;  %969 = vst.msk [vmem:[#allocation2 + $0x5a] sm:$0x3] %vm947_vm2, %v7980_v0  ;;  %v2092_v32 = vld [vmem:[#allocation8 + $0x30] sm:$0xff]  ;;  %v2279_v48 = vld [vmem:[#allocation8 + $0x38] sm:$0xff] }
 0x1fc   : > { %956 = vst.msk [vmem:[#allocation2 + $0x2a] sm:$0xff] %vm9770_vm0, %v955_v3  ;;  %959 = vst.msk [vmem:[#allocation2 + $0x34] sm:$0xff] %vm9770_vm0, %v958_v5  ;;  %v2466_v50 = vld [vmem:[#allocation8 + $0x40] sm:$0xff]  ;;  %vm3257_vm10 = vcmask 125952   ;;  %s733_s15 = scalar_lea.vmem [#allocation29], %s6020_s4  ;;  %s6276_s29 = sshll.u32 %s8087_s24, 10 }
 0x1fd   : > { %v973_v4 = vld [vmem:[#allocation2 + $0x1] sm:$0xff]  ;;  %962 = vst.msk [vmem:[#allocation2 + $0x3e] sm:$0xff] %vm9770_vm0, %v961_v6  ;;  %950 = vst.msk [vmem:[#allocation2 + $0x16] sm:$0xff] %vm9770_vm0, %v949_v8  ;;  %s5775_s26 = sshll.u32 %s733_s15, 4  ;;  %s9890_s0 = sld [smem:[#allocation55_spill]]  ;;  %s9684_s26 = int_to_ptr.vmem [resolvable:$true] %s5775_s26 }
 0x1fe   : > { %6561 = vmatprep.mubr.msk.f32.mxu0 %vm9770_vm0, %v973_v4  ;;  %953 = vst.msk [vmem:[#allocation2 + $0x20] sm:$0xff] %vm9770_vm0, %v952_v9  ;;  %965 = vst.msk [vmem:[#allocation2 + $0x48] sm:$0xff] %vm9770_vm0, %v964_v10  ;;  %v974_v13 = vld [vmem:[#allocation2 + $0x9] sm:$0xff]  ;;  %s5762_s24 = scalar_lea.sflag [#allocation7], %s8523_s14  ;;  %s7867_s17 = scalar_lea.vmem %s9684_s26, 1024 }
 0x1ff   : > { %968 = vst.msk [vmem:[#allocation2 + $0x52] sm:$0xff] %vm9770_vm0, %v967_v12  ;;  %6562 = vmatmul.mubr.msk.f32.vlgmr.msra.gmra.mrb[0].mxu0 %vm9770_vm0, %v974_v13  ;;  %v1146_v23 = vld [vmem:[#allocation2 + $0x2] sm:$0xff]  ;;  %v1147_v26 = vld [vmem:[#allocation2 + $0xa] sm:$0xff]  ;;  %p7868_p4 = scmp.ne.s32.totalorder %s9684_s26, %s7867_s17  ;;  %p9891_p11 = scmp.ne.s32.totalorder %s9800_s23, 0 }
 0x200   : > { %6594 = vmatpush3.msra.mxu0 %v1344_v11  ;;  %v1333_v25 = vld [vmem:[#allocation2 + $0x3] sm:$0xff]  ;;  %v1334_v28 = vld [vmem:[#allocation2 + $0xb] sm:$0xff]  ;;  %3256 = vst.msk [vmem:[#allocation3] sm:$0xff] %vm1135_vm3, %v7980_v0  ;;  %3259 = vst.msk [vmem:[#allocation3 + $0x5c] sm:$0xff] %vm1135_vm3, %v7980_v0  ;;  %s7983_s22 = smov [#allocation29]  }
 0x201   : > { %6627 = vmatprep.subr.mxu0 %v1718_v21  ;;  %v1707_v46 = vld [vmem:[#allocation2 + $0xc] sm:$0xff]  ;;  %3258 = vst.msk [vmem:[#allocation3 + $0x8] sm:$0xf] %vm3257_vm10, %v7980_v0  ;;  %3260 = vst.msk [vmem:[#allocation3 + $0x64] sm:$0xf] %vm3257_vm10, %v7980_v0  ;;  %p7869_p12 = pnand %p7868_p4, %p9891_p11  ;;  %s7871_s11 = sshll.u32 %s7983_s22, 4  ;;  %s7872_s11 = int_to_ptr.vmem [resolvable:$false] %s7871_s11 }
 0x202   : > { %v1894_v58 = vld [vmem:[#allocation2 + $0xd] sm:$0xff]  ;;  %s7873_s3 = scalar_lea.vmem %s7872_s11, 2048  ;;  %p7874_p5 = scmp.lt.s32.totalorder %s9684_s26, %s7872_s11 }
 0x203   : > { %v979_v14 = vld [vmem:[#allocation2 + $0x31] sm:$0xff]  ;;  %v978_v24 = vld [vmem:[#allocation2 + $0x29] sm:$0xff]  ;;  %s9682_s16 = scalar_lea.hbm %s9890_s0, %s6276_s29  ;;  %p7870_p3 = pneg %p7869_p12 }
 0x204   : > { %v980_v15 = vld [vmem:[#allocation2 + $0x39] sm:$0xff]  ;;  %6570 = vmatprep.mubr.msk.f32.mxu1 %vm9770_vm0, %v979_v14  ;;  %v975_v16 = vld [vmem:[#allocation2 + $0x11] sm:$0xff]  ;;  %p7875_p9 = scmp.lt.s32.totalorder %s7873_s3, %s7867_s17 }
 0x205   : > { %v976_v17 = vld [vmem:[#allocation2 + $0x19] sm:$0xff]  ;;  %6571 = vmatmul.mubr.msk.f32.vlgmr.msra.gmra.mrb[0].mxu1 %vm9770_vm0, %v980_v15  ;;  %6564 = vmatprep.mubr.msk.f32.mxu0 %vm9770_vm0, %v975_v16  ;;  %v981_v19 = vld [vmem:[#allocation2 + $0x41] sm:$0xff]  ;;  %v982_v22 = vld [vmem:[#allocation2 + $0x49] sm:$0xff] }
 0x206   : > { %v977_v20 = vld [vmem:[#allocation2 + $0x21] sm:$0xff]  ;;  %6577 = vmatpush3.msra.mxu1 %v1157_v7  ;;  %6573 = vmatprep.mubr.msk.f32.mxu1 %vm9770_vm0, %v981_v19  ;;  %v1148_v27 = vld [vmem:[#allocation2 + $0x12] sm:$0xff]  ;;  %v1151_v36 = vld [vmem:[#allocation2 + $0x2a] sm:$0xff]  ;;  %p7876_p7 = por %p7875_p9, %p7874_p5 }
 0x207   : > { %6565 = vmatmul.mubr.msk.f32.gmra.mrb[2].mxu0 %vm9770_vm0, %v976_v17  ;;  %6610 = vmatprep.subr.mxu1 %v1531_v18  ;;  %v1335_v30 = vld [vmem:[#allocation2 + $0x13] sm:$0xff]  ;;  %v1150_v33 = vld [vmem:[#allocation2 + $0x22] sm:$0xff]  ;;  %v1338_v38 = vld [vmem:[#allocation2 + $0x2b] sm:$0xff] }
 0x208   : > { %6567 = vmatprep.mubr.msk.f32.mxu0 %vm9770_vm0, %v977_v20  ;;  %v1149_v31 = vld [vmem:[#allocation2 + $0x1a] sm:$0xff]  ;;  %v1337_v35 = vld [vmem:[#allocation2 + $0x23] sm:$0xff]  ;;  %v1152_v37 = vld [vmem:[#allocation2 + $0x32] sm:$0xff]  ;;  %p7877_p8 = pnand %p7876_p7, %p7870_p3 }
 0x209   : > { %6574 = vmatmul.mubr.msk.f32.gmra.mrb[2].mxu1 %vm9770_vm0, %v982_v22  ;;  %v1336_v34 = vld [vmem:[#allocation2 + $0x1b] sm:$0xff]  ;;  %v1339_v39 = vld [vmem:[#allocation2 + $0x33] sm:$0xff]  ;;  %v1341_v43 = vld [vmem:[#allocation2 + $0x43] sm:$0xff] }
 0x20a   : > { %6578 = vmatprep.mubr.msk.f32.mxu1 %vm9770_vm0, %v1146_v23  ;;  %v1153_v40 = vld [vmem:[#allocation2 + $0x3a] sm:$0xff]  ;;  %v1154_v41 = vld [vmem:[#allocation2 + $0x42] sm:$0xff]  ;;  %v1155_v44 = vld [vmem:[#allocation2 + $0x4a] sm:$0xff] }
 0x20b   : > { %6568 = vmatmul.mubr.msk.f32.gmra.mrb[4].mxu0 %vm9770_vm0, %v978_v24  ;;  %v1340_v42 = vld [vmem:[#allocation2 + $0x3b] sm:$0xff]  ;;  %v1342_v45 = vld [vmem:[#allocation2 + $0x4b] sm:$0xff]  ;;  %v1529_v57 = vld [vmem:[#allocation2 + $0x53] sm:$0xff] }
 0x20c   : > { %6595 = vmatprep.mubr.msk.f32.mxu0 %vm9770_vm0, %v1333_v25  ;;  %v1708_v47 = vld [vmem:[#allocation2 + $0x14] sm:$0xff]  ;;  %v1709_v49 = vld [vmem:[#allocation2 + $0x1c] sm:$0xff]  ;;  %v1710_v51 = vld [vmem:[#allocation2 + $0x24] sm:$0xff] }
 0x20d   : > { %6579 = vmatmul.mubr.msk.f32.vlgmr.msra.gmra.mrb[4].mxu1 %vm9770_vm0, %v1147_v26  ;;  %v1711_v52 = vld [vmem:[#allocation2 + $0x2c] sm:$0xff]  ;;  %v1712_v53 = vld [vmem:[#allocation2 + $0x34] sm:$0xff]  ;;  %v1713_v54 = vld [vmem:[#allocation2 + $0x3c] sm:$0xff] }
 0x20e   : > { %6611 = vmatpush3.msra.mxu1 %v1531_v18  ;;  %6581 = vmatprep.mubr.msk.f32.mxu1 %vm9770_vm0, %v1148_v27  ;;  %v1714_v55 = vld [vmem:[#allocation2 + $0x44] sm:$0xff]  ;;  %v1715_v56 = vld [vmem:[#allocation2 + $0x4c] sm:$0xff]  ;;  %v1716_v59 = vld [vmem:[#allocation2 + $0x54] sm:$0xff]  ;;  %v7981_v27 = vmov 0.0|0.0  }
 0x20f   : > { %6596 = vmatmul.mubr.msk.f32.vlgmr.msra.gmra.mrb[6].mxu0 %vm9770_vm0, %v1334_v28  ;;  %6644 = vmatprep.subr.mxu1 %v1905_v29  ;;  %v1895_v60 = vld [vmem:[#allocation2 + $0x15] sm:$0xff]  ;;  %v1896_v61 = vld [vmem:[#allocation2 + $0x1d] sm:$0xff]  ;;  %v1897_v62 = vld [vmem:[#allocation2 + $0x25] sm:$0xff] }
 0x210   : > { %6628 = vmatpush3.msra.mxu0 %v1718_v21  ;;  %6598 = vmatprep.mubr.msk.f32.mxu0 %vm9770_vm0, %v1335_v30  ;;  %v1898_v63 = vld [vmem:[#allocation2 + $0x2d] sm:$0xff]  ;;  %v1899_v1 = vld [vmem:[#allocation2 + $0x35] sm:$0xff]  ;;  %v1900_v2 = vld [vmem:[#allocation2 + $0x3d] sm:$0xff] }
 0x211   : > { %6582 = vmatmul.mubr.msk.f32.gmra.mrb[6].mxu1 %vm9770_vm0, %v1149_v31  ;;  %6661 = vmatprep.subr.mxu0 %v2092_v32  ;;  %v1901_v3 = vld [vmem:[#allocation2 + $0x45] sm:$0xff]  ;;  %v1902_v4 = vld [vmem:[#allocation2 + $0x4d] sm:$0xff]  ;;  %v1903_v5 = vld [vmem:[#allocation2 + $0x55] sm:$0xff] }
 0x212   : > { %6584 = vmatprep.mubr.msk.f32.mxu1 %vm9770_vm0, %v1150_v33  ;;  %v2268_v6 = vld [vmem:[#allocation2 + $0x16] sm:$0xff]  ;;  %v2269_v9 = vld [vmem:[#allocation2 + $0x1e] sm:$0xff]  ;;  %v2270_v10 = vld [vmem:[#allocation2 + $0x26] sm:$0xff] }
 0x213   : > { %6599 = vmatmul.mubr.msk.f32.gmra.mrb[8].mxu0 %vm9770_vm0, %v1336_v34  ;;  %v2090_v7 = vld [vmem:[#allocation2 + $0x5d] sm:$0xff]  ;;  %v2457_v12 = vld [vmem:[#allocation2 + $0x27] sm:$0xff]  ;;  %v2458_v15 = vld [vmem:[#allocation2 + $0x2f] sm:$0xff] }
 0x214   : > { %6601 = vmatprep.mubr.msk.f32.mxu0 %vm9770_vm0, %v1337_v35  ;;  %v2455_v8 = vld [vmem:[#allocation2 + $0x17] sm:$0xff]  ;;  %v2456_v11 = vld [vmem:[#allocation2 + $0x1f] sm:$0xff]  ;;  %v2271_v13 = vld [vmem:[#allocation2 + $0x2e] sm:$0xff] }
 0x215   : > { %6585 = vmatmul.mubr.msk.f32.gmra.mrb[8].mxu1 %vm9770_vm0, %v1151_v36  ;;  %v2272_v14 = vld [vmem:[#allocation2 + $0x36] sm:$0xff]  ;;  %v2273_v17 = vld [vmem:[#allocation2 + $0x3e] sm:$0xff]  ;;  %v2274_v18 = vld [vmem:[#allocation2 + $0x46] sm:$0xff] }
 0x216   : > { %6587 = vmatprep.mubr.msk.f32.mxu1 %vm9770_vm0, %v1152_v37  ;;  %v2459_v16 = vld [vmem:[#allocation2 + $0x37] sm:$0xff]  ;;  %v2460_v19 = vld [vmem:[#allocation2 + $0x3f] sm:$0xff]  ;;  %v2461_v20 = vld [vmem:[#allocation2 + $0x47] sm:$0xff] }
 0x217   : > { %6602 = vmatmul.mubr.msk.f32.gmra.mrb[10].mxu0 %vm9770_vm0, %v1338_v38  ;;  %v2275_v21 = vld [vmem:[#allocation2 + $0x4e] sm:$0xff]  ;;  %v2276_v22 = vld [vmem:[#allocation2 + $0x56] sm:$0xff]  ;;  %v2277_v25 = vld [vmem:[#allocation2 + $0x5e] sm:$0xff] }
 0x218   : > { %6604 = vmatprep.mubr.msk.f32.mxu0 %vm9770_vm0, %v1339_v39  ;;  %v2462_v23 = vld [vmem:[#allocation2 + $0x4f] sm:$0xff]  ;;  %v2463_v24 = vld [vmem:[#allocation2 + $0x57] sm:$0xff]  ;;  %v2464_v26 = vld [vmem:[#allocation2 + $0x5f] sm:$0xff] }
 0x219   : > { %6588 = vmatmul.mubr.msk.f32.gmra.mrb[10].mxu1 %vm9770_vm0, %v1153_v40 }
 0x21a   : > { %6590 = vmatprep.mubr.msk.f32.mxu1 %vm9770_vm0, %v1154_v41 }
 0x21b   : > { %6605 = vmatmul.mubr.msk.f32.gmra.mrb[12].mxu0 %vm9770_vm0, %v1340_v42 }
 0x21c   : > { %6607 = vmatprep.mubr.msk.f32.mxu0 %vm9770_vm0, %v1341_v43 }
 0x21d   : > { %6591 = vmatmul.mubr.msk.f32.gmra.mrb[12].mxu1 %vm9770_vm0, %v1155_v44 }
 0x21e   : > { %6612 = vmatprep.mubr.msk.f32.mxu1 %vm9770_vm0, %v1334_v28  ;;  %v6035_v28 = vld [vmem:[#allocation10] ss:$0 sm:$0xff] }
 0x21f   : > { %6608 = vmatmul.mubr.msk.f32.gmra.mrb[14].mxu0 %vm9770_vm0, %v1342_v45 }
 0x220   : > { %6629 = vmatprep.mubr.msk.f32.mxu0 %vm9770_vm0, %v1707_v46 }
 0x221   : > { %6613 = vmatmul.mubr.msk.f32.vlgmr.msra.gmra.mrb[14].mxu1 %vm9770_vm0, %v1335_v30 }
 0x222   : > { %6645 = vmatpush3.msra.mxu1 %v1905_v29  ;;  %6615 = vmatprep.mubr.msk.f32.mxu1 %vm9770_vm0, %v1336_v34 }
 0x223   : > { %6630 = vmatmul.mubr.msk.f32.vlgmr.msra.gmra.mrb[16].mxu0 %vm9770_vm0, %v1708_v47  ;;  %6678 = vmatprep.subr.mxu1 %v2279_v48 }
 0x224   : > { %6662 = vmatpush3.msra.mxu0 %v2092_v32  ;;  %6632 = vmatprep.mubr.msk.f32.mxu0 %vm9770_vm0, %v1709_v49 }
 0x225   : > { %6616 = vmatmul.mubr.msk.f32.gmra.mrb[16].mxu1 %vm9770_vm0, %v1337_v35  ;;  %6695 = vmatprep.subr.mxu0 %v2466_v50 }
 0x226   : > { %6618 = vmatprep.mubr.msk.f32.mxu1 %vm9770_vm0, %v1338_v38 }
 0x227   : > { %6633 = vmatmul.mubr.msk.f32.gmra.mrb[18].mxu0 %vm9770_vm0, %v1710_v51 }
 0x228   : > { %6635 = vmatprep.mubr.msk.f32.mxu0 %vm9770_vm0, %v1711_v52 }
 0x229   : > { %6619 = vmatmul.mubr.msk.f32.gmra.mrb[18].mxu1 %vm9770_vm0, %v1339_v39 }
 0x22a   : > { %6621 = vmatprep.mubr.msk.f32.mxu1 %vm9770_vm0, %v1340_v42 }
 0x22b   : > { %6636 = vmatmul.mubr.msk.f32.gmra.mrb[20].mxu0 %vm9770_vm0, %v1712_v53 }
 0x22c   : > { %6638 = vmatprep.mubr.msk.f32.mxu0 %vm9770_vm0, %v1713_v54 }
 0x22d   : > { %6622 = vmatmul.mubr.msk.f32.gmra.mrb[20].mxu1 %vm9770_vm0, %v1341_v43 }
 0x22e   : > { %6624 = vmatprep.mubr.msk.f32.mxu1 %vm9770_vm0, %v1342_v45 }
 0x22f   : > { %6639 = vmatmul.mubr.msk.f32.gmra.mrb[22].mxu0 %vm9770_vm0, %v1714_v55 }
 0x230   : > { %6641 = vmatprep.mubr.msk.f32.mxu0 %vm9770_vm0, %v1715_v56 }
 0x231   : > { %6625 = vmatmul.mubr.msk.f32.gmra.mrb[22].mxu1 %vm9770_vm0, %v1529_v57 }
 0x232   : > { %6646 = vmatprep.mubr.msk.f32.mxu1 %vm9770_vm0, %v1894_v58 }
 0x233   : > { %6642 = vmatmul.mubr.msk.f32.gmra.mrb[24].mxu0 %vm9770_vm0, %v1716_v59 }
 0x234   : > { %6663 = vmatprep.mubr.msk.f32.mxu0 %vm9770_vm0, %v1895_v60 }
 0x235   : > { %6647 = vmatmul.mubr.msk.f32.vlgmr.msra.gmra.mrb[24].mxu1 %vm9770_vm0, %v1895_v60 }
 0x236   : > { %6679 = vmatpush3.msra.mxu1 %v2279_v48  ;;  %6649 = vmatprep.mubr.msk.f32.mxu1 %vm9770_vm0, %v1896_v61 }
 0x237   : > { %6664 = vmatmul.mubr.msk.f32.vlgmr.msra.gmra.mrb[26].mxu0 %vm9770_vm0, %v1896_v61  ;;  %7040 = vmatprep.subr.bf16.mxu1 %v7981_v27 }
 0x238   : > { %6696 = vmatpush3.msra.mxu0 %v2466_v50  ;;  %6666 = vmatprep.mubr.msk.f32.mxu0 %vm9770_vm0, %v1897_v62 }
 0x239   : > { %6650 = vmatmul.mubr.msk.f32.gmra.mrb[26].mxu1 %vm9770_vm0, %v1897_v62  ;;  %7055 = vmatprep.subr.bf16.mxu0 %v7981_v27 }
 0x23a   : > { %6652 = vmatprep.mubr.msk.f32.mxu1 %vm9770_vm0, %v1898_v63 }
 0x23b   : > { %6667 = vmatmul.mubr.msk.f32.gmra.mrb[28].mxu0 %vm9770_vm0, %v1898_v63 }
 0x23c   : > { %6669 = vmatprep.mubr.msk.f32.mxu0 %vm9770_vm0, %v1899_v1 }
 0x23d   : > { %6653 = vmatmul.mubr.msk.f32.gmra.mrb[28].mxu1 %vm9770_vm0, %v1899_v1 }
 0x23e   : > { %6655 = vmatprep.mubr.msk.f32.mxu1 %vm9770_vm0, %v1900_v2 }
 0x23f   : > { %6670 = vmatmul.mubr.msk.f32.gmra.mrb[30].mxu0 %vm9770_vm0, %v1900_v2 }
 0x240   : > { %6672 = vmatprep.mubr.msk.f32.mxu0 %vm9770_vm0, %v1901_v3 }
 0x241   : > { %6656 = vmatmul.mubr.msk.f32.gmra.mrb[30].mxu1 %vm9770_vm0, %v1901_v3 }
 0x242   : > { %6658 = vmatprep.mubr.msk.f32.mxu1 %vm9770_vm0, %v1902_v4 }
 0x243   : > { %6673 = vmatmul.mubr.msk.f32.gmra.mrb[32].mxu0 %vm9770_vm0, %v1902_v4 }
 0x244   : > { %6675 = vmatprep.mubr.msk.f32.mxu0 %vm9770_vm0, %v1903_v5 }
 0x245   : > { %6659 = vmatmul.mubr.msk.f32.gmra.mrb[32].mxu1 %vm9770_vm0, %v1903_v5 }
 0x246   : > { %6680 = vmatprep.mubr.msk.f32.mxu1 %vm9770_vm0, %v2268_v6 }
 0x247   : > { %6676 = vmatmul.mubr.msk.f32.gmra.mrb[34].mxu0 %vm9770_vm0, %v2090_v7 }
 0x248   : > { %6697 = vmatprep.mubr.msk.f32.mxu0 %vm9770_vm0, %v2455_v8 }
 0x249   : > { %6681 = vmatmul.mubr.msk.f32.vlgmr.msra.gmra.mrb[34].mxu1 %vm9770_vm0, %v2269_v9 }
 0x24a   : > { %6683 = vmatprep.mubr.msk.f32.mxu1 %vm9770_vm0, %v2270_v10 }
 0x24b   : > { %6698 = vmatmul.mubr.msk.f32.vlgmr.msra.gmra.mrb[36].mxu0 %vm9770_vm0, %v2456_v11 }
 0x24c   : > { %6700 = vmatprep.mubr.msk.f32.mxu0 %vm9770_vm0, %v2457_v12 }
 0x24d   : > { %6684 = vmatmul.mubr.msk.f32.gmra.mrb[36].mxu1 %vm9770_vm0, %v2271_v13 }
 0x24e   : > { %6686 = vmatprep.mubr.msk.f32.mxu1 %vm9770_vm0, %v2272_v14 }
 0x24f   : > { %6701 = vmatmul.mubr.msk.f32.gmra.mrb[38].mxu0 %vm9770_vm0, %v2458_v15 }
 0x250   : > { %6703 = vmatprep.mubr.msk.f32.mxu0 %vm9770_vm0, %v2459_v16 }
 0x251   : > { %6687 = vmatmul.mubr.msk.f32.gmra.mrb[38].mxu1 %vm9770_vm0, %v2273_v17 }
 0x252   : > { %6689 = vmatprep.mubr.msk.f32.mxu1 %vm9770_vm0, %v2274_v18 }
 0x253   : > { %6704 = vmatmul.mubr.msk.f32.gmra.mrb[40].mxu0 %vm9770_vm0, %v2460_v19 }
 0x254   : > { %6706 = vmatprep.mubr.msk.f32.mxu0 %vm9770_vm0, %v2461_v20 }
 0x255   : > { %6690 = vmatmul.mubr.msk.f32.gmra.mrb[40].mxu1 %vm9770_vm0, %v2275_v21 }
 0x256   : > { %6692 = vmatprep.mubr.msk.f32.mxu1 %vm9770_vm0, %v2276_v22 }
 0x257   : > { %6707 = vmatmul.mubr.msk.f32.gmra.mrb[42].mxu0 %vm9770_vm0, %v2462_v23 }
 0x258   : > { %6709 = vmatprep.mubr.msk.f32.mxu0 %vm9770_vm0, %v2463_v24 }
 0x259   : > { %6693 = vmatmul.mubr.msk.f32.gmra.mrb[42].mxu1 %vm9770_vm0, %v2277_v25 }
 0x25a   : > { %6732 = vmatprep.mubr.msk.f32.mxu1 %vm7982_vm4, %v7980_v0 }
 0x25b   : > { %6710 = vmatmul.mubr.msk.f32.gmra.mrb[44].mxu0 %vm9770_vm0, %v2464_v26 }
 0x25c   : > { %6755 = vmatprep.mubr.msk.f32.mxu0 %vm7982_vm4, %v7980_v0 }
 0x2d2   : > { %v6563_v29 = vpop.f32.mrb[0].mxu0 }
 0x2d3   : > { %v1092_v30 = vadd.f32 %v6563_v29, %v6035_v28  ;;  %v1086_v31 = vpop.f32.mrb[1].mxu0 }
 0x2d4   : > { %v1087_v32 = vadd.f32 %v6035_v28, %v1086_v31 }
 0x2d5   : > { %1137 = vst.msk [vmem:[#allocation4 + $0x8] sm:$0xff] %vm1135_vm3, %v1092_v30 }
 0x2d6   : > { %1136 = vst.msk [vmem:[#allocation4] sm:$0xff] %vm1135_vm3, %v1087_v32 }
 0x2d8   : > { %v6572_v33 = vpop.f32.mrb[0].mxu1 }
 0x2d9   : > { %v1122_v34 = vadd.f32 %v6572_v33, %v6035_v28  ;;  %v1116_v35 = vpop.f32.mrb[1].mxu1 }
 0x2da   : > { %v1117_v36 = vadd.f32 %v6035_v28, %v1116_v35  ;;  %v6566_v37 = vpop.f32.mrb[2].mxu0 }
 0x2db   : > { %1143 = vst.msk [vmem:[#allocation4 + $0x38] sm:$0xff] %vm1135_vm3, %v1122_v34  ;;  %v1102_v38 = vadd.f32 %v6566_v37, %v6035_v28  ;;  %v1096_v39 = vpop.f32.mrb[3].mxu0 }
 0x2dc   : > { %1142 = vst.msk [vmem:[#allocation4 + $0x30] sm:$0xff] %vm1135_vm3, %v1117_v36  ;;  %v1097_v40 = vadd.f32 %v6035_v28, %v1096_v39  ;;  %v6575_v41 = vpop.f32.mrb[2].mxu1  ;;  %v1304_v50 = vld [vmem:[#allocation4 + $0x8] sm:$0xff] }
 0x2dd   : > { %1139 = vst.msk [vmem:[#allocation4 + $0x18] sm:$0xff] %vm1135_vm3, %v1102_v38  ;;  %v1132_v42 = vadd.f32 %v6575_v41, %v6035_v28  ;;  %v1126_v43 = vpop.f32.mrb[3].mxu1  ;;  %v1303_v53 = vld [vmem:[#allocation4] sm:$0xff] }
 0x2de   : > { %1138 = vst.msk [vmem:[#allocation4 + $0x10] sm:$0xff] %vm1135_vm3, %v1097_v40  ;;  %v1127_v44 = vadd.f32 %v6035_v28, %v1126_v43  ;;  %v6569_v45 = vpop.f32.mrb[4].mxu0 }
 0x2df   : > { %1145 = vst.msk [vmem:[#allocation4 + $0x48] sm:$0xff] %vm1135_vm3, %v1132_v42  ;;  %v1112_v46 = vadd.f32 %v6569_v45, %v6035_v28  ;;  %v1106_v47 = vpop.f32.mrb[5].mxu0 }
 0x2e0   : > { %1144 = vst.msk [vmem:[#allocation4 + $0x40] sm:$0xff] %vm1135_vm3, %v1127_v44  ;;  %v1107_v48 = vadd.f32 %v6035_v28, %v1106_v47  ;;  %v6580_v49 = vpop.f32.mrb[4].mxu1 }
 0x2e1   : > { %1141 = vst.msk [vmem:[#allocation4 + $0x28] sm:$0xff] %vm1135_vm3, %v1112_v46  ;;  %v1314_v51 = vadd.f32 %v6580_v49, %v1304_v50  ;;  %v1254_v52 = vpop.f32.mrb[5].mxu1 }
 0x2e2   : > { %1140 = vst.msk [vmem:[#allocation4 + $0x20] sm:$0xff] %vm1135_vm3, %v1107_v48  ;;  %v1313_v54 = vadd.f32 %v1303_v53, %v1254_v52  ;;  %v6597_v55 = vpop.f32.mrb[6].mxu0  ;;  %v1310_v15 = vld [vmem:[#allocation4 + $0x38] sm:$0xff] }
 0x2e3   : > { %1324 = vst.msk [vmem:[#allocation4 + $0x8] sm:$0xff] %vm1135_vm3, %v1314_v51  ;;  %v1441_v56 = vpop.f32.mrb[7].mxu0  ;;  %v1309_v18 = vld [vmem:[#allocation4 + $0x30] sm:$0xff] }
 0x2e4   : > { %1323 = vst.msk [vmem:[#allocation4] sm:$0xff] %vm1135_vm3, %v1313_v54  ;;  %v6583_v57 = vpop.f32.mrb[6].mxu1  ;;  %v1306_v58 = vld [vmem:[#allocation4 + $0x18] sm:$0xff] }
 0x2e5   : > { %v1316_v59 = vadd.f32 %v6583_v57, %v1306_v58  ;;  %v1264_v60 = vpop.f32.mrb[7].mxu1  ;;  %v1305_v61 = vld [vmem:[#allocation4 + $0x10] sm:$0xff] }
 0x2e6   : > { %v1315_v62 = vadd.f32 %v1305_v61, %v1264_v60  ;;  %v6600_v63 = vpop.f32.mrb[8].mxu0  ;;  %v1312_v28 = vld [vmem:[#allocation4 + $0x48] sm:$0xff] }
 0x2e7   : > { %1326 = vst.msk [vmem:[#allocation4 + $0x18] sm:$0xff] %vm1135_vm3, %v1316_v59  ;;  %v1451_v1 = vpop.f32.mrb[9].mxu0  ;;  %v1311_v31 = vld [vmem:[#allocation4 + $0x40] sm:$0xff] }
 0x2e8   : > { %1325 = vst.msk [vmem:[#allocation4 + $0x10] sm:$0xff] %vm1135_vm3, %v1315_v62  ;;  %v6586_v2 = vpop.f32.mrb[8].mxu1  ;;  %v1308_v3 = vld [vmem:[#allocation4 + $0x28] sm:$0xff] }
 0x2e9   : > { %v1318_v4 = vadd.f32 %v6586_v2, %v1308_v3  ;;  %v1274_v5 = vpop.f32.mrb[9].mxu1  ;;  %v1307_v6 = vld [vmem:[#allocation4 + $0x20] sm:$0xff] }
 0x2ea   : > { %v1317_v7 = vadd.f32 %v1307_v6, %v1274_v5  ;;  %v1491_v8 = vld [vmem:[#allocation4 + $0x8] sm:$0xff]  ;;  %v6603_v9 = vpop.f32.mrb[10].mxu0 }
 0x2eb   : > { %1328 = vst.msk [vmem:[#allocation4 + $0x28] sm:$0xff] %vm1135_vm3, %v1318_v4  ;;  %v1501_v10 = vadd.f32 %v6597_v55, %v1491_v8  ;;  %v1490_v11 = vld [vmem:[#allocation4] sm:$0xff]  ;;  %v1461_v12 = vpop.f32.mrb[11].mxu0 }
 0x2ec   : > { %1327 = vst.msk [vmem:[#allocation4 + $0x20] sm:$0xff] %vm1135_vm3, %v1317_v7  ;;  %v1500_v13 = vadd.f32 %v1490_v11, %v1441_v56  ;;  %v6589_v14 = vpop.f32.mrb[10].mxu1 }
 0x2ed   : > { %1511 = vst.msk [vmem:[#allocation4 + $0x8] sm:$0xff] %vm1135_vm3, %v1501_v10  ;;  %v1320_v16 = vadd.f32 %v6589_v14, %v1310_v15  ;;  %v1284_v17 = vpop.f32.mrb[11].mxu1 }
 0x2ee   : > { %1510 = vst.msk [vmem:[#allocation4] sm:$0xff] %vm1135_vm3, %v1500_v13  ;;  %v1319_v19 = vadd.f32 %v1309_v18, %v1284_v17  ;;  %v1493_v20 = vld [vmem:[#allocation4 + $0x18] sm:$0xff]  ;;  %v6606_v21 = vpop.f32.mrb[12].mxu0 }
 0x2ef   : > { %1330 = vst.msk [vmem:[#allocation4 + $0x38] sm:$0xff] %vm1135_vm3, %v1320_v16  ;;  %v1503_v22 = vadd.f32 %v6600_v63, %v1493_v20  ;;  %v1492_v23 = vld [vmem:[#allocation4 + $0x10] sm:$0xff]  ;;  %v1471_v24 = vpop.f32.mrb[13].mxu0 }
 0x2f0   : > { %1329 = vst.msk [vmem:[#allocation4 + $0x30] sm:$0xff] %vm1135_vm3, %v1319_v19  ;;  %v1502_v25 = vadd.f32 %v1492_v23, %v1451_v1  ;;  %v6592_v26 = vpop.f32.mrb[12].mxu1 }
 0x2f1   : > { %1513 = vst.msk [vmem:[#allocation4 + $0x18] sm:$0xff] %vm1135_vm3, %v1503_v22  ;;  %v1322_v29 = vadd.f32 %v6592_v26, %v1312_v28  ;;  %v1294_v30 = vpop.f32.mrb[13].mxu1 }
 0x2f2   : > { %1512 = vst.msk [vmem:[#allocation4 + $0x10] sm:$0xff] %vm1135_vm3, %v1502_v25  ;;  %v1321_v32 = vadd.f32 %v1311_v31, %v1294_v30  ;;  %v1495_v33 = vld [vmem:[#allocation4 + $0x28] sm:$0xff]  ;;  %v6609_v34 = vpop.f32.mrb[14].mxu0 }
 0x2f3   : > { %1332 = vst.msk [vmem:[#allocation4 + $0x48] sm:$0xff] %vm1135_vm3, %v1322_v29  ;;  %v1505_v35 = vadd.f32 %v6603_v9, %v1495_v33  ;;  %v1494_v36 = vld [vmem:[#allocation4 + $0x20] sm:$0xff]  ;;  %v1481_v37 = vpop.f32.mrb[15].mxu0 }
 0x2f4   : > { %1331 = vst.msk [vmem:[#allocation4 + $0x40] sm:$0xff] %vm1135_vm3, %v1321_v32  ;;  %v1504_v38 = vadd.f32 %v1494_v36, %v1461_v12  ;;  %v6614_v39 = vpop.f32.mrb[14].mxu1  ;;  %v1678_v40 = vld [vmem:[#allocation4 + $0x8] sm:$0xff] }
 0x2f5   : > { %1515 = vst.msk [vmem:[#allocation4 + $0x28] sm:$0xff] %vm1135_vm3, %v1505_v35  ;;  %v1688_v41 = vadd.f32 %v6614_v39, %v1678_v40  ;;  %v1628_v42 = vpop.f32.mrb[15].mxu1  ;;  %v1677_v43 = vld [vmem:[#allocation4] sm:$0xff] }
 0x2f6   : > { %1514 = vst.msk [vmem:[#allocation4 + $0x20] sm:$0xff] %vm1135_vm3, %v1504_v38  ;;  %v1687_v44 = vadd.f32 %v1677_v43, %v1628_v42  ;;  %v1497_v45 = vld [vmem:[#allocation4 + $0x38] sm:$0xff]  ;;  %v6631_v46 = vpop.f32.mrb[16].mxu0 }
 0x2f7   : > { %1698 = vst.msk [vmem:[#allocation4 + $0x8] sm:$0xff] %vm1135_vm3, %v1688_v41  ;;  %v1507_v47 = vadd.f32 %v6606_v21, %v1497_v45  ;;  %v1496_v48 = vld [vmem:[#allocation4 + $0x30] sm:$0xff]  ;;  %v1815_v49 = vpop.f32.mrb[17].mxu0 }
 0x2f8   : > { %1697 = vst.msk [vmem:[#allocation4] sm:$0xff] %vm1135_vm3, %v1687_v44  ;;  %v1506_v50 = vadd.f32 %v1496_v48, %v1471_v24  ;;  %v6617_v51 = vpop.f32.mrb[16].mxu1  ;;  %v1680_v52 = vld [vmem:[#allocation4 + $0x18] sm:$0xff] }
 0x2f9   : > { %1517 = vst.msk [vmem:[#allocation4 + $0x38] sm:$0xff] %vm1135_vm3, %v1507_v47  ;;  %v1690_v53 = vadd.f32 %v6617_v51, %v1680_v52  ;;  %v1638_v54 = vpop.f32.mrb[17].mxu1  ;;  %v1679_v55 = vld [vmem:[#allocation4 + $0x10] sm:$0xff] }
 0x2fa   : > { %1516 = vst.msk [vmem:[#allocation4 + $0x30] sm:$0xff] %vm1135_vm3, %v1506_v50  ;;  %v1689_v56 = vadd.f32 %v1679_v55, %v1638_v54  ;;  %v1499_v57 = vld [vmem:[#allocation4 + $0x48] sm:$0xff]  ;;  %v6634_v58 = vpop.f32.mrb[18].mxu0 }
 0x2fb   : > { %1700 = vst.msk [vmem:[#allocation4 + $0x18] sm:$0xff] %vm1135_vm3, %v1690_v53  ;;  %v1509_v59 = vadd.f32 %v6609_v34, %v1499_v57  ;;  %v1498_v60 = vld [vmem:[#allocation4 + $0x40] sm:$0xff]  ;;  %v1825_v61 = vpop.f32.mrb[19].mxu0 }
 0x2fc   : > { %1699 = vst.msk [vmem:[#allocation4 + $0x10] sm:$0xff] %vm1135_vm3, %v1689_v56  ;;  %v1508_v62 = vadd.f32 %v1498_v60, %v1481_v37  ;;  %v6620_v63 = vpop.f32.mrb[18].mxu1  ;;  %v1682_v1 = vld [vmem:[#allocation4 + $0x28] sm:$0xff] }
 0x2fd   : > { %1519 = vst.msk [vmem:[#allocation4 + $0x48] sm:$0xff] %vm1135_vm3, %v1509_v59  ;;  %v1692_v2 = vadd.f32 %v6620_v63, %v1682_v1  ;;  %v1648_v3 = vpop.f32.mrb[19].mxu1  ;;  %v1681_v4 = vld [vmem:[#allocation4 + $0x20] sm:$0xff] }
 0x2fe   : > { %1518 = vst.msk [vmem:[#allocation4 + $0x40] sm:$0xff] %vm1135_vm3, %v1508_v62  ;;  %v1691_v5 = vadd.f32 %v1681_v4, %v1648_v3  ;;  %v1865_v6 = vld [vmem:[#allocation4 + $0x8] sm:$0xff]  ;;  %v6637_v7 = vpop.f32.mrb[20].mxu0 }
 0x2ff   : > { %1702 = vst.msk [vmem:[#allocation4 + $0x28] sm:$0xff] %vm1135_vm3, %v1692_v2  ;;  %v1875_v8 = vadd.f32 %v6631_v46, %v1865_v6  ;;  %v1864_v9 = vld [vmem:[#allocation4] sm:$0xff]  ;;  %v1835_v10 = vpop.f32.mrb[21].mxu0 }
 0x300   : > { %1701 = vst.msk [vmem:[#allocation4 + $0x20] sm:$0xff] %vm1135_vm3, %v1691_v5  ;;  %v1874_v11 = vadd.f32 %v1864_v9, %v1815_v49  ;;  %v6623_v12 = vpop.f32.mrb[20].mxu1  ;;  %v1684_v13 = vld [vmem:[#allocation4 + $0x38] sm:$0xff] }
 0x301   : > { %1885 = vst.msk [vmem:[#allocation4 + $0x8] sm:$0xff] %vm1135_vm3, %v1875_v8  ;;  %v1694_v14 = vadd.f32 %v6623_v12, %v1684_v13  ;;  %v1658_v15 = vpop.f32.mrb[21].mxu1  ;;  %v1683_v16 = vld [vmem:[#allocation4 + $0x30] sm:$0xff] }
 0x302   : > { %1884 = vst.msk [vmem:[#allocation4] sm:$0xff] %vm1135_vm3, %v1874_v11  ;;  %v1693_v17 = vadd.f32 %v1683_v16, %v1658_v15  ;;  %v1867_v18 = vld [vmem:[#allocation4 + $0x18] sm:$0xff]  ;;  %v6640_v19 = vpop.f32.mrb[22].mxu0 }
 0x303   : > { %1704 = vst.msk [vmem:[#allocation4 + $0x38] sm:$0xff] %vm1135_vm3, %v1694_v14  ;;  %v1877_v20 = vadd.f32 %v6634_v58, %v1867_v18  ;;  %v1866_v21 = vld [vmem:[#allocation4 + $0x10] sm:$0xff]  ;;  %v1845_v22 = vpop.f32.mrb[23].mxu0 }
 0x304   : > { %1703 = vst.msk [vmem:[#allocation4 + $0x30] sm:$0xff] %vm1135_vm3, %v1693_v17  ;;  %v1876_v23 = vadd.f32 %v1866_v21, %v1825_v61  ;;  %v6626_v24 = vpop.f32.mrb[22].mxu1  ;;  %v1686_v25 = vld [vmem:[#allocation4 + $0x48] sm:$0xff] }
 0x305   : > { %1887 = vst.msk [vmem:[#allocation4 + $0x18] sm:$0xff] %vm1135_vm3, %v1877_v20  ;;  %v1696_v26 = vadd.f32 %v6626_v24, %v1686_v25  ;;  %v1668_v28 = vpop.f32.mrb[23].mxu1  ;;  %v1685_v29 = vld [vmem:[#allocation4 + $0x40] sm:$0xff] }
 0x306   : > { %1886 = vst.msk [vmem:[#allocation4 + $0x10] sm:$0xff] %vm1135_vm3, %v1876_v23  ;;  %v1695_v30 = vadd.f32 %v1685_v29, %v1668_v28  ;;  %v1869_v31 = vld [vmem:[#allocation4 + $0x28] sm:$0xff]  ;;  %v6643_v32 = vpop.f32.mrb[24].mxu0 }
 0x307   : > { %1706 = vst.msk [vmem:[#allocation4 + $0x48] sm:$0xff] %vm1135_vm3, %v1696_v26  ;;  %v1879_v33 = vadd.f32 %v6637_v7, %v1869_v31  ;;  %v1868_v34 = vld [vmem:[#allocation4 + $0x20] sm:$0xff]  ;;  %v1855_v35 = vpop.f32.mrb[25].mxu0 }
 0x308   : > { %1705 = vst.msk [vmem:[#allocation4 + $0x40] sm:$0xff] %vm1135_vm3, %v1695_v30  ;;  %v1878_v36 = vadd.f32 %v1868_v34, %v1835_v10  ;;  %v6648_v37 = vpop.f32.mrb[24].mxu1  ;;  %v2052_v38 = vld [vmem:[#allocation4 + $0x8] sm:$0xff] }
 0x309   : > { %1889 = vst.msk [vmem:[#allocation4 + $0x28] sm:$0xff] %vm1135_vm3, %v1879_v33  ;;  %v2062_v39 = vadd.f32 %v6648_v37, %v2052_v38  ;;  %v2002_v40 = vpop.f32.mrb[25].mxu1  ;;  %v2051_v41 = vld [vmem:[#allocation4] sm:$0xff]  ;;  %v734_v37 = vlaneseq }
 0x30a   : > { %1888 = vst.msk [vmem:[#allocation4 + $0x20] sm:$0xff] %vm1135_vm3, %v1878_v36  ;;  %v2061_v42 = vadd.f32 %v2051_v41, %v2002_v40  ;;  %v1871_v43 = vld [vmem:[#allocation4 + $0x38] sm:$0xff]  ;;  %v6665_v44 = vpop.f32.mrb[26].mxu0 }
 0x30b   : > { %2072 = vst.msk [vmem:[#allocation4 + $0x8] sm:$0xff] %vm1135_vm3, %v2062_v39  ;;  %v1881_v45 = vadd.f32 %v6640_v19, %v1871_v43  ;;  %v1870_v46 = vld [vmem:[#allocation4 + $0x30] sm:$0xff]  ;;  %v2189_v47 = vpop.f32.mrb[27].mxu0 }
 0x30c   : > { %2071 = vst.msk [vmem:[#allocation4] sm:$0xff] %vm1135_vm3, %v2061_v42  ;;  %v1880_v48 = vadd.f32 %v1870_v46, %v1845_v22  ;;  %v6651_v49 = vpop.f32.mrb[26].mxu1  ;;  %v2054_v50 = vld [vmem:[#allocation4 + $0x18] sm:$0xff] }
 0x30d   : > { %1891 = vst.msk [vmem:[#allocation4 + $0x38] sm:$0xff] %vm1135_vm3, %v1881_v45  ;;  %v2064_v51 = vadd.f32 %v6651_v49, %v2054_v50  ;;  %v2012_v52 = vpop.f32.mrb[27].mxu1  ;;  %v2053_v53 = vld [vmem:[#allocation4 + $0x10] sm:$0xff]  ;;  %v8765_v50 = vand.u32 127, %v734_v37 }
 0x30e   : > { %1890 = vst.msk [vmem:[#allocation4 + $0x30] sm:$0xff] %vm1135_vm3, %v1880_v48  ;;  %v2063_v54 = vadd.f32 %v2053_v53, %v2012_v52  ;;  %v1873_v55 = vld [vmem:[#allocation4 + $0x48] sm:$0xff]  ;;  %v6668_v56 = vpop.f32.mrb[28].mxu0 }
 0x30f   : > { %2074 = vst.msk [vmem:[#allocation4 + $0x18] sm:$0xff] %vm1135_vm3, %v2064_v51  ;;  %v1883_v57 = vadd.f32 %v6643_v32, %v1873_v55  ;;  %v1872_v58 = vld [vmem:[#allocation4 + $0x40] sm:$0xff]  ;;  %v2199_v59 = vpop.f32.mrb[29].mxu0 }
 0x310   : > { %2073 = vst.msk [vmem:[#allocation4 + $0x10] sm:$0xff] %vm1135_vm3, %v2063_v54  ;;  %v1882_v60 = vadd.f32 %v1872_v58, %v1855_v35  ;;  %v6654_v61 = vpop.f32.mrb[28].mxu1  ;;  %v2056_v62 = vld [vmem:[#allocation4 + $0x28] sm:$0xff] }
 0x311   : > { %1893 = vst.msk [vmem:[#allocation4 + $0x48] sm:$0xff] %vm1135_vm3, %v1883_v57  ;;  %v2066_v63 = vadd.f32 %v6654_v61, %v2056_v62  ;;  %v2022_v1 = vpop.f32.mrb[29].mxu1  ;;  %v2055_v2 = vld [vmem:[#allocation4 + $0x20] sm:$0xff] }
 0x312   : > { %1892 = vst.msk [vmem:[#allocation4 + $0x40] sm:$0xff] %vm1135_vm3, %v1882_v60  ;;  %v2065_v3 = vadd.f32 %v2055_v2, %v2022_v1  ;;  %v2239_v4 = vld [vmem:[#allocation4 + $0x8] sm:$0xff]  ;;  %v6671_v5 = vpop.f32.mrb[30].mxu0 }
 0x313   : > { %2076 = vst.msk [vmem:[#allocation4 + $0x28] sm:$0xff] %vm1135_vm3, %v2066_v63  ;;  %v2249_v6 = vadd.f32 %v6665_v44, %v2239_v4  ;;  %v2238_v7 = vld [vmem:[#allocation4] sm:$0xff]  ;;  %v2209_v8 = vpop.f32.mrb[31].mxu0  ;;  %v8772_v63 = vmul.u32.u64.low 3435973837, %v8765_v50  ;;  %v8773_v1 = vmul.u32.u64.high 3435973837, %v8765_v50, %v8772_v63 }
 0x314   : > { %2075 = vst.msk [vmem:[#allocation4 + $0x20] sm:$0xff] %vm1135_vm3, %v2065_v3  ;;  %v2248_v9 = vadd.f32 %v2238_v7, %v2189_v47  ;;  %v6657_v10 = vpop.f32.mrb[30].mxu1  ;;  %v2058_v11 = vld [vmem:[#allocation4 + $0x38] sm:$0xff] }
 0x315   : > { %2259 = vst.msk [vmem:[#allocation4 + $0x8] sm:$0xff] %vm1135_vm3, %v2249_v6  ;;  %v2068_v12 = vadd.f32 %v6657_v10, %v2058_v11  ;;  %v2032_v13 = vpop.f32.mrb[31].mxu1  ;;  %v2057_v14 = vld [vmem:[#allocation4 + $0x30] sm:$0xff] }
 0x316   : > { %2258 = vst.msk [vmem:[#allocation4] sm:$0xff] %vm1135_vm3, %v2248_v9  ;;  %v2067_v15 = vadd.f32 %v2057_v14, %v2032_v13  ;;  %v2241_v16 = vld [vmem:[#allocation4 + $0x18] sm:$0xff]  ;;  %v6674_v17 = vpop.f32.mrb[32].mxu0 }
 0x317   : > { %2078 = vst.msk [vmem:[#allocation4 + $0x38] sm:$0xff] %vm1135_vm3, %v2068_v12  ;;  %v2251_v18 = vadd.f32 %v6668_v56, %v2241_v16  ;;  %v2240_v19 = vld [vmem:[#allocation4 + $0x10] sm:$0xff]  ;;  %v2219_v20 = vpop.f32.mrb[33].mxu0 }
 0x318   : > { %2077 = vst.msk [vmem:[#allocation4 + $0x30] sm:$0xff] %vm1135_vm3, %v2067_v15  ;;  %v2250_v21 = vadd.f32 %v2240_v19, %v2199_v59  ;;  %v6660_v22 = vpop.f32.mrb[32].mxu1  ;;  %v2060_v23 = vld [vmem:[#allocation4 + $0x48] sm:$0xff] }
 0x319   : > { %2261 = vst.msk [vmem:[#allocation4 + $0x18] sm:$0xff] %vm1135_vm3, %v2251_v18  ;;  %v2070_v24 = vadd.f32 %v6660_v22, %v2060_v23  ;;  %v2042_v25 = vpop.f32.mrb[33].mxu1  ;;  %v2059_v26 = vld [vmem:[#allocation4 + $0x40] sm:$0xff] }
 0x31a   : > { %2260 = vst.msk [vmem:[#allocation4 + $0x10] sm:$0xff] %vm1135_vm3, %v2250_v21  ;;  %v2069_v28 = vadd.f32 %v2059_v26, %v2042_v25  ;;  %v2243_v29 = vld [vmem:[#allocation4 + $0x28] sm:$0xff]  ;;  %v6677_v30 = vpop.f32.mrb[34].mxu0  ;;  %v742_v26 = vshrl.u32 %v8773_v1, 3 }
 0x31b   : > { %2080 = vst.msk [vmem:[#allocation4 + $0x48] sm:$0xff] %vm1135_vm3, %v2070_v24  ;;  %v2253_v31 = vadd.f32 %v6671_v5, %v2243_v29  ;;  %v2242_v32 = vld [vmem:[#allocation4 + $0x20] sm:$0xff]  ;;  %v2229_v33 = vpop.f32.mrb[35].mxu0 }
 0x31c   : > { %2079 = vst.msk [vmem:[#allocation4 + $0x40] sm:$0xff] %vm1135_vm3, %v2069_v28  ;;  %v2252_v34 = vadd.f32 %v2242_v32, %v2209_v8  ;;  %v6682_v35 = vpop.f32.mrb[34].mxu1  ;;  %v2426_v36 = vld [vmem:[#allocation4 + $0x8] sm:$0xff] }
 0x31d   : > { %2263 = vst.msk [vmem:[#allocation4 + $0x28] sm:$0xff] %vm1135_vm3, %v2253_v31  ;;  %v2436_v38 = vadd.f32 %v6682_v35, %v2426_v36  ;;  %v2376_v39 = vpop.f32.mrb[35].mxu1  ;;  %v2425_v40 = vld [vmem:[#allocation4] sm:$0xff] }
 0x31e   : > { %2262 = vst.msk [vmem:[#allocation4 + $0x20] sm:$0xff] %vm1135_vm3, %v2252_v34  ;;  %v2435_v41 = vadd.f32 %v2425_v40, %v2376_v39  ;;  %v2245_v42 = vld [vmem:[#allocation4 + $0x38] sm:$0xff]  ;;  %v6699_v43 = vpop.f32.mrb[36].mxu0  ;;  %v743_v40 = vmul.u32 10, %v742_v26 }
 0x31f   : > { %2446 = vst.msk [vmem:[#allocation4 + $0x8] sm:$0xff] %vm1135_vm3, %v2436_v38  ;;  %v2255_v44 = vadd.f32 %v6674_v17, %v2245_v42  ;;  %v2244_v45 = vld [vmem:[#allocation4 + $0x30] sm:$0xff]  ;;  %v2563_v46 = vpop.f32.mrb[37].mxu0 }
 0x320   : > { %2445 = vst.msk [vmem:[#allocation4] sm:$0xff] %vm1135_vm3, %v2435_v41  ;;  %v2254_v47 = vadd.f32 %v2244_v45, %v2219_v20  ;;  %v6685_v48 = vpop.f32.mrb[36].mxu1  ;;  %v2428_v49 = vld [vmem:[#allocation4 + $0x18] sm:$0xff] }
 0x321   : > { %2265 = vst.msk [vmem:[#allocation4 + $0x38] sm:$0xff] %vm1135_vm3, %v2255_v44  ;;  %v2438_v51 = vadd.f32 %v6685_v48, %v2428_v49  ;;  %v2386_v52 = vpop.f32.mrb[37].mxu1  ;;  %v2427_v53 = vld [vmem:[#allocation4 + $0x10] sm:$0xff] }
 0x322   : > { %2264 = vst.msk [vmem:[#allocation4 + $0x30] sm:$0xff] %vm1135_vm3, %v2254_v47  ;;  %v2437_v54 = vadd.f32 %v2427_v53, %v2386_v52  ;;  %v2247_v55 = vld [vmem:[#allocation4 + $0x48] sm:$0xff]  ;;  %v6702_v56 = vpop.f32.mrb[38].mxu0  ;;  %v744_v52 = vsub.s32 %v8765_v50, %v743_v40 }
 0x323   : > { %2448 = vst.msk [vmem:[#allocation4 + $0x18] sm:$0xff] %vm1135_vm3, %v2438_v51  ;;  %v2257_v57 = vadd.f32 %v6677_v30, %v2247_v55  ;;  %v2246_v58 = vld [vmem:[#allocation4 + $0x40] sm:$0xff]  ;;  %v2573_v59 = vpop.f32.mrb[39].mxu0 }
 0x324   : > { %2447 = vst.msk [vmem:[#allocation4 + $0x10] sm:$0xff] %vm1135_vm3, %v2437_v54  ;;  %v2256_v60 = vadd.f32 %v2246_v58, %v2229_v33  ;;  %v6688_v61 = vpop.f32.mrb[38].mxu1  ;;  %v2430_v62 = vld [vmem:[#allocation4 + $0x28] sm:$0xff]  ;;  %vm747_vm5 = vcmp.ne.s32.totalorder %v744_v52, 0  ;;  %vm748_vm6 = vcmp.lt.s32.totalorder %v744_v52, 0 }
 0x325   : > { %2267 = vst.msk [vmem:[#allocation4 + $0x48] sm:$0xff] %vm1135_vm3, %v2257_v57  ;;  %v2440_v2 = vadd.f32 %v6688_v61, %v2430_v62  ;;  %v2396_v3 = vpop.f32.mrb[39].mxu1  ;;  %v2429_v4 = vld [vmem:[#allocation4 + $0x20] sm:$0xff]  ;;  %vm8829_vm7 = vmand %vm748_vm6, %vm747_vm5 }
 0x326   : > { %2266 = vst.msk [vmem:[#allocation4 + $0x40] sm:$0xff] %vm1135_vm3, %v2256_v60  ;;  %v2439_v5 = vadd.f32 %v2429_v4, %v2396_v3  ;;  %v2613_v6 = vld [vmem:[#allocation4 + $0x8] sm:$0xff]  ;;  %v6705_v7 = vpop.f32.mrb[40].mxu0  ;;  %v750_v3 = vadd.s32 10, %v744_v52 }
 0x327   : > { %2450 = vst.msk [vmem:[#allocation4 + $0x28] sm:$0xff] %vm1135_vm3, %v2440_v2  ;;  %v2623_v8 = vadd.f32 %v6699_v43, %v2613_v6  ;;  %v2612_v9 = vld [vmem:[#allocation4] sm:$0xff]  ;;  %v2583_v10 = vpop.f32.mrb[41].mxu0 }
 0x328   : > { %2449 = vst.msk [vmem:[#allocation4 + $0x20] sm:$0xff] %vm1135_vm3, %v2439_v5  ;;  %v2622_v11 = vadd.f32 %v2612_v9, %v2563_v46  ;;  %v6691_v12 = vpop.f32.mrb[40].mxu1  ;;  %v2432_v13 = vld [vmem:[#allocation4 + $0x38] sm:$0xff] }
 0x329   : > { %2633 = vst.msk [vmem:[#allocation4 + $0x8] sm:$0xff] %vm1135_vm3, %v2623_v8  ;;  %v2442_v14 = vadd.f32 %v6691_v12, %v2432_v13  ;;  %v2406_v15 = vpop.f32.mrb[41].mxu1  ;;  %v2431_v16 = vld [vmem:[#allocation4 + $0x30] sm:$0xff] }
 0x32a   : > { %2632 = vst.msk [vmem:[#allocation4] sm:$0xff] %vm1135_vm3, %v2622_v11  ;;  %v2441_v17 = vadd.f32 %v2431_v16, %v2406_v15  ;;  %v2615_v18 = vld [vmem:[#allocation4 + $0x18] sm:$0xff]  ;;  %v6708_v19 = vpop.f32.mrb[42].mxu0  ;;  %v751_v11 = vsel %vm8829_vm7, %v750_v3, %v744_v52 }
 0x32b   : > { %2452 = vst.msk [vmem:[#allocation4 + $0x38] sm:$0xff] %vm1135_vm3, %v2442_v14  ;;  %v2625_v20 = vadd.f32 %v6702_v56, %v2615_v18  ;;  %v2614_v21 = vld [vmem:[#allocation4 + $0x10] sm:$0xff]  ;;  %v2593_v22 = vpop.f32.mrb[43].mxu0  ;;  %vm752_vm8 = vcmp.lt.s32.totalorder %v751_v11, 8  ;;  %v936_v16 = vld [vmem:[#allocation23] sm:$0xff] }
 0x32c   : > { %2451 = vst.msk [vmem:[#allocation4 + $0x30] sm:$0xff] %vm1135_vm3, %v2441_v17  ;;  %v2624_v23 = vadd.f32 %v2614_v21, %v2573_v59  ;;  %v6694_v24 = vpop.f32.mrb[42].mxu1  ;;  %v2434_v25 = vld [vmem:[#allocation4 + $0x48] sm:$0xff]  ;;  %v937_v17 = vld [vmem:[#allocation23 + $0x8] sm:$0xff]  ;;  %v8860_v21 = vsel %vm752_vm8, 1.0, %v7980_v0 }
 0x32d   : > { %2635 = vst.msk [vmem:[#allocation4 + $0x18] sm:$0xff] %vm1135_vm3, %v2625_v20  ;;  %v2444_v28 = vadd.f32 %v6694_v24, %v2434_v25  ;;  %v2416_v29 = vpop.f32.mrb[43].mxu1  ;;  %v2433_v30 = vld [vmem:[#allocation4 + $0x40] sm:$0xff]  ;;  %v3151_v11 = vld [vmem:[%s639_s12] sm:$0x1] }
 0x32e   : > { %2634 = vst.msk [vmem:[#allocation4 + $0x10] sm:$0xff] %vm1135_vm3, %v2624_v23  ;;  %v2443_v31 = vadd.f32 %v2433_v30, %v2416_v29  ;;  %v2617_v32 = vld [vmem:[#allocation4 + $0x28] sm:$0xff]  ;;  %v6711_v33 = vpop.f32.mrb[44].mxu0  ;;  %v3477_v52 = vld [vmem:[#allocation3 + $0x2] sm:$0xff] }
 0x32f   : > { %2454 = vst.msk [vmem:[#allocation4 + $0x48] sm:$0xff] %vm1135_vm3, %v2444_v28  ;;  %v2627_v34 = vadd.f32 %v6705_v7, %v2617_v32  ;;  %v2616_v35 = vld [vmem:[#allocation4 + $0x20] sm:$0xff]  ;;  %v2603_v36 = vpop.f32.mrb[45].mxu0  ;;  %v938_v28 = vld [vmem:[#allocation25] sm:$0xff] }
 0x330   : > { %2453 = vst.msk [vmem:[#allocation4 + $0x40] sm:$0xff] %vm1135_vm3, %v2443_v31  ;;  %v2626_v38 = vadd.f32 %v2616_v35, %v2583_v10  ;;  %v8788_v39 = vld [vmem:[#allocation4 + $0x8] sm:$0xff] }
 0x331   : > { %2637 = vst.msk [vmem:[#allocation4 + $0x28] sm:$0xff] %vm1135_vm3, %v2627_v34  ;;  %v8791_v41 = vld [vmem:[#allocation4] sm:$0xff]  ;;  %v2727_v42 = vmul.f32 %v8788_v39, %v8788_v39 }
 0x332   : > { %2636 = vst.msk [vmem:[#allocation4 + $0x20] sm:$0xff] %vm1135_vm3, %v2626_v38  ;;  %v2619_v43 = vld [vmem:[#allocation4 + $0x38] sm:$0xff]  ;;  %v7041_v44 = vpack.c.bf16 %v8788_v39, %v8791_v41  ;;  %v2726_v45 = vmul.f32 %v8791_v41, %v8791_v41 }
 0x333   : > { %v2629_v46 = vadd.f32 %v6708_v19, %v2619_v43  ;;  %v2618_v47 = vld [vmem:[#allocation4 + $0x30] sm:$0xff]  ;;  %v3314_v43 = vld [vmem:[#allocation17] sm:$0xff] }
 0x334   : > { %v2628_v48 = vadd.f32 %v2618_v47, %v2593_v22  ;;  %7042 = vmatpush3.bf16.msra.mxu1 %v7041_v44  ;;  %v7056_v49 = vpack.c.bf16 %v2727_v42, %v2726_v45  ;;  %v8800_v51 = vld [vmem:[#allocation4 + $0x18] sm:$0xff]  ;;  %v8862_v22 = vpack.c.bf16 %v937_v17, %v936_v16  ;;  %v3315_v44 = vld [vmem:[#allocation17 + $0x8] sm:$0xff]  ;;  %v3152_v17 = vadd.f32 1.0, %v3151_v11 }
 0x335   : > { %2639 = vst.msk [vmem:[#allocation4 + $0x38] sm:$0xff] %vm1135_vm3, %v2629_v46  ;;  %7043 = vmatprep.subr.bf16.mxu1 %v7981_v27  ;;  %v8805_v53 = vld [vmem:[#allocation4 + $0x10] sm:$0xff]  ;;  %v2729_v54 = vmul.f32 %v8800_v51, %v8800_v51  ;;  %v7076_v46 = vpack.c.bf16 %v3315_v44, %v3314_v43  ;;  %v3489_v47 = vld [vmem:[#allocation17 + $0x18] sm:$0xff] }
 0x336   : > { %2638 = vst.msk [vmem:[#allocation4 + $0x30] sm:$0xff] %vm1135_vm3, %v2628_v48  ;;  %v2621_v55 = vld [vmem:[#allocation4 + $0x48] sm:$0xff]  ;;  %7057 = vmatpush3.bf16.msra.mxu0 %v7056_v49  ;;  %v7044_v56 = vpack.c.bf16 %v8800_v51, %v8805_v53  ;;  %v2728_v57 = vmul.f32 %v8805_v53, %v8805_v53  ;;  %v3488_v45 = vld [vmem:[#allocation17 + $0x10] sm:$0xff] }
 0x337   : > { %v2631_v50 = vadd.f32 %v6711_v33, %v2621_v55  ;;  %v2620_v58 = vld [vmem:[#allocation4 + $0x40] sm:$0xff]  ;;  %7058 = vmatprep.subr.bf16.mxu0 %v7981_v27  ;;  %v7080_v48 = vpack.c.bf16 %v3489_v47, %v3488_v45  ;;  %v3677_v55 = vld [vmem:[#allocation17 + $0x28] sm:$0xff] }
 0x338   : > { %v2630_v59 = vadd.f32 %v2620_v58, %v2603_v36  ;;  %7045 = vmatpush3.bf16.msra.mxu1 %v7044_v56  ;;  %v7059_v60 = vpack.c.bf16 %v2729_v54, %v2728_v57  ;;  %v8815_v61 = vld [vmem:[#allocation4 + $0x28] sm:$0xff]  ;;  %v3304_v49 = vld [vmem:[#allocation3 + $0x1] sm:$0xff] }
 0x339   : > { %2641 = vst.msk [vmem:[#allocation4 + $0x48] sm:$0xff] %vm1135_vm3, %v2631_v50  ;;  %7046 = vmatprep.subr.bf16.mxu1 %v7981_v27  ;;  %v8819_v62 = vld [vmem:[#allocation4 + $0x20] sm:$0xff]  ;;  %v2731_v63 = vmul.f32 %v8815_v61, %v8815_v61  ;;  %v3864_v57 = vld [vmem:[#allocation17 + $0x30] sm:$0xff] }
 0x33a   : > { %2640 = vst.msk [vmem:[#allocation4 + $0x40] sm:$0xff] %vm1135_vm3, %v2630_v59  ;;  %7060 = vmatpush3.bf16.msra.mxu0 %v7059_v60  ;;  %v7047_v1 = vpack.c.bf16 %v8815_v61, %v8819_v62  ;;  %v2730_v2 = vmul.f32 %v8819_v62, %v8819_v62  ;;  %v3676_v54 = vld [vmem:[#allocation17 + $0x20] sm:$0xff]  ;;  %v3865_v50 = vld [vmem:[#allocation17 + $0x38] sm:$0xff]  ;;  %v756_v59 = vshrl.u32 %v734_v37, 7 }
 0x33b   : > { %7061 = vmatprep.subr.bf16.mxu0 %v7981_v27  ;;  %v8890_v56 = vpack.c.bf16 %v3677_v55, %v3676_v54  ;;  %v8893_v58 = vpack.c.bf16 %v3865_v50, %v3864_v57 }
 0x33c   : > { %7048 = vmatpush3.bf16.msra.mxu1 %v7047_v1  ;;  %v7062_v5 = vpack.c.bf16 %v2731_v63, %v2730_v2  ;;  %v8833_v6 = vld [vmem:[#allocation4 + $0x38] sm:$0xff]  ;;  %v8897_v1 = vmul.u32.u64.low 3435973837, %v756_v59  ;;  %v8898_v2 = vmul.u32.u64.high 3435973837, %v756_v59, %v8897_v1  ;;  %v8900_v3 = vadd.s32 8, %v756_v59 }
 0x33d   : > { %7049 = vmatprep.subr.bf16.mxu1 %v7981_v27  ;;  %v8836_v7 = vld [vmem:[#allocation4 + $0x30] sm:$0xff]  ;;  %v2733_v8 = vmul.f32 %v8833_v6, %v8833_v6  ;;  %v8902_v4 = vadd.s32 16, %v756_v59 }
 0x33e   : > { %7063 = vmatpush3.bf16.msra.mxu0 %v7062_v5  ;;  %v7050_v9 = vpack.c.bf16 %v8833_v6, %v8836_v7  ;;  %v2732_v10 = vmul.f32 %v8836_v7, %v8836_v7  ;;  %v8904_v5 = vadd.s32 24, %v756_v59 }
 0x33f   : > { %7064 = vmatprep.subr.bf16.mxu0 %v7981_v27 }
 0x340   : > { %7051 = vmatpush3.bf16.msra.mxu1 %v7050_v9  ;;  %v7065_v12 = vpack.c.bf16 %v2733_v8, %v2732_v10  ;;  %v8847_v13 = vld [vmem:[#allocation4 + $0x48] sm:$0xff]  ;;  %v772_v8 = vshrl.u32 %v8898_v2, 3  ;;  %v8908_v9 = vmul.u32.u64.low 3435973837, %v8900_v3  ;;  %v8909_v10 = vmul.u32.u64.high 3435973837, %v8900_v3, %v8908_v9 }
 0x341   : > { %7052 = vmatprep.subr.bf16.mxu1 %v7981_v27  ;;  %v8850_v14 = vld [vmem:[#allocation4 + $0x40] sm:$0xff]  ;;  %v2735_v15 = vmul.f32 %v8847_v13, %v8847_v13 }
 0x342   : > { %7066 = vmatpush3.bf16.msra.mxu0 %v7065_v12  ;;  %v7053_v18 = vpack.c.bf16 %v8847_v13, %v8850_v14  ;;  %v2734_v19 = vmul.f32 %v8850_v14, %v8850_v14  ;;  %v8914_v37 = vmul.u32.u64.low 3435973837, %v8902_v4  ;;  %v8915_v12 = vmul.u32.u64.high 3435973837, %v8902_v4, %v8914_v37 }
 0x343   : > { %7067 = vmatprep.subr.bf16.mxu0 %v7981_v27 }
 0x344   : > { %7054 = vmatpush3.bf16.msra.mxu1 %v7053_v18  ;;  %v7068_v20 = vpack.c.bf16 %v2735_v15, %v2734_v19  ;;  %v8918_v15 = vmul.u32.u64.low 3435973837, %v8904_v5  ;;  %v8919_v16 = vmul.u32.u64.high 3435973837, %v8904_v5, %v8918_v15  ;;  %v773_v18 = vmul.u32 10, %v772_v8 }
 0x345   : > { %7070 = vmatprep.subr.bf16.mxu1 %v7981_v27  ;;  %v8921_v19 = vsub.s32 0, %v756_v59  ;;  %v794_v44 = vshrl.u32 %v8915_v12, 3 }
 0x346   : > { %7069 = vmatpush3.bf16.msra.mxu0 %v7068_v20  ;;  %v8923_v20 = vadd.s32 32, %v756_v59  ;;  %v805_v45 = vshrl.u32 %v8919_v16, 3 }
 0x347   : > { %6733 = vmatmul.mubr.msk.f32.vlgmr.msra.gmra.mrb[44].mxu1 %vm9771_vm9, %v8860_v21  ;;  %7081 = vmatprep.subr.bf16.mxu0 %v7080_v48 }
 0x348   : > { %7072 = vmatpush3.bf16.msra.mxu1 %v8862_v22  ;;  %6762 = vmatprep.mubr.msk.f32.mxu1 %vm7982_vm4, %v7980_v0 }
 0x349   : > { %6756 = vmatmul.mubr.msk.f32.vlgmr.msra.gmra.mrb[46].mxu0 %vm9771_vm9, %v8860_v21  ;;  %7073 = vmatprep.subr.bf16.mxu1 %v7981_v27 }
 0x34a   : > { %7083 = vmatpush3.bf16.msra.mxu0 %v7080_v48  ;;  %6805 = vmatprep.mubr.msk.f32.mxu0 %vm1135_vm3, %v3477_v52 }
 0x34b   : > { %7089 = vmatprep.subr.bf16.mxu0 %v8893_v58 }
 0x41a   : > { %v2722_v23 = vpop.f32.mrb[44].mxu1 }
 0x41b   : > { %v6734_v24 = vpop.f32.mrb[45].mxu1  ;;  %6763 = vmatmul.mubr.msk.f32.vlgmr.msra.gmra.mrb[46].mxu1 %vm1135_vm3, %v2722_v23  ;;  %v8925_v23 = vadd.s32 40, %v756_v59 }
 0x41c   : > { %7075 = vmatpush3.bf16.msra.mxu1 %v8862_v22  ;;  %v2802_v25 = vpop.f32.mrb[46].mxu0  ;;  %6769 = vmatprep.mubr.msk.f32.mxu1 %vm7982_vm4, %v7980_v0  ;;  %v8927_v24 = vadd.s32 48, %v756_v59 }
 0x41d   : > { %v6757_v26 = vpop.f32.mrb[47].mxu0  ;;  %6772 = vmatprep.subr.mxu1 %v7980_v0 }
 0x41e   : > { %v8932_v26 = vrot.slane %v3152_v17, %v8921_v19 }
 0x41f   : > { %6770 = vmatmul.mubr.msk.f32.vlgmr.msra.gmra.mrb[48].mxu1 %vm1135_vm3, %v2802_v25  ;;  %v8929_v25 = vadd.s32 56, %v756_v59 }
 0x420   : > { %6774 = vmatprep.mubr.msk.f32.mxu1 %vm7982_vm4, %v7980_v0  ;;  %6773 = vmatpush3.msra.mxu1 %v938_v28 }
 0x421   : > { %6777 = vmatprep.subr.mxu1 %v7980_v0 }
 0x4ee   : > { %v2875_v29 = vpop.f32.mrb[46].mxu1 }
 0x4ef   : > { %v2953_v30 = vmul.f32 0.0078125, %v2875_v29  ;;  %v6764_v31 = vpop.f32.mrb[47].mxu1  ;;  %v783_v29 = vshrl.u32 %v8909_v10, 3 }
 0x4f1   : > { %6775 = vmatmul.mubr.msk.f32.vlgmr.msra.gmra.mrb[50].mxu1 %vm9770_vm0, %v2953_v30  ;;  %v2955_v33 = vmul.f32 %v2953_v30, %v2953_v30  ;;  %v8937_v30 = vadd.s32 64, %v756_v59  ;;  %v8966_v52 = vmul.u32 10, %v783_v29 }
 0x4f2   : > { %v2948_v32 = vpop.f32.mrb[48].mxu1  ;;  %6778 = vmatpush3.msra.mxu1 %v938_v28  ;;  %6779 = vmatprep.mubr.msk.f32.mxu1 %vm7982_vm4, %v7980_v0  ;;  %v8934_v28 = vsub.s32 %v756_v59, %v773_v18 }
 0x4f3   : > { %v2954_v34 = vmul.f32 0.0078125, %v2948_v32  ;;  %v6771_v35 = vpop.f32.mrb[49].mxu1  ;;  %7077 = vmatprep.subr.bf16.mxu1 %v7076_v46  ;;  %v971_v32 = vld [vmem:[#allocation11] sm:$0x1]  ;;  %v8969_v54 = vmul.u32.u64.low 3435973837, %v8937_v30  ;;  %v8970_v55 = vmul.u32.u64.high 3435973837, %v8937_v30, %v8969_v54 }
 0x4f4   : > { %v8947_v35 = vadd.s32 72, %v756_v59  ;;  %vm876_vm11 = vcmp.ne.s32.totalorder %v8934_v28, 0  ;;  %vm886_vm12 = vcmp.lt.s32.totalorder %v8934_v28, 0 }
 0x4f5   : > { %v2956_v36 = vsub.f32 %v2954_v34, %v2955_v33  ;;  %v8943_v33 = vmul.u32.u64.low 3435973837, %v8923_v20  ;;  %v8944_v34 = vmul.u32.u64.high 3435973837, %v8923_v20, %v8943_v33  ;;  %vm9063_vm15 = vmand %vm886_vm12, %vm876_vm11 }
 0x4f7   : > { %v2957_v38 = vmax.f32 %v2956_v36, 0.0 }
 0x4f9   : > { %v2958_v40 = vadd.f32 1e-05, %v2957_v38  ;;  %v8950_v36 = vmul.u32.u64.low 3435973837, %v8925_v23  ;;  %v8951_v38 = vmul.u32.u64.high 3435973837, %v8925_v23, %v8950_v36 }
 0x4fb   : > { %7356 = vrsqrt.f32 %v2958_v40 }
 0x505   : > { %v7357_v42 = vpop.eup %7356 }
 0x506   : > { %6780 = vmatmul.mubr.msk.f32.vlgmr.msra.gmra.mrb[52].mxu1 %vm9770_vm0, %v7357_v42  ;;  %v8955_v40 = vmul.u32.u64.low 3435973837, %v8927_v24  ;;  %v8956_v42 = vmul.u32.u64.high 3435973837, %v8927_v24, %v8955_v40 }
 0x507   : > { %7079 = vmatpush3.bf16.msra.mxu1 %v7076_v46  ;;  %6786 = vmatprep.mubr.msk.f32.mxu1 %vm1135_vm3, %v3304_v49  ;;  %v8962_v46 = vmul.u32.u64.low 3435973837, %v8929_v25  ;;  %v8963_v47 = vmul.u32.u64.high 3435973837, %v8929_v25, %v8962_v46 }
 0x508   : > { %7085 = vmatprep.subr.bf16.mxu1 %v8890_v56 }
 0x5c4   : > { %v3029_v60 = vpop.f32.mrb[50].mxu1 }
 0x5c5   : > { %v6776_v63 = vpop.f32.mrb[51].mxu1  ;;  %v8940_v31 = vrot.slane %v3029_v60, %v8921_v19  ;;  %v8978_v59 = vmul.u32.u64.low 3435973837, %v8947_v35  ;;  %v8979_v60 = vmul.u32.u64.high 3435973837, %v8947_v35, %v8978_v59 }
 0x5c7   : > { %v3110_v57 = vsub.f32 %v8791_v41, %v8940_v31  ;;  %v3111_v50 = vsub.f32 %v8788_v39, %v8940_v31  ;;  %v3112_v1 = vsub.f32 %v8805_v53, %v8940_v31  ;;  %v3113_v2 = vsub.f32 %v8800_v51, %v8940_v31  ;;  %v6132_v41 = vld [vmem:[#allocation13] ss:$0 sm:$0xff] }
 0x5c8   : > { %v3114_v8 = vsub.f32 %v8819_v62, %v8940_v31  ;;  %v3115_v39 = vsub.f32 %v8815_v61, %v8940_v31  ;;  %v3116_v9 = vsub.f32 %v8836_v7, %v8940_v31  ;;  %v3117_v10 = vsub.f32 %v8833_v6, %v8940_v31  ;;  %v6133_v7 = vld [vmem:[%s647_s5] ss:$0 sm:$0xff] }
 0x5c9   : > { %v3118_v53 = vsub.f32 %v8850_v14, %v8940_v31 }
 0x5d9   : > { %v3102_v43 = vpop.f32.mrb[52].mxu1 }
 0x5da   : > { %v3120_v48 = vmul.f32 %v3102_v43, %v971_v32  ;;  %v6781_v49 = vpop.f32.mrb[53].mxu1 }
 0x5dc   : > { %v3124_v63 = vrot.slane %v3120_v48, %v8921_v19 }
 0x5de   : > { %v3125_v11 = vmul.f32 %v3124_v63, %v3110_v57  ;;  %v3126_v37 = vmul.f32 %v3124_v63, %v3111_v50  ;;  %v3127_v51 = vmul.f32 %v3124_v63, %v3112_v1  ;;  %v3128_v12 = vmul.f32 %v3124_v63, %v3113_v2 }
 0x5df   : > { %v3129_v15 = vmul.f32 %v3124_v63, %v3114_v8  ;;  %v3130_v62 = vmul.f32 %v3124_v63, %v3115_v39  ;;  %v3131_v17 = vmul.f32 %v3124_v63, %v3116_v9  ;;  %v3132_v18 = vmul.f32 %v3124_v63, %v3117_v10 }
 0x5e0   : > { %v3141_v29 = vadd.f32 %v6132_v41, %v3125_v11  ;;  %v3142_v61 = vadd.f32 %v6132_v41, %v3126_v37  ;;  %v3143_v32 = vadd.f32 %v6132_v41, %v3127_v51  ;;  %v3144_v33 = vadd.f32 %v6132_v41, %v3128_v12 }
 0x5e1   : > { %v3145_v36 = vadd.f32 %v6132_v41, %v3129_v15  ;;  %v3146_v40 = vadd.f32 %v6132_v41, %v3130_v62  ;;  %v3147_v6 = vadd.f32 %v6132_v41, %v3131_v17  ;;  %v3148_v43 = vadd.f32 %v6132_v41, %v3132_v18 }
 0x5e2   : > { %v3159_v14 = vmul.f32 %v8932_v26, %v3141_v29  ;;  %v3160_v46 = vmul.f32 %v8932_v26, %v3142_v61  ;;  %v3161_v48 = vmul.f32 %v8932_v26, %v3143_v32  ;;  %v3162_v49 = vmul.f32 %v8932_v26, %v3144_v33 }
 0x5e3   : > { %v3163_v54 = vmul.f32 %v8932_v26, %v3145_v36  ;;  %v3164_v57 = vmul.f32 %v8932_v26, %v3146_v40  ;;  %v3165_v50 = vmul.f32 %v8932_v26, %v3147_v6  ;;  %v3166_v59 = vmul.f32 %v8932_v26, %v3148_v43 }
 0x5e4   : > { %v9008_v1 = vadd.f32 %v6133_v7, %v3159_v14  ;;  %v9010_v2 = vadd.f32 %v6133_v7, %v3160_v46  ;;  %v9012_v8 = vadd.f32 %v6133_v7, %v3161_v48  ;;  %v9014_v39 = vadd.f32 %v6133_v7, %v3162_v49 }
 0x5e5   : > { %v9016_v9 = vadd.f32 %v6133_v7, %v3163_v54  ;;  %v9018_v10 = vadd.f32 %v6133_v7, %v3164_v57  ;;  %v9020_v11 = vadd.f32 %v6133_v7, %v3165_v50  ;;  %v3119_v37 = vsub.f32 %v8847_v13, %v8940_v31 }
 0x5e6   : > { %v6134_v51 = vmul.f32 -1.442695, %v9008_v1  ;;  %v6135_v12 = vmul.f32 -1.442695, %v9010_v2  ;;  %v6136_v15 = vmul.f32 -1.442695, %v9012_v8  ;;  %v3133_v62 = vmul.f32 %v3124_v63, %v3118_v53 }
 0x5e7   : > { %v6137_v17 = vmul.f32 -1.442695, %v9014_v39  ;;  %v9029_v18 = vadd.f32 %v6133_v7, %v3166_v59  ;;  %v3134_v29 = vmul.f32 %v3124_v63, %v3119_v37  ;;  %v795_v61 = vmul.u32 10, %v794_v44 }
 0x5e8   : > { %7358 = vpow2.f32 %v6134_v51  ;;  %v6138_v32 = vmul.f32 -1.442695, %v9016_v9  ;;  %v3149_v33 = vadd.f32 %v6132_v41, %v3133_v62  ;;  %v806_v13 = vmul.u32 10, %v805_v45 }
 0x5e9   : > { %7360 = vpow2.f32 %v6135_v12  ;;  %v6139_v31 = vmul.f32 -1.442695, %v9018_v10  ;;  %v3150_v36 = vadd.f32 %v6132_v41, %v3134_v29  ;;  %v9037_v53 = vsub.s32 %v8900_v3, %v8966_v52 }
 0x5ea   : > { %7362 = vpow2.f32 %v6136_v15  ;;  %v6140_v40 = vmul.f32 -1.442695, %v9020_v11  ;;  %v3167_v63 = vmul.f32 %v8932_v26, %v3149_v33  ;;  %v816_v44 = vshrl.u32 %v8944_v34, 3 }
 0x5eb   : > { %7364 = vpow2.f32 %v6137_v17  ;;  %v6141_v6 = vmul.f32 -1.442695, %v9029_v18  ;;  %v3168_v16 = vmul.f32 %v8932_v26, %v3150_v36  ;;  %v906_v45 = vadd.s32 10, %v8934_v28 }
 0x5ec   : > { %v9046_v41 = vsub.s32 %v8902_v4, %v795_v61  ;;  %7366 = vpow2.f32 %v6138_v32  ;;  %v9048_v3 = vadd.f32 %v6133_v7, %v3167_v63  ;;  %v9051_v52 = vsub.s32 %v8904_v5, %v806_v13 }
 0x5ed   : > { %v827_v43 = vshrl.u32 %v8951_v38, 3  ;;  %7368 = vpow2.f32 %v6139_v31  ;;  %v9054_v14 = vadd.f32 %v6133_v7, %v3168_v16  ;;  %vm877_vm13 = vcmp.ne.s32.totalorder %v9037_v53, 0 }
 0x5ee   : > { %vm887_vm14 = vcmp.lt.s32.totalorder %v9037_v53, 0  ;;  %7370 = vpow2.f32 %v6140_v40  ;;  %v6142_v26 = vmul.f32 -1.442695, %v9048_v3  ;;  %v817_v5 = vmul.u32 10, %v816_v44 }
 0x5ef   : > { %v838_v34 = vshrl.u32 %v8956_v42, 3  ;;  %7372 = vpow2.f32 %v6141_v6  ;;  %v6143_v38 = vmul.f32 -1.442695, %v9054_v14  ;;  %v9070_v7 = vadd.s32 10, %v9037_v53  ;;  %vm9076_vm5 = vmand %vm887_vm14, %vm877_vm13 }
 0x5f0   : > { %vm878_vm1 = vcmp.ne.s32.totalorder %v9046_v41, 0  ;;  %vm888_vm2 = vcmp.lt.s32.totalorder %v9046_v41, 0  ;;  %7374 = vpow2.f32 %v6142_v26  ;;  %v828_v48 = vmul.u32 10, %v827_v43 }
 0x5f1   : > { %v849_v42 = vshrl.u32 %v8963_v47, 3  ;;  %7376 = vpow2.f32 %v6143_v38  ;;  %v916_v54 = vsel %vm9063_vm15, %v906_v45, %v8934_v28  ;;  %v9085_v57 = vadd.s32 10, %v9046_v41  ;;  %vm9089_vm7 = vmand %vm888_vm2, %vm878_vm1 }
 0x5f2   : > { %v7359_v49 = vpop.eup %7358  ;;  %vm879_vm6 = vcmp.ne.s32.totalorder %v9051_v52, 0  ;;  %v860_v50 = vshrl.u32 %v8970_v55, 3  ;;  %vm889_vm8 = vcmp.lt.s32.totalorder %v9051_v52, 0  ;;  %v9095_v47 = vsub.s32 %v8923_v20, %v817_v5 }
 0x5f3   : > { %v7361_v59 = vpop.eup %7360  ;;  %v3216_v37 = vadd.f32 1.0, %v7359_v49  ;;  %v871_v28 = vshrl.u32 %v8979_v60, 3  ;;  %v917_v15 = vsel %vm9076_vm5, %v9070_v7, %v9037_v53  ;;  %v9103_v62 = vadd.s32 10, %v9051_v52  ;;  %vm9137_vm15 = vmand %vm889_vm8, %vm879_vm6 }
 0x5f4   : > { %v7363_v12 = vpop.eup %7362  ;;  %v3217_v55 = vadd.f32 1.0, %v7361_v59  ;;  %v839_v17 = vmul.u32 10, %v838_v34  ;;  %v9106_v32 = vsub.s32 %v8925_v23, %v828_v48  ;;  %v850_v20 = vmul.u32 10, %v849_v42 }
 0x5f5   : > { %v7365_v29 = vpop.eup %7364  ;;  %7378 = vrcp.f32 %v3216_v37  ;;  %v3218_v61 = vadd.f32 1.0, %v7363_v12  ;;  %v918_v60 = vsel %vm9089_vm7, %v9085_v57, %v9046_v41  ;;  %v861_v31 = vmul.u32 10, %v860_v50 }
 0x5f6   : > { %v7367_v33 = vpop.eup %7366  ;;  %7380 = vrcp.f32 %v3217_v55  ;;  %v3219_v13 = vadd.f32 1.0, %v7365_v29  ;;  %vm9112_vm10 = vcmp.lt.s32.totalorder %v916_v54, 8  ;;  %vm880_vm11 = vcmp.ne.s32.totalorder %v9095_v47, 0 }
 0x5f7   : > { %v7369_v36 = vpop.eup %7368  ;;  %7382 = vrcp.f32 %v3218_v61  ;;  %v3220_v23 = vadd.f32 1.0, %v7367_v33  ;;  %v872_v63 = vmul.u32 10, %v871_v28  ;;  %vm890_vm12 = vcmp.lt.s32.totalorder %v9095_v47, 0 }
 0x5f8   : > { %v7371_v44 = vpop.eup %7370  ;;  %7384 = vrcp.f32 %v3219_v13  ;;  %v3221_v6 = vadd.f32 1.0, %v7369_v36  ;;  %v9119_v16 = vsub.s32 %v8927_v24, %v839_v17  ;;  %v910_v41 = vadd.s32 10, %v9095_v47  ;;  %vm9147_vm7 = vmand %vm890_vm12, %vm880_vm11 }
 0x5f9   : > { %v7373_v45 = vpop.eup %7372  ;;  %7386 = vrcp.f32 %v3220_v23  ;;  %v3222_v43 = vadd.f32 1.0, %v7371_v44  ;;  %v9123_v26 = vsub.s32 %v8929_v25, %v850_v20  ;;  %vm881_vm13 = vcmp.ne.s32.totalorder %v9106_v32, 0  ;;  %v4240_v25 = vld [vmem:[#allocation17 + $0x50] sm:$0xff] }
 0x5fa   : > { %v7375_v4 = vpop.eup %7374  ;;  %7388 = vrcp.f32 %v3221_v6  ;;  %v3223_v5 = vadd.f32 1.0, %v7373_v45  ;;  %v9127_v34 = vsub.s32 %v8937_v30, %v861_v31  ;;  %vm891_vm14 = vcmp.lt.s32.totalorder %v9106_v32, 0  ;;  %v4804_v45 = vld [vmem:[#allocation17 + $0x80] sm:$0xff] }
 0x5fb   : > { %v7377_v38 = vpop.eup %7376  ;;  %7390 = vrcp.f32 %v3222_v43  ;;  %v3224_v24 = vadd.f32 1.0, %v7375_v4  ;;  %v9131_v48 = vsub.s32 %v8947_v35, %v872_v63  ;;  %vm882_vm1 = vcmp.ne.s32.totalorder %v9119_v16, 0  ;;  %vm9156_vm0 = vmand %vm891_vm14, %vm881_vm13 }
 0x5fc   : > { %vm892_vm2 = vcmp.lt.s32.totalorder %v9119_v16, 0  ;;  %7392 = vrcp.f32 %v3223_v5  ;;  %v3225_v30 = vadd.f32 1.0, %v7377_v38  ;;  %v911_v42 = vadd.s32 10, %v9106_v32 }
 0x5fd   : > { %vm883_vm6 = vcmp.ne.s32.totalorder %v9123_v26, 0  ;;  %vm893_vm8 = vcmp.lt.s32.totalorder %v9123_v26, 0  ;;  %7394 = vrcp.f32 %v3224_v24  ;;  %v912_v54 = vadd.s32 10, %v9119_v16  ;;  %vm9171_vm13 = vmand %vm892_vm2, %vm882_vm1 }
 0x5fe   : > { %vm884_vm11 = vcmp.ne.s32.totalorder %v9127_v34, 0  ;;  %vm894_vm12 = vcmp.lt.s32.totalorder %v9127_v34, 0  ;;  %7396 = vrcp.f32 %v3225_v30  ;;  %v919_v50 = vsel %vm9137_vm15, %v9103_v62, %v9051_v52  ;;  %vm9195_vm1 = vmand %vm893_vm8, %vm883_vm6 }
 0x5ff   : > { %v7379_v57 = vpop.eup %7378  ;;  %v913_v37 = vadd.s32 10, %v9123_v26  ;;  %vm885_vm14 = vcmp.ne.s32.totalorder %v9131_v48, 0  ;;  %vm895_vm9 = vcmp.lt.s32.totalorder %v9131_v48, 0  ;;  %vm9184_vm15 = vcmp.lt.s32.totalorder %v917_v15, 8  ;;  %vm9212_vm2 = vmand %vm894_vm12, %vm884_vm11 }
 0x600   : > { %v7381_v51 = vpop.eup %7380  ;;  %v3246_v28 = vmul.f32 %v7379_v57, %v9008_v1  ;;  %v920_v12 = vsel %vm9147_vm7, %v910_v41, %v9095_v47  ;;  %v914_v1 = vadd.s32 10, %v9127_v34  ;;  %vm9201_vm5 = vcmp.lt.s32.totalorder %v918_v60, 8 }
 0x601   : > { %v7383_v46 = vpop.eup %7382  ;;  %v3247_v53 = vmul.f32 %v7381_v51, %v9010_v2  ;;  %v921_v47 = vsel %vm9156_vm0, %v911_v42, %v9106_v32  ;;  %v915_v62 = vadd.s32 10, %v9131_v48  ;;  %vm9220_vm7 = vcmp.lt.s32.totalorder %v919_v50, 8  ;;  %vm9231_vm0 = vmand %vm895_vm9, %vm885_vm14 }
 0x602   : > { %v7385_v17 = vpop.eup %7384  ;;  %v3281_v2 = vsel %vm9112_vm10, %v3246_v28, 0.0  ;;  %v3248_v29 = vmul.f32 %v7383_v46, %v9012_v8  ;;  %v922_v32 = vsel %vm9171_vm13, %v912_v54, %v9119_v16  ;;  %vm9239_vm10 = vcmp.lt.s32.totalorder %v920_v12, 8 }
 0x603   : > { %v7387_v33 = vpop.eup %7386  ;;  %3291 = vst.msk [vmem:[#allocation3 + $0xc] sm:$0xff] %vm1135_vm3, %v3281_v2  ;;  %v3282_v8 = vsel %vm9184_vm15, %v3247_v53, 0.0  ;;  %v3249_v60 = vmul.f32 %v7385_v17, %v9014_v39  ;;  %v923_v31 = vsel %vm9195_vm1, %v913_v37, %v9123_v26  ;;  %vm9250_vm9 = vcmp.lt.s32.totalorder %v921_v47, 8  ;;  %v3665_v17 = vld [vmem:[#allocation3 + $0x3] sm:$0xff] }
 0x604   : > { %v7389_v36 = vpop.eup %7388  ;;  %3292 = vst.msk [vmem:[#allocation3 + $0x14] sm:$0xff] %vm1135_vm3, %v3282_v8  ;;  %v3283_v40 = vsel %vm9201_vm5, %v3248_v29, 0.0  ;;  %v3250_v23 = vmul.f32 %v7387_v33, %v9016_v9  ;;  %v924_v39 = vsel %vm9212_vm2, %v914_v1, %v9127_v34  ;;  %vm9261_vm6 = vcmp.lt.s32.totalorder %v922_v32, 8  ;;  %v4428_v2 = vld [vmem:[#allocation17 + $0x60] sm:$0xff]  ;;  %v4429_v32 = vld [vmem:[#allocation17 + $0x68] sm:$0xff]  ;;  %v4616_v33 = vld [vmem:[#allocation17 + $0x70] sm:$0xff] }
 0x605   : > { %v7391_v44 = vpop.eup %7390  ;;  %3293 = vst.msk [vmem:[#allocation3 + $0x1c] sm:$0xff] %vm1135_vm3, %v3283_v40  ;;  %v3284_v6 = vsel %vm9220_vm7, %v3249_v60, 0.0  ;;  %v3251_v16 = vmul.f32 %v7389_v36, %v9018_v10  ;;  %v925_v9 = vsel %vm9231_vm0, %v915_v62, %v9131_v48  ;;  %vm9272_vm8 = vcmp.lt.s32.totalorder %v923_v31, 8  ;;  %v4052_v10 = vld [vmem:[#allocation17 + $0x40] sm:$0xff]  ;;  %v4053_v48 = vld [vmem:[#allocation17 + $0x48] sm:$0xff]  ;;  %v4617_v8 = vld [vmem:[#allocation17 + $0x78] sm:$0xff] }
 0x606   : > { %v7393_v41 = vpop.eup %7392  ;;  %3294 = vst.msk [vmem:[#allocation3 + $0x24] sm:$0xff] %vm1135_vm3, %v3284_v6  ;;  %v3285_v43 = vsel %vm9239_vm10, %v3250_v23, 0.0  ;;  %v3252_v26 = vmul.f32 %v7391_v44, %v9020_v11  ;;  %vm9280_vm11 = vcmp.lt.s32.totalorder %v924_v39, 8  ;;  %v4241_v11 = vld [vmem:[#allocation17 + $0x58] sm:$0xff]  ;;  %vm9288_vm12 = vcmp.lt.s32.totalorder %v925_v9, 8 }
 0x607   : > { %v7395_v5 = vpop.eup %7394  ;;  %3295 = vst.msk [vmem:[#allocation3 + $0x2c] sm:$0xff] %vm1135_vm3, %v3285_v43  ;;  %v3286_v34 = vsel %vm9250_vm9, %v3251_v16, 0.0  ;;  %v3253_v38 = vmul.f32 %v7393_v41, %v9029_v18  ;;  %v7092_v37 = vpack.c.bf16 %v4053_v48, %v4052_v10  ;;  %v7100_v13 = vpack.c.bf16 %v4429_v32, %v4428_v2  ;;  %v4805_v43 = vld [vmem:[#allocation17 + $0x88] sm:$0xff]  ;;  %v6144_v32 = vld [vmem:[#allocation19] ss:$0 sm:$0xff] }
 0x608   : > { %v7397_v30 = vpop.eup %7396  ;;  %3296 = vst.msk [vmem:[#allocation3 + $0x34] sm:$0xff] %vm1135_vm3, %v3286_v34  ;;  %v3287_v35 = vsel %vm9261_vm6, %v3252_v26, 0.0  ;;  %v3254_v42 = vmul.f32 %v7395_v5, %v9048_v3  ;;  %v7096_v3 = vpack.c.bf16 %v4241_v11, %v4240_v25  ;;  %v7104_v31 = vpack.c.bf16 %v4617_v8, %v4616_v33 }
 0x609   : > { %3297 = vst.msk [vmem:[#allocation3 + $0x3c] sm:$0xff] %vm1135_vm3, %v3287_v35  ;;  %v3288_v18 = vsel %vm9272_vm8, %v3253_v38, 0.0  ;;  %v3255_v54 = vmul.f32 %v7397_v30, %v9054_v14  ;;  %v7108_v10 = vpack.c.bf16 %v4805_v43, %v4804_v45  ;;  %vm9876_vm13 = vcmask 654336  }
 0x60a   : > { %v3305_v57 = vld [vmem:[#allocation3 + $0x9] sm:$0xff]  ;;  %3298 = vst.msk [vmem:[#allocation3 + $0x44] sm:$0xff] %vm1135_vm3, %v3288_v18  ;;  %v3289_v59 = vsel %vm9280_vm11, %v3254_v42, 0.0  ;;  %vm9877_vm14 = vmmov %vm9876_vm13  ;;  %vm9878_vm15 = vcmask 64512  }
 0x60b   : > { %v3478_v50 = vld [vmem:[#allocation3 + $0xa] sm:$0xff]  ;;  %6787 = vmatmul.mubr.msk.f32.vlgmr.msra.gmra.mrb[54].mxu1 %vm1135_vm3, %v3305_v57  ;;  %v3479_v28 = vld [vmem:[#allocation3 + $0x12] sm:$0xff]  ;;  %3299 = vst.msk [vmem:[#allocation3 + $0x4c] sm:$0xff] %vm1135_vm3, %v3289_v59  ;;  %v3290_v14 = vsel %vm9288_vm12, %v3255_v54, 0.0  ;;  %vm9879_vm1 = vmmov %vm9878_vm15 }
 0x60c   : > { %6806 = vmatmul.mubr.msk.f32.vlgmr.msra.gmra.mrb[48].mxu0 %vm1135_vm3, %v3478_v50  ;;  %v3306_v51 = vld [vmem:[#allocation3 + $0x11] sm:$0xff]  ;;  %3300 = vst.msk [vmem:[#allocation3 + $0x54] sm:$0xff] %vm1135_vm3, %v3290_v14  ;;  %7087 = vmatpush3.bf16.msra.mxu1 %v8890_v56  ;;  %v3307_v52 = vld [vmem:[#allocation3 + $0x19] sm:$0xff]  ;;  %vm9880_vm5 = vmmov %vm9879_vm1 }
 0x60d   : > { %6789 = vmatprep.mubr.msk.f32.mxu1 %vm1135_vm3, %v3306_v51  ;;  %6808 = vmatprep.mubr.msk.f32.mxu0 %vm1135_vm3, %v3479_v28  ;;  %v3480_v12 = vld [vmem:[#allocation3 + $0x1a] sm:$0xff]  ;;  %v3481_v1 = vld [vmem:[#allocation3 + $0x22] sm:$0xff]  ;;  %v3853_v20 = vld [vmem:[#allocation3 + $0xb] sm:$0xff] }
 0x60e   : > { %7091 = vmatpush3.bf16.msra.mxu0 %v8893_v58  ;;  %7093 = vmatprep.subr.bf16.mxu1 %v7092_v37  ;;  %v3308_v55 = vld [vmem:[#allocation3 + $0x21] sm:$0xff]  ;;  %v3309_v46 = vld [vmem:[#allocation3 + $0x29] sm:$0xff]  ;;  %v3854_v60 = vld [vmem:[#allocation3 + $0x13] sm:$0xff] }
 0x60f   : > { %7097 = vmatprep.subr.bf16.mxu0 %v7096_v3  ;;  %6790 = vmatmul.mubr.msk.f32.gmra.mrb[56].mxu1 %vm1135_vm3, %v3307_v52  ;;  %v3482_v53 = vld [vmem:[#allocation3 + $0x2a] sm:$0xff]  ;;  %v3483_v58 = vld [vmem:[#allocation3 + $0x32] sm:$0xff]  ;;  %v3855_v36 = vld [vmem:[#allocation3 + $0x1b] sm:$0xff] }
 0x610   : > { %6809 = vmatmul.mubr.msk.f32.gmra.mrb[50].mxu0 %vm1135_vm3, %v3480_v12  ;;  %6792 = vmatprep.mubr.msk.f32.mxu1 %vm1135_vm3, %v3308_v55  ;;  %v3310_v56 = vld [vmem:[#allocation3 + $0x31] sm:$0xff]  ;;  %v3311_v7 = vld [vmem:[#allocation3 + $0x39] sm:$0xff]  ;;  %v3856_v40 = vld [vmem:[#allocation3 + $0x23] sm:$0xff] }
 0x611   : > { %6811 = vmatprep.mubr.msk.f32.mxu0 %vm1135_vm3, %v3481_v1  ;;  %v3484_v47 = vld [vmem:[#allocation3 + $0x3a] sm:$0xff]  ;;  %v3485_v62 = vld [vmem:[#allocation3 + $0x42] sm:$0xff]  ;;  %v3857_v23 = vld [vmem:[#allocation3 + $0x2b] sm:$0xff] }
 0x612   : > { %v3312_v15 = vld [vmem:[#allocation3 + $0x41] sm:$0xff]  ;;  %v3313_v29 = vld [vmem:[#allocation3 + $0x49] sm:$0xff]  ;;  %v3858_v63 = vld [vmem:[#allocation3 + $0x33] sm:$0xff] }
 0x613   : > { %6793 = vmatmul.mubr.msk.f32.gmra.mrb[58].mxu1 %vm1135_vm3, %v3309_v46  ;;  %v3486_v61 = vld [vmem:[#allocation3 + $0x4a] sm:$0xff]  ;;  %v3859_v39 = vld [vmem:[#allocation3 + $0x3b] sm:$0xff]  ;;  %v3862_v16 = vld [vmem:[#allocation3 + $0x53] sm:$0xff] }
 0x614   : > { %6812 = vmatmul.mubr.msk.f32.gmra.mrb[52].mxu0 %vm1135_vm3, %v3482_v53  ;;  %6795 = vmatprep.mubr.msk.f32.mxu1 %vm1135_vm3, %v3310_v56  ;;  %v3860_v44 = vld [vmem:[#allocation3 + $0x43] sm:$0xff]  ;;  %v3861_v6 = vld [vmem:[#allocation3 + $0x4b] sm:$0xff]  ;;  %v4042_v26 = vld [vmem:[#allocation3 + $0x14] sm:$0xff] }
 0x615   : > { %6814 = vmatprep.mubr.msk.f32.mxu0 %vm1135_vm3, %v3483_v58  ;;  %v4041_v9 = vld [vmem:[#allocation3 + $0xc] sm:$0xff]  ;;  %v4230_v4 = vld [vmem:[#allocation3 + $0x15] sm:$0xff]  ;;  %v4231_v34 = vld [vmem:[#allocation3 + $0x1d] sm:$0xff] }
 0x616   : > { %v4229_v41 = vld [vmem:[#allocation3 + $0xd] sm:$0xff]  ;;  %v4043_v5 = vld [vmem:[#allocation3 + $0x1c] sm:$0xff]  ;;  %v4044_v38 = vld [vmem:[#allocation3 + $0x24] sm:$0xff] }
 0x617   : > { %6796 = vmatmul.mubr.msk.f32.gmra.mrb[60].mxu1 %vm1135_vm3, %v3311_v7  ;;  %v4232_v24 = vld [vmem:[#allocation3 + $0x25] sm:$0xff]  ;;  %v4233_v25 = vld [vmem:[#allocation3 + $0x2d] sm:$0xff]  ;;  %v4234_v30 = vld [vmem:[#allocation3 + $0x35] sm:$0xff] }
 0x618   : > { %6815 = vmatmul.mubr.msk.f32.gmra.mrb[54].mxu0 %vm1135_vm3, %v3484_v47  ;;  %6798 = vmatprep.mubr.msk.f32.mxu1 %vm1135_vm3, %v3312_v15  ;;  %v4045_v48 = vld [vmem:[#allocation3 + $0x2c] sm:$0xff]  ;;  %v4046_v11 = vld [vmem:[#allocation3 + $0x34] sm:$0xff]  ;;  %v4047_v35 = vld [vmem:[#allocation3 + $0x3c] sm:$0xff] }
 0x619   : > { %6817 = vmatprep.mubr.msk.f32.mxu0 %vm1135_vm3, %v3485_v62  ;;  %v4235_v42 = vld [vmem:[#allocation3 + $0x3d] sm:$0xff]  ;;  %v4236_v18 = vld [vmem:[#allocation3 + $0x45] sm:$0xff]  ;;  %v4237_v57 = vld [vmem:[#allocation3 + $0x4d] sm:$0xff] }
 0x61a   : > { %v4048_v49 = vld [vmem:[#allocation3 + $0x44] sm:$0xff]  ;;  %v4049_v54 = vld [vmem:[#allocation3 + $0x4c] sm:$0xff]  ;;  %v4050_v50 = vld [vmem:[#allocation3 + $0x54] sm:$0xff] }
 0x61b   : > { %6799 = vmatmul.mubr.msk.f32.gmra.mrb[62].mxu1 %vm1135_vm3, %v3313_v29  ;;  %v4238_v59 = vld [vmem:[#allocation3 + $0x55] sm:$0xff]  ;;  %v4607_v51 = vld [vmem:[#allocation3 + $0x26] sm:$0xff]  ;;  %v4610_v52 = vld [vmem:[#allocation3 + $0x3e] sm:$0xff] }
 0x61c   : > { %6818 = vmatmul.mubr.msk.f32.gmra.mrb[56].mxu0 %vm1135_vm3, %v3486_v61  ;;  %6824 = vmatprep.mubr.msk.f32.mxu1 %vm1135_vm3, %v3665_v17  ;;  %v4608_v28 = vld [vmem:[#allocation3 + $0x2e] sm:$0xff]  ;;  %v4609_v14 = vld [vmem:[#allocation3 + $0x36] sm:$0xff]  ;;  %v4611_v12 = vld [vmem:[#allocation3 + $0x46] sm:$0xff] }
 0x61d   : > { %6843 = vmatprep.mubr.msk.f32.mxu0 %vm1135_vm3, %v3853_v20  ;;  %v4612_v55 = vld [vmem:[#allocation3 + $0x4e] sm:$0xff]  ;;  %v4613_v1 = vld [vmem:[#allocation3 + $0x56] sm:$0xff]  ;;  %v4614_v53 = vld [vmem:[#allocation3 + $0x5e] sm:$0xff] }
 0x61e   : > { %v4426_v46 = vld [vmem:[#allocation3 + $0x5d] sm:$0xff]  ;;  %v4795_v7 = vld [vmem:[#allocation3 + $0x27] sm:$0xff]  ;;  %v4796_v47 = vld [vmem:[#allocation3 + $0x2f] sm:$0xff] }
 0x61f   : > { %6825 = vmatmul.mubr.msk.f32.vlgmr.msra.gmra.mrb[64].mxu1 %vm1135_vm3, %v3853_v20  ;;  %v4793_v56 = vld [vmem:[#allocation3 + $0x17] sm:$0xff]  ;;  %v4794_v58 = vld [vmem:[#allocation3 + $0x1f] sm:$0xff]  ;;  %v4799_v17 = vld [vmem:[#allocation3 + $0x47] sm:$0xff] }
 0x620   : > { %6844 = vmatmul.mubr.msk.f32.vlgmr.msra.gmra.mrb[58].mxu0 %vm1135_vm3, %v3854_v60  ;;  %6827 = vmatprep.mubr.msk.f32.mxu1 %vm1135_vm3, %v3854_v60  ;;  %v4797_v15 = vld [vmem:[#allocation3 + $0x37] sm:$0xff]  ;;  %v4798_v62 = vld [vmem:[#allocation3 + $0x3f] sm:$0xff]  ;;  %v4800_v2 = vld [vmem:[#allocation3 + $0x4f] sm:$0xff] }
 0x621   : > { %6846 = vmatprep.mubr.msk.f32.mxu0 %vm1135_vm3, %v3855_v36  ;;  %7095 = vmatpush3.bf16.msra.mxu1 %v7092_v37  ;;  %v4605_v37 = vld [vmem:[#allocation3 + $0x16] sm:$0xff]  ;;  %v4802_v61 = vld [vmem:[#allocation3 + $0x5f] sm:$0xff]  ;;  %vm9881_vm2 = vmmov %vm9879_vm1 }
 0x622   : > { %7099 = vmatpush3.bf16.msra.mxu0 %v7096_v3  ;;  %7101 = vmatprep.subr.bf16.mxu1 %v7100_v13  ;;  %v4606_v3 = vld [vmem:[#allocation3 + $0x1e] sm:$0xff]  ;;  %vm9883_vm7 = vmmov %vm9879_vm1 }
 0x623   : > { %7105 = vmatprep.subr.bf16.mxu0 %v7104_v31  ;;  %6828 = vmatmul.mubr.msk.f32.gmra.mrb[66].mxu1 %vm1135_vm3, %v3855_v36  ;;  %v4801_v29 = vld [vmem:[#allocation3 + $0x57] sm:$0xff]  ;;  %vm9884_vm0 = vmmov %vm9879_vm1 }
 0x624   : > { %6847 = vmatmul.mubr.msk.f32.gmra.mrb[60].mxu0 %vm1135_vm3, %v3856_v40  ;;  %6830 = vmatprep.mubr.msk.f32.mxu1 %vm1135_vm3, %v3856_v40  ;;  %vm9885_vm10 = vmmov %vm9884_vm0 }
 0x625   : > { %6849 = vmatprep.mubr.msk.f32.mxu0 %vm1135_vm3, %v3857_v23  ;;  %vm9886_vm9 = vmmov %vm9884_vm0 }
 0x626   : > { %vm9887_vm6 = vmmov %vm9884_vm0 }
 0x627   : > { %6831 = vmatmul.mubr.msk.f32.gmra.mrb[68].mxu1 %vm1135_vm3, %v3857_v23  ;;  %vm9888_vm8 = vmmov %vm9884_vm0 }
 0x628   : > { %6850 = vmatmul.mubr.msk.f32.gmra.mrb[62].mxu0 %vm1135_vm3, %v3858_v63  ;;  %6833 = vmatprep.mubr.msk.f32.mxu1 %vm1135_vm3, %v3858_v63  ;;  %vm9889_vm11 = vmmov %vm9884_vm0 }
 0x629   : > { %6852 = vmatprep.mubr.msk.f32.mxu0 %vm1135_vm3, %v3859_v39 }
 0x62b   : > { %6834 = vmatmul.mubr.msk.f32.gmra.mrb[70].mxu1 %vm1135_vm3, %v3859_v39 }
 0x62c   : > { %6853 = vmatmul.mubr.msk.f32.gmra.mrb[64].mxu0 %vm1135_vm3, %v3860_v44  ;;  %6836 = vmatprep.mubr.msk.f32.mxu1 %vm1135_vm3, %v3860_v44 }
 0x62d   : > { %6855 = vmatprep.mubr.msk.f32.mxu0 %vm1135_vm3, %v3861_v6 }
 0x62f   : > { %6837 = vmatmul.mubr.msk.f32.gmra.mrb[72].mxu1 %vm1135_vm3, %v3861_v6 }
 0x630   : > { %6856 = vmatmul.mubr.msk.f32.gmra.mrb[66].mxu0 %vm1135_vm3, %v3862_v16  ;;  %6862 = vmatprep.mubr.msk.f32.mxu1 %vm1135_vm3, %v4041_v9 }
 0x631   : > { %6881 = vmatprep.mubr.msk.f32.mxu0 %vm1135_vm3, %v4229_v41 }
 0x633   : > { %6863 = vmatmul.mubr.msk.f32.vlgmr.msra.gmra.mrb[74].mxu1 %vm1135_vm3, %v4042_v26 }
 0x634   : > { %6882 = vmatmul.mubr.msk.f32.vlgmr.msra.gmra.mrb[68].mxu0 %vm1135_vm3, %v4230_v4  ;;  %6865 = vmatprep.mubr.msk.f32.mxu1 %vm1135_vm3, %v4043_v5 }
 0x635   : > { %6884 = vmatprep.mubr.msk.f32.mxu0 %vm1135_vm3, %v4231_v34  ;;  %7103 = vmatpush3.bf16.msra.mxu1 %v7100_v13 }
 0x636   : > { %7107 = vmatpush3.bf16.msra.mxu0 %v7104_v31  ;;  %7109 = vmatprep.subr.bf16.mxu1 %v7108_v10 }
 0x637   : > { %7112 = vmatprep.subr.bf16.mxu0 %v7981_v27  ;;  %6866 = vmatmul.mubr.msk.f32.gmra.mrb[76].mxu1 %vm1135_vm3, %v4044_v38 }
 0x638   : > { %6885 = vmatmul.mubr.msk.f32.gmra.mrb[70].mxu0 %vm1135_vm3, %v4232_v24  ;;  %6868 = vmatprep.mubr.msk.f32.mxu1 %vm1135_vm3, %v4045_v48 }
 0x639   : > { %6887 = vmatprep.mubr.msk.f32.mxu0 %vm1135_vm3, %v4233_v25 }
 0x63b   : > { %6869 = vmatmul.mubr.msk.f32.gmra.mrb[78].mxu1 %vm1135_vm3, %v4046_v11 }
 0x63c   : > { %6888 = vmatmul.mubr.msk.f32.gmra.mrb[72].mxu0 %vm1135_vm3, %v4234_v30  ;;  %6871 = vmatprep.mubr.msk.f32.mxu1 %vm1135_vm3, %v4047_v35 }
 0x63d   : > { %6890 = vmatprep.mubr.msk.f32.mxu0 %vm1135_vm3, %v4235_v42 }
 0x63f   : > { %6872 = vmatmul.mubr.msk.f32.gmra.mrb[80].mxu1 %vm1135_vm3, %v4048_v49 }
 0x640   : > { %6891 = vmatmul.mubr.msk.f32.gmra.mrb[74].mxu0 %vm1135_vm3, %v4236_v18  ;;  %6874 = vmatprep.mubr.msk.f32.mxu1 %vm1135_vm3, %v4049_v54 }
 0x641   : > { %6893 = vmatprep.mubr.msk.f32.mxu0 %vm1135_vm3, %v4237_v57 }
 0x643   : > { %6875 = vmatmul.mubr.msk.f32.gmra.mrb[82].mxu1 %vm1135_vm3, %v4050_v50 }
 0x644   : > { %6894 = vmatmul.mubr.msk.f32.gmra.mrb[76].mxu0 %vm1135_vm3, %v4238_v59  ;;  %6900 = vmatprep.mubr.msk.f32.mxu1 %vm1135_vm3, %v4230_v4 }
 0x645   : > { %6919 = vmatprep.mubr.msk.f32.mxu0 %vm1135_vm3, %v4605_v37 }
 0x647   : > { %6901 = vmatmul.mubr.msk.f32.vlgmr.msra.gmra.mrb[84].mxu1 %vm1135_vm3, %v4231_v34 }
 0x648   : > { %6920 = vmatmul.mubr.msk.f32.vlgmr.msra.gmra.mrb[78].mxu0 %vm1135_vm3, %v4606_v3  ;;  %6903 = vmatprep.mubr.msk.f32.mxu1 %vm1135_vm3, %v4232_v24 }
 0x649   : > { %6922 = vmatprep.mubr.msk.f32.mxu0 %vm1135_vm3, %v4607_v51  ;;  %7111 = vmatpush3.bf16.msra.mxu1 %v7108_v10 }
 0x64a   : > { %7127 = vmatprep.subr.bf16.mxu1 %v7981_v27 }
 0x64b   : > { %6904 = vmatmul.mubr.msk.f32.gmra.mrb[86].mxu1 %vm1135_vm3, %v4233_v25 }
 0x64c   : > { %6923 = vmatmul.mubr.msk.f32.gmra.mrb[80].mxu0 %vm1135_vm3, %v4608_v28  ;;  %6906 = vmatprep.mubr.msk.f32.mxu1 %vm1135_vm3, %v4234_v30 }
 0x64d   : > { %6925 = vmatprep.mubr.msk.f32.mxu0 %vm1135_vm3, %v4609_v14 }
 0x64f   : > { %6907 = vmatmul.mubr.msk.f32.gmra.mrb[88].mxu1 %vm1135_vm3, %v4235_v42 }
 0x650   : > { %6926 = vmatmul.mubr.msk.f32.gmra.mrb[82].mxu0 %vm1135_vm3, %v4610_v52  ;;  %6909 = vmatprep.mubr.msk.f32.mxu1 %vm1135_vm3, %v4236_v18 }
 0x651   : > { %6928 = vmatprep.mubr.msk.f32.mxu0 %vm1135_vm3, %v4611_v12 }
 0x653   : > { %6910 = vmatmul.mubr.msk.f32.gmra.mrb[90].mxu1 %vm1135_vm3, %v4237_v57 }
 0x654   : > { %6929 = vmatmul.mubr.msk.f32.gmra.mrb[84].mxu0 %vm1135_vm3, %v4612_v55  ;;  %6912 = vmatprep.mubr.msk.f32.mxu1 %vm1135_vm3, %v4238_v59 }
 0x655   : > { %6931 = vmatprep.mubr.msk.f32.mxu0 %vm1135_vm3, %v4613_v1 }
 0x657   : > { %6913 = vmatmul.mubr.msk.f32.gmra.mrb[92].mxu1 %vm1135_vm3, %v4426_v46 }
 0x658   : > { %6932 = vmatmul.mubr.msk.f32.gmra.mrb[86].mxu0 %vm1135_vm3, %v4614_v53  ;;  %6938 = vmatprep.mubr.msk.f32.mxu1 %vm1135_vm3, %v4793_v56 }
 0x659   : > { %6973 = vmatprep.mubr.msk.f32.mxu0 %vm7982_vm4, %v7980_v0 }
 0x65b   : > { %6939 = vmatmul.mubr.msk.f32.vlgmr.msra.gmra.mrb[94].mxu1 %vm1135_vm3, %v4794_v58 }
 0x65c   : > { %6941 = vmatprep.mubr.msk.f32.mxu1 %vm1135_vm3, %v4795_v7 }
 0x65f   : > { %6942 = vmatmul.mubr.msk.f32.gmra.mrb[96].mxu1 %vm1135_vm3, %v4796_v47 }
 0x660   : > { %6944 = vmatprep.mubr.msk.f32.mxu1 %vm1135_vm3, %v4797_v15 }
 0x663   : > { %6945 = vmatmul.mubr.msk.f32.gmra.mrb[98].mxu1 %vm1135_vm3, %v4798_v62 }
 0x664   : > { %6947 = vmatprep.mubr.msk.f32.mxu1 %vm1135_vm3, %v4799_v17 }
 0x667   : > { %6948 = vmatmul.mubr.msk.f32.gmra.mrb[100].mxu1 %vm1135_vm3, %v4800_v2 }
 0x668   : > { %6950 = vmatprep.mubr.msk.f32.mxu1 %vm1135_vm3, %v4801_v29 }
 0x66b   : > { %6951 = vmatmul.mubr.msk.f32.gmra.mrb[102].mxu1 %vm1135_vm3, %v4802_v61 }
 0x66c   : > { %6996 = vmatprep.mubr.msk.f32.mxu1 %vm7982_vm4, %v7980_v0 }
 0x6de   : > { %v6788_v20 = vpop.f32.mrb[54].mxu1 }
 0x6df   : > { %v6807_v33 = vpop.f32.mrb[48].mxu0  ;;  %v3424_v8 = vadd.f32 %v6788_v20, %v6144_v32  ;;  %v3418_v60 = vpop.f32.mrb[55].mxu1 }
 0x6e0   : > { %v3586_v13 = vpop.f32.mrb[49].mxu0  ;;  %v3419_v31 = vadd.f32 %v6144_v32, %v3418_v60 }
 0x6e1   : > { %3468 = vst.msk [vmem:[#allocation4 + $0x8] sm:$0xff] %vm1135_vm3, %v3424_v8 }
 0x6e2   : > { %3467 = vst.msk [vmem:[#allocation4] sm:$0xff] %vm1135_vm3, %v3419_v31  ;;  %v6791_v36 = vpop.f32.mrb[56].mxu1 }
 0x6e3   : > { %v6810_v40 = vpop.f32.mrb[50].mxu0  ;;  %v3434_v23 = vadd.f32 %v6791_v36, %v6144_v32  ;;  %v3428_v63 = vpop.f32.mrb[57].mxu1 }
 0x6e4   : > { %v3596_v39 = vpop.f32.mrb[51].mxu0  ;;  %v3429_v44 = vadd.f32 %v6144_v32, %v3428_v63 }
 0x6e5   : > { %3470 = vst.msk [vmem:[#allocation4 + $0x18] sm:$0xff] %vm1135_vm3, %v3434_v23 }
 0x6e6   : > { %3469 = vst.msk [vmem:[#allocation4 + $0x10] sm:$0xff] %vm1135_vm3, %v3429_v44  ;;  %v6794_v6 = vpop.f32.mrb[58].mxu1 }
 0x6e7   : > { %v6813_v16 = vpop.f32.mrb[52].mxu0  ;;  %v3444_v45 = vadd.f32 %v6794_v6, %v6144_v32  ;;  %v3438_v9 = vpop.f32.mrb[59].mxu1 }
 0x6e8   : > { %v3606_v41 = vpop.f32.mrb[53].mxu0  ;;  %v3636_v43 = vld [vmem:[#allocation4 + $0x8] sm:$0xff]  ;;  %v3439_v26 = vadd.f32 %v6144_v32, %v3438_v9 }
 0x6e9   : > { %v3646_v4 = vadd.f32 %v6807_v33, %v3636_v43  ;;  %v3635_v10 = vld [vmem:[#allocation4] sm:$0xff]  ;;  %3472 = vst.msk [vmem:[#allocation4 + $0x28] sm:$0xff] %vm1135_vm3, %v3444_v45 }
 0x6ea   : > { %v3645_v5 = vadd.f32 %v3635_v10, %v3586_v13  ;;  %3471 = vst.msk [vmem:[#allocation4 + $0x20] sm:$0xff] %vm1135_vm3, %v3439_v26  ;;  %v6797_v34 = vpop.f32.mrb[60].mxu1 }
 0x6eb   : > { %v6816_v38 = vpop.f32.mrb[54].mxu0  ;;  %3656 = vst.msk [vmem:[#allocation4 + $0x8] sm:$0xff] %vm1135_vm3, %v3646_v4  ;;  %v3454_v24 = vadd.f32 %v6797_v34, %v6144_v32  ;;  %v3448_v48 = vpop.f32.mrb[61].mxu1 }
 0x6ec   : > { %v3616_v25 = vpop.f32.mrb[55].mxu0  ;;  %3655 = vst.msk [vmem:[#allocation4] sm:$0xff] %vm1135_vm3, %v3645_v5  ;;  %v3638_v11 = vld [vmem:[#allocation4 + $0x18] sm:$0xff]  ;;  %v3449_v30 = vadd.f32 %v6144_v32, %v3448_v48 }
 0x6ed   : > { %v3648_v35 = vadd.f32 %v6810_v40, %v3638_v11  ;;  %v3637_v42 = vld [vmem:[#allocation4 + $0x10] sm:$0xff]  ;;  %3474 = vst.msk [vmem:[#allocation4 + $0x38] sm:$0xff] %vm1135_vm3, %v3454_v24 }
 0x6ee   : > { %v3647_v49 = vadd.f32 %v3637_v42, %v3596_v39  ;;  %3473 = vst.msk [vmem:[#allocation4 + $0x30] sm:$0xff] %vm1135_vm3, %v3449_v30  ;;  %v6800_v18 = vpop.f32.mrb[62].mxu1 }
 0x6ef   : > { %v6819_v54 = vpop.f32.mrb[56].mxu0  ;;  %3658 = vst.msk [vmem:[#allocation4 + $0x18] sm:$0xff] %vm1135_vm3, %v3648_v35  ;;  %v3464_v57 = vadd.f32 %v6800_v18, %v6144_v32  ;;  %v3458_v50 = vpop.f32.mrb[63].mxu1 }
 0x6f0   : > { %v3626_v59 = vpop.f32.mrb[57].mxu0  ;;  %3657 = vst.msk [vmem:[#allocation4 + $0x10] sm:$0xff] %vm1135_vm3, %v3647_v49  ;;  %v3640_v37 = vld [vmem:[#allocation4 + $0x28] sm:$0xff]  ;;  %v3459_v3 = vadd.f32 %v6144_v32, %v3458_v50 }
 0x6f1   : > { %v3650_v51 = vadd.f32 %v6813_v16, %v3640_v37  ;;  %v3639_v28 = vld [vmem:[#allocation4 + $0x20] sm:$0xff]  ;;  %3476 = vst.msk [vmem:[#allocation4 + $0x48] sm:$0xff] %vm1135_vm3, %v3464_v57 }
 0x6f2   : > { %v3649_v14 = vadd.f32 %v3639_v28, %v3606_v41  ;;  %3475 = vst.msk [vmem:[#allocation4 + $0x40] sm:$0xff] %vm1135_vm3, %v3459_v3  ;;  %v6826_v52 = vpop.f32.mrb[64].mxu1  ;;  %v3824_v12 = vld [vmem:[#allocation4 + $0x8] sm:$0xff] }
 0x6f3   : > { %v6845_v55 = vpop.f32.mrb[58].mxu0  ;;  %3660 = vst.msk [vmem:[#allocation4 + $0x28] sm:$0xff] %vm1135_vm3, %v3650_v51  ;;  %v3834_v1 = vadd.f32 %v6826_v52, %v3824_v12  ;;  %v3774_v46 = vpop.f32.mrb[65].mxu1  ;;  %v3823_v53 = vld [vmem:[#allocation4] sm:$0xff] }
 0x6f4   : > { %v3962_v56 = vpop.f32.mrb[59].mxu0  ;;  %3659 = vst.msk [vmem:[#allocation4 + $0x20] sm:$0xff] %vm1135_vm3, %v3649_v14  ;;  %v3642_v58 = vld [vmem:[#allocation4 + $0x38] sm:$0xff]  ;;  %v3833_v7 = vadd.f32 %v3823_v53, %v3774_v46 }
 0x6f5   : > { %v3652_v47 = vadd.f32 %v6816_v38, %v3642_v58  ;;  %v3641_v15 = vld [vmem:[#allocation4 + $0x30] sm:$0xff]  ;;  %3844 = vst.msk [vmem:[#allocation4 + $0x8] sm:$0xff] %vm1135_vm3, %v3834_v1 }
 0x6f6   : > { %v3651_v62 = vadd.f32 %v3641_v15, %v3616_v25  ;;  %3843 = vst.msk [vmem:[#allocation4] sm:$0xff] %vm1135_vm3, %v3833_v7  ;;  %v6829_v17 = vpop.f32.mrb[66].mxu1  ;;  %v3826_v2 = vld [vmem:[#allocation4 + $0x18] sm:$0xff] }
 0x6f7   : > { %v6848_v29 = vpop.f32.mrb[60].mxu0  ;;  %3662 = vst.msk [vmem:[#allocation4 + $0x38] sm:$0xff] %vm1135_vm3, %v3652_v47  ;;  %v3836_v61 = vadd.f32 %v6829_v17, %v3826_v2  ;;  %v3784_v32 = vpop.f32.mrb[67].mxu1  ;;  %v3825_v20 = vld [vmem:[#allocation4 + $0x10] sm:$0xff] }
 0x6f8   : > { %v3972_v33 = vpop.f32.mrb[61].mxu0  ;;  %3661 = vst.msk [vmem:[#allocation4 + $0x30] sm:$0xff] %vm1135_vm3, %v3651_v62  ;;  %v3644_v8 = vld [vmem:[#allocation4 + $0x48] sm:$0xff]  ;;  %v3835_v60 = vadd.f32 %v3825_v20, %v3784_v32 }
 0x6f9   : > { %v3654_v13 = vadd.f32 %v6819_v54, %v3644_v8  ;;  %v3643_v31 = vld [vmem:[#allocation4 + $0x40] sm:$0xff]  ;;  %3846 = vst.msk [vmem:[#allocation4 + $0x18] sm:$0xff] %vm1135_vm3, %v3836_v61 }
 0x6fa   : > { %v3653_v36 = vadd.f32 %v3643_v31, %v3626_v59  ;;  %3845 = vst.msk [vmem:[#allocation4 + $0x10] sm:$0xff] %vm1135_vm3, %v3835_v60  ;;  %v6832_v40 = vpop.f32.mrb[68].mxu1  ;;  %v3828_v23 = vld [vmem:[#allocation4 + $0x28] sm:$0xff] }
 0x6fb   : > { %v6851_v63 = vpop.f32.mrb[62].mxu0  ;;  %3664 = vst.msk [vmem:[#allocation4 + $0x48] sm:$0xff] %vm1135_vm3, %v3654_v13  ;;  %v3838_v39 = vadd.f32 %v6832_v40, %v3828_v23  ;;  %v3794_v44 = vpop.f32.mrb[69].mxu1  ;;  %v3827_v6 = vld [vmem:[#allocation4 + $0x20] sm:$0xff] }
 0x6fc   : > { %v3982_v16 = vpop.f32.mrb[63].mxu0  ;;  %3663 = vst.msk [vmem:[#allocation4 + $0x40] sm:$0xff] %vm1135_vm3, %v3653_v36  ;;  %v4012_v45 = vld [vmem:[#allocation4 + $0x8] sm:$0xff]  ;;  %v3837_v9 = vadd.f32 %v3827_v6, %v3794_v44 }
 0x6fd   : > { %v4022_v41 = vadd.f32 %v6845_v55, %v4012_v45  ;;  %v4011_v43 = vld [vmem:[#allocation4] sm:$0xff]  ;;  %3848 = vst.msk [vmem:[#allocation4 + $0x28] sm:$0xff] %vm1135_vm3, %v3838_v39 }
 0x6fe   : > { %v4021_v26 = vadd.f32 %v4011_v43, %v3962_v56  ;;  %3847 = vst.msk [vmem:[#allocation4 + $0x20] sm:$0xff] %vm1135_vm3, %v3837_v9  ;;  %v6835_v4 = vpop.f32.mrb[70].mxu1  ;;  %v3830_v10 = vld [vmem:[#allocation4 + $0x38] sm:$0xff] }
 0x6ff   : > { %v6854_v5 = vpop.f32.mrb[64].mxu0  ;;  %4032 = vst.msk [vmem:[#allocation4 + $0x8] sm:$0xff] %vm1135_vm3, %v4022_v41  ;;  %v3840_v34 = vadd.f32 %v6835_v4, %v3830_v10  ;;  %v3804_v38 = vpop.f32.mrb[71].mxu1  ;;  %v3829_v24 = vld [vmem:[#allocation4 + $0x30] sm:$0xff] }
 0x700   : > { %v3992_v48 = vpop.f32.mrb[65].mxu0  ;;  %4031 = vst.msk [vmem:[#allocation4] sm:$0xff] %vm1135_vm3, %v4021_v26  ;;  %v4014_v25 = vld [vmem:[#allocation4 + $0x18] sm:$0xff]  ;;  %v3839_v11 = vadd.f32 %v3829_v24, %v3804_v38 }
 0x701   : > { %v4024_v30 = vadd.f32 %v6848_v29, %v4014_v25  ;;  %v4013_v35 = vld [vmem:[#allocation4 + $0x10] sm:$0xff]  ;;  %3850 = vst.msk [vmem:[#allocation4 + $0x38] sm:$0xff] %vm1135_vm3, %v3840_v34 }
 0x702   : > { %v4023_v42 = vadd.f32 %v4013_v35, %v3972_v33  ;;  %3849 = vst.msk [vmem:[#allocation4 + $0x30] sm:$0xff] %vm1135_vm3, %v3839_v11  ;;  %v6838_v49 = vpop.f32.mrb[72].mxu1  ;;  %v3832_v18 = vld [vmem:[#allocation4 + $0x48] sm:$0xff] }
 0x703   : > { %v6857_v54 = vpop.f32.mrb[66].mxu0  ;;  %4034 = vst.msk [vmem:[#allocation4 + $0x18] sm:$0xff] %vm1135_vm3, %v4024_v30  ;;  %v3842_v57 = vadd.f32 %v6838_v49, %v3832_v18  ;;  %v3814_v50 = vpop.f32.mrb[73].mxu1  ;;  %v3831_v59 = vld [vmem:[#allocation4 + $0x40] sm:$0xff] }
 0x704   : > { %v4002_v37 = vpop.f32.mrb[67].mxu0  ;;  %4033 = vst.msk [vmem:[#allocation4 + $0x10] sm:$0xff] %vm1135_vm3, %v4023_v42  ;;  %v4016_v3 = vld [vmem:[#allocation4 + $0x28] sm:$0xff]  ;;  %v3841_v51 = vadd.f32 %v3831_v59, %v3814_v50 }
 0x705   : > { %v4026_v28 = vadd.f32 %v6851_v63, %v4016_v3  ;;  %v4015_v14 = vld [vmem:[#allocation4 + $0x20] sm:$0xff]  ;;  %3852 = vst.msk [vmem:[#allocation4 + $0x48] sm:$0xff] %vm1135_vm3, %v3842_v57 }
 0x706   : > { %v4025_v52 = vadd.f32 %v4015_v14, %v3982_v16  ;;  %3851 = vst.msk [vmem:[#allocation4 + $0x40] sm:$0xff] %vm1135_vm3, %v3841_v51  ;;  %v6864_v12 = vpop.f32.mrb[74].mxu1  ;;  %v4200_v55 = vld [vmem:[#allocation4 + $0x8] sm:$0xff] }
 0x707   : > { %v6883_v1 = vpop.f32.mrb[68].mxu0  ;;  %4036 = vst.msk [vmem:[#allocation4 + $0x28] sm:$0xff] %vm1135_vm3, %v4026_v28  ;;  %v4210_v46 = vadd.f32 %v6864_v12, %v4200_v55  ;;  %v4150_v53 = vpop.f32.mrb[75].mxu1  ;;  %v4199_v56 = vld [vmem:[#allocation4] sm:$0xff] }
 0x708   : > { %v4338_v58 = vpop.f32.mrb[69].mxu0  ;;  %4035 = vst.msk [vmem:[#allocation4 + $0x20] sm:$0xff] %vm1135_vm3, %v4025_v52  ;;  %v4018_v7 = vld [vmem:[#allocation4 + $0x38] sm:$0xff]  ;;  %v4209_v47 = vadd.f32 %v4199_v56, %v4150_v53 }
 0x709   : > { %v4028_v15 = vadd.f32 %v6854_v5, %v4018_v7  ;;  %v4017_v62 = vld [vmem:[#allocation4 + $0x30] sm:$0xff]  ;;  %4220 = vst.msk [vmem:[#allocation4 + $0x8] sm:$0xff] %vm1135_vm3, %v4210_v46 }
 0x70a   : > { %v4027_v17 = vadd.f32 %v4017_v62, %v3992_v48  ;;  %4219 = vst.msk [vmem:[#allocation4] sm:$0xff] %vm1135_vm3, %v4209_v47  ;;  %v6867_v2 = vpop.f32.mrb[76].mxu1  ;;  %v4202_v29 = vld [vmem:[#allocation4 + $0x18] sm:$0xff] }
 0x70b   : > { %v6886_v61 = vpop.f32.mrb[70].mxu0  ;;  %4038 = vst.msk [vmem:[#allocation4 + $0x38] sm:$0xff] %vm1135_vm3, %v4028_v15  ;;  %v4212_v32 = vadd.f32 %v6867_v2, %v4202_v29  ;;  %v4160_v20 = vpop.f32.mrb[77].mxu1  ;;  %v4201_v33 = vld [vmem:[#allocation4 + $0x10] sm:$0xff] }
 0x70c   : > { %v4348_v8 = vpop.f32.mrb[71].mxu0  ;;  %4037 = vst.msk [vmem:[#allocation4 + $0x30] sm:$0xff] %vm1135_vm3, %v4027_v17  ;;  %v4020_v60 = vld [vmem:[#allocation4 + $0x48] sm:$0xff]  ;;  %v4211_v13 = vadd.f32 %v4201_v33, %v4160_v20 }
 0x70d   : > { %v4030_v31 = vadd.f32 %v6857_v54, %v4020_v60  ;;  %v4019_v36 = vld [vmem:[#allocation4 + $0x40] sm:$0xff]  ;;  %4222 = vst.msk [vmem:[#allocation4 + $0x18] sm:$0xff] %vm1135_vm3, %v4212_v32 }
 0x70e   : > { %v4029_v40 = vadd.f32 %v4019_v36, %v4002_v37  ;;  %4221 = vst.msk [vmem:[#allocation4 + $0x10] sm:$0xff] %vm1135_vm3, %v4211_v13  ;;  %v6870_v23 = vpop.f32.mrb[78].mxu1  ;;  %v4204_v63 = vld [vmem:[#allocation4 + $0x28] sm:$0xff] }
 0x70f   : > { %v6889_v39 = vpop.f32.mrb[72].mxu0  ;;  %4040 = vst.msk [vmem:[#allocation4 + $0x48] sm:$0xff] %vm1135_vm3, %v4030_v31  ;;  %v4214_v44 = vadd.f32 %v6870_v23, %v4204_v63  ;;  %v4170_v6 = vpop.f32.mrb[79].mxu1  ;;  %v4203_v16 = vld [vmem:[#allocation4 + $0x20] sm:$0xff] }
 0x710   : > { %v4358_v45 = vpop.f32.mrb[73].mxu0  ;;  %4039 = vst.msk [vmem:[#allocation4 + $0x40] sm:$0xff] %vm1135_vm3, %v4029_v40  ;;  %v4388_v9 = vld [vmem:[#allocation4 + $0x8] sm:$0xff]  ;;  %v4213_v41 = vadd.f32 %v4203_v16, %v4170_v6 }
 0x711   : > { %v4398_v43 = vadd.f32 %v6883_v1, %v4388_v9  ;;  %v4387_v26 = vld [vmem:[#allocation4] sm:$0xff]  ;;  %4224 = vst.msk [vmem:[#allocation4 + $0x28] sm:$0xff] %vm1135_vm3, %v4214_v44 }
 0x712   : > { %v4397_v4 = vadd.f32 %v4387_v26, %v4338_v58  ;;  %4223 = vst.msk [vmem:[#allocation4 + $0x20] sm:$0xff] %vm1135_vm3, %v4213_v41  ;;  %v6873_v10 = vpop.f32.mrb[80].mxu1  ;;  %v4206_v5 = vld [vmem:[#allocation4 + $0x38] sm:$0xff] }
 0x713   : > { %v6892_v34 = vpop.f32.mrb[74].mxu0  ;;  %4408 = vst.msk [vmem:[#allocation4 + $0x8] sm:$0xff] %vm1135_vm3, %v4398_v43  ;;  %v4216_v38 = vadd.f32 %v6873_v10, %v4206_v5  ;;  %v4180_v24 = vpop.f32.mrb[81].mxu1  ;;  %v4205_v48 = vld [vmem:[#allocation4 + $0x30] sm:$0xff] }
 0x714   : > { %v4368_v25 = vpop.f32.mrb[75].mxu0  ;;  %4407 = vst.msk [vmem:[#allocation4] sm:$0xff] %vm1135_vm3, %v4397_v4  ;;  %v4390_v11 = vld [vmem:[#allocation4 + $0x18] sm:$0xff]  ;;  %v4215_v30 = vadd.f32 %v4205_v48, %v4180_v24 }
 0x715   : > { %v4400_v35 = vadd.f32 %v6886_v61, %v4390_v11  ;;  %v4389_v42 = vld [vmem:[#allocation4 + $0x10] sm:$0xff]  ;;  %4226 = vst.msk [vmem:[#allocation4 + $0x38] sm:$0xff] %vm1135_vm3, %v4216_v38 }
 0x716   : > { %v4399_v49 = vadd.f32 %v4389_v42, %v4348_v8  ;;  %4225 = vst.msk [vmem:[#allocation4 + $0x30] sm:$0xff] %vm1135_vm3, %v4215_v30  ;;  %v6876_v18 = vpop.f32.mrb[82].mxu1  ;;  %v4208_v54 = vld [vmem:[#allocation4 + $0x48] sm:$0xff] }
 0x717   : > { %v6895_v57 = vpop.f32.mrb[76].mxu0  ;;  %4410 = vst.msk [vmem:[#allocation4 + $0x18] sm:$0xff] %vm1135_vm3, %v4400_v35  ;;  %v4218_v50 = vadd.f32 %v6876_v18, %v4208_v54  ;;  %v4190_v59 = vpop.f32.mrb[83].mxu1  ;;  %v4207_v37 = vld [vmem:[#allocation4 + $0x40] sm:$0xff] }
 0x718   : > { %v4378_v3 = vpop.f32.mrb[77].mxu0  ;;  %4409 = vst.msk [vmem:[#allocation4 + $0x10] sm:$0xff] %vm1135_vm3, %v4399_v49  ;;  %v4392_v51 = vld [vmem:[#allocation4 + $0x28] sm:$0xff]  ;;  %v4217_v28 = vadd.f32 %v4207_v37, %v4190_v59 }
 0x719   : > { %v4402_v14 = vadd.f32 %v6889_v39, %v4392_v51  ;;  %v4391_v52 = vld [vmem:[#allocation4 + $0x20] sm:$0xff]  ;;  %4228 = vst.msk [vmem:[#allocation4 + $0x48] sm:$0xff] %vm1135_vm3, %v4218_v50 }
 0x71a   : > { %v4401_v12 = vadd.f32 %v4391_v52, %v4358_v45  ;;  %4227 = vst.msk [vmem:[#allocation4 + $0x40] sm:$0xff] %vm1135_vm3, %v4217_v28  ;;  %v6902_v55 = vpop.f32.mrb[84].mxu1  ;;  %v4576_v1 = vld [vmem:[#allocation4 + $0x8] sm:$0xff] }
 0x71b   : > { %v6921_v46 = vpop.f32.mrb[78].mxu0  ;;  %4412 = vst.msk [vmem:[#allocation4 + $0x28] sm:$0xff] %vm1135_vm3, %v4402_v14  ;;  %v4586_v53 = vadd.f32 %v6902_v55, %v4576_v1  ;;  %v4526_v56 = vpop.f32.mrb[85].mxu1  ;;  %v4575_v58 = vld [vmem:[#allocation4] sm:$0xff] }
 0x71c   : > { %v4714_v7 = vpop.f32.mrb[79].mxu0  ;;  %4411 = vst.msk [vmem:[#allocation4 + $0x20] sm:$0xff] %vm1135_vm3, %v4401_v12  ;;  %v4394_v47 = vld [vmem:[#allocation4 + $0x38] sm:$0xff]  ;;  %v4585_v15 = vadd.f32 %v4575_v58, %v4526_v56 }
 0x71d   : > { %v4404_v62 = vadd.f32 %v6892_v34, %v4394_v47  ;;  %v4393_v17 = vld [vmem:[#allocation4 + $0x30] sm:$0xff]  ;;  %4596 = vst.msk [vmem:[#allocation4 + $0x8] sm:$0xff] %vm1135_vm3, %v4586_v53 }
 0x71e   : > { %v4403_v2 = vadd.f32 %v4393_v17, %v4368_v25  ;;  %4595 = vst.msk [vmem:[#allocation4] sm:$0xff] %vm1135_vm3, %v4585_v15  ;;  %v6905_v29 = vpop.f32.mrb[86].mxu1  ;;  %v4578_v61 = vld [vmem:[#allocation4 + $0x18] sm:$0xff] }
 0x71f   : > { %v6924_v32 = vpop.f32.mrb[80].mxu0  ;;  %4414 = vst.msk [vmem:[#allocation4 + $0x38] sm:$0xff] %vm1135_vm3, %v4404_v62  ;;  %v4588_v20 = vadd.f32 %v6905_v29, %v4578_v61  ;;  %v4536_v33 = vpop.f32.mrb[87].mxu1  ;;  %v4577_v8 = vld [vmem:[#allocation4 + $0x10] sm:$0xff] }
 0x720   : > { %v4724_v60 = vpop.f32.mrb[81].mxu0  ;;  %4413 = vst.msk [vmem:[#allocation4 + $0x30] sm:$0xff] %vm1135_vm3, %v4403_v2  ;;  %v4396_v13 = vld [vmem:[#allocation4 + $0x48] sm:$0xff]  ;;  %v4587_v31 = vadd.f32 %v4577_v8, %v4536_v33 }
 0x721   : > { %v4406_v36 = vadd.f32 %v6895_v57, %v4396_v13  ;;  %v4395_v40 = vld [vmem:[#allocation4 + $0x40] sm:$0xff]  ;;  %4598 = vst.msk [vmem:[#allocation4 + $0x18] sm:$0xff] %vm1135_vm3, %v4588_v20 }
 0x722   : > { %v4405_v23 = vadd.f32 %v4395_v40, %v4378_v3  ;;  %4597 = vst.msk [vmem:[#allocation4 + $0x10] sm:$0xff] %vm1135_vm3, %v4587_v31  ;;  %v6908_v63 = vpop.f32.mrb[88].mxu1  ;;  %v4580_v39 = vld [vmem:[#allocation4 + $0x28] sm:$0xff] }
 0x723   : > { %v6927_v44 = vpop.f32.mrb[82].mxu0  ;;  %4416 = vst.msk [vmem:[#allocation4 + $0x48] sm:$0xff] %vm1135_vm3, %v4406_v36  ;;  %v4590_v6 = vadd.f32 %v6908_v63, %v4580_v39  ;;  %v4546_v16 = vpop.f32.mrb[89].mxu1  ;;  %v4579_v45 = vld [vmem:[#allocation4 + $0x20] sm:$0xff] }
 0x724   : > { %v4734_v9 = vpop.f32.mrb[83].mxu0  ;;  %4415 = vst.msk [vmem:[#allocation4 + $0x40] sm:$0xff] %vm1135_vm3, %v4405_v23  ;;  %v4764_v41 = vld [vmem:[#allocation4 + $0x8] sm:$0xff]  ;;  %v4589_v43 = vadd.f32 %v4579_v45, %v4546_v16 }
 0x725   : > { %v4774_v26 = vadd.f32 %v6921_v46, %v4764_v41  ;;  %v4763_v4 = vld [vmem:[#allocation4] sm:$0xff]  ;;  %4600 = vst.msk [vmem:[#allocation4 + $0x28] sm:$0xff] %vm1135_vm3, %v4590_v6 }
 0x726   : > { %v4773_v10 = vadd.f32 %v4763_v4, %v4714_v7  ;;  %4599 = vst.msk [vmem:[#allocation4 + $0x20] sm:$0xff] %vm1135_vm3, %v4589_v43  ;;  %v6911_v5 = vpop.f32.mrb[90].mxu1  ;;  %v4582_v34 = vld [vmem:[#allocation4 + $0x38] sm:$0xff] }
 0x727   : > { %v6930_v38 = vpop.f32.mrb[84].mxu0  ;;  %4784 = vst.msk [vmem:[#allocation4 + $0x8] sm:$0xff] %vm1135_vm3, %v4774_v26  ;;  %v4592_v24 = vadd.f32 %v6911_v5, %v4582_v34  ;;  %v4556_v48 = vpop.f32.mrb[91].mxu1  ;;  %v4581_v25 = vld [vmem:[#allocation4 + $0x30] sm:$0xff] }
 0x728   : > { %v4744_v11 = vpop.f32.mrb[85].mxu0  ;;  %4783 = vst.msk [vmem:[#allocation4] sm:$0xff] %vm1135_vm3, %v4773_v10  ;;  %v4766_v30 = vld [vmem:[#allocation4 + $0x18] sm:$0xff]  ;;  %v4591_v35 = vadd.f32 %v4581_v25, %v4556_v48 }
 0x729   : > { %v4776_v42 = vadd.f32 %v6924_v32, %v4766_v30  ;;  %v4765_v49 = vld [vmem:[#allocation4 + $0x10] sm:$0xff]  ;;  %4602 = vst.msk [vmem:[#allocation4 + $0x38] sm:$0xff] %vm1135_vm3, %v4592_v24 }
 0x72a   : > { %v4775_v18 = vadd.f32 %v4765_v49, %v4724_v60  ;;  %4601 = vst.msk [vmem:[#allocation4 + $0x30] sm:$0xff] %vm1135_vm3, %v4591_v35  ;;  %v6914_v54 = vpop.f32.mrb[92].mxu1  ;;  %v4584_v57 = vld [vmem:[#allocation4 + $0x48] sm:$0xff] }
 0x72b   : > { %v6933_v50 = vpop.f32.mrb[86].mxu0  ;;  %4786 = vst.msk [vmem:[#allocation4 + $0x18] sm:$0xff] %vm1135_vm3, %v4776_v42  ;;  %v4594_v59 = vadd.f32 %v6914_v54, %v4584_v57  ;;  %v4566_v37 = vpop.f32.mrb[93].mxu1  ;;  %v4583_v3 = vld [vmem:[#allocation4 + $0x40] sm:$0xff] }
 0x72c   : > { %v4754_v51 = vpop.f32.mrb[87].mxu0  ;;  %4785 = vst.msk [vmem:[#allocation4 + $0x10] sm:$0xff] %vm1135_vm3, %v4775_v18  ;;  %v4768_v28 = vld [vmem:[#allocation4 + $0x28] sm:$0xff]  ;;  %v4593_v14 = vadd.f32 %v4583_v3, %v4566_v37 }
 0x72d   : > { %v4778_v52 = vadd.f32 %v6927_v44, %v4768_v28  ;;  %v4767_v12 = vld [vmem:[#allocation4 + $0x20] sm:$0xff]  ;;  %4604 = vst.msk [vmem:[#allocation4 + $0x48] sm:$0xff] %vm1135_vm3, %v4594_v59 }
 0x72e   : > { %v4777_v55 = vadd.f32 %v4767_v12, %v4734_v9  ;;  %4603 = vst.msk [vmem:[#allocation4 + $0x40] sm:$0xff] %vm1135_vm3, %v4593_v14  ;;  %v6940_v1 = vpop.f32.mrb[94].mxu1  ;;  %v4952_v46 = vld [vmem:[#allocation4 + $0x8] sm:$0xff] }
 0x72f   : > { %4788 = vst.msk [vmem:[#allocation4 + $0x28] sm:$0xff] %vm1135_vm3, %v4778_v52  ;;  %v4962_v53 = vadd.f32 %v6940_v1, %v4952_v46  ;;  %v4902_v56 = vpop.f32.mrb[95].mxu1  ;;  %v4951_v58 = vld [vmem:[#allocation4] sm:$0xff] }
 0x730   : > { %4787 = vst.msk [vmem:[#allocation4 + $0x20] sm:$0xff] %vm1135_vm3, %v4777_v55  ;;  %v4770_v7 = vld [vmem:[#allocation4 + $0x38] sm:$0xff]  ;;  %v4961_v47 = vadd.f32 %v4951_v58, %v4902_v56 }
 0x731   : > { %v4780_v15 = vadd.f32 %v6930_v38, %v4770_v7  ;;  %v4769_v62 = vld [vmem:[#allocation4 + $0x30] sm:$0xff]  ;;  %4972 = vst.msk [vmem:[#allocation4 + $0x8] sm:$0xff] %vm1135_vm3, %v4962_v53 }
 0x732   : > { %v4779_v17 = vadd.f32 %v4769_v62, %v4744_v11  ;;  %4971 = vst.msk [vmem:[#allocation4] sm:$0xff] %vm1135_vm3, %v4961_v47  ;;  %v6943_v2 = vpop.f32.mrb[96].mxu1  ;;  %v4954_v29 = vld [vmem:[#allocation4 + $0x18] sm:$0xff] }
 0x733   : > { %4790 = vst.msk [vmem:[#allocation4 + $0x38] sm:$0xff] %vm1135_vm3, %v4780_v15  ;;  %v4964_v61 = vadd.f32 %v6943_v2, %v4954_v29  ;;  %v4912_v32 = vpop.f32.mrb[97].mxu1  ;;  %v4953_v20 = vld [vmem:[#allocation4 + $0x10] sm:$0xff] }
 0x734   : > { %4789 = vst.msk [vmem:[#allocation4 + $0x30] sm:$0xff] %vm1135_vm3, %v4779_v17  ;;  %v4772_v33 = vld [vmem:[#allocation4 + $0x48] sm:$0xff]  ;;  %v4963_v8 = vadd.f32 %v4953_v20, %v4912_v32 }
 0x735   : > { %4974 = vst.msk [vmem:[#allocation4 + $0x18] sm:$0xff] %vm1135_vm3, %v4964_v61  ;;  %v4782_v60 = vadd.f32 %v6933_v50, %v4772_v33  ;;  %v4771_v13 = vld [vmem:[#allocation4 + $0x40] sm:$0xff]  ;;  %v7440_v32 = vld [vmem:[#allocation25] sm:$0xff] }
 0x736   : > { %4973 = vst.msk [vmem:[#allocation4 + $0x10] sm:$0xff] %vm1135_vm3, %v4963_v8  ;;  %v4781_v31 = vadd.f32 %v4771_v13, %v4754_v51  ;;  %v6946_v36 = vpop.f32.mrb[98].mxu1  ;;  %v4956_v40 = vld [vmem:[#allocation4 + $0x28] sm:$0xff] }
 0x737   : > { %4792 = vst.msk [vmem:[#allocation4 + $0x48] sm:$0xff] %vm1135_vm3, %v4782_v60  ;;  %v4966_v23 = vadd.f32 %v6946_v36, %v4956_v40  ;;  %v4922_v63 = vpop.f32.mrb[99].mxu1  ;;  %v4955_v39 = vld [vmem:[#allocation4 + $0x20] sm:$0xff] }
 0x738   : > { %4791 = vst.msk [vmem:[#allocation4 + $0x40] sm:$0xff] %vm1135_vm3, %v4781_v31  ;;  %v4965_v44 = vadd.f32 %v4955_v39, %v4922_v63  ;;  %v9483_v6 = vld [vmem:[#allocation4 + $0x8] sm:$0xff] }
 0x739   : > { %4976 = vst.msk [vmem:[#allocation4 + $0x28] sm:$0xff] %vm1135_vm3, %v4966_v23  ;;  %v9486_v16 = vld [vmem:[#allocation4] sm:$0xff]  ;;  %v5062_v45 = vmul.f32 %v9483_v6, %v9483_v6 }
 0x73a   : > { %4975 = vst.msk [vmem:[#allocation4 + $0x20] sm:$0xff] %vm1135_vm3, %v4965_v44  ;;  %v6949_v9 = vpop.f32.mrb[100].mxu1  ;;  %v4958_v41 = vld [vmem:[#allocation4 + $0x38] sm:$0xff]  ;;  %v7113_v43 = vpack.c.bf16 %v9483_v6, %v9486_v16  ;;  %v5061_v26 = vmul.f32 %v9486_v16, %v9486_v16  ;;  %v5556_v39 = vld [vmem:[#allocation2 + $0x14] sm:$0xff]  ;;  %v5557_v44 = vld [vmem:[#allocation2 + $0x1c] sm:$0xff] }
 0x73b   : > { %v4968_v4 = vadd.f32 %v6949_v9, %v4958_v41  ;;  %v4932_v10 = vpop.f32.mrb[101].mxu1  ;;  %v4957_v5 = vld [vmem:[#allocation4 + $0x30] sm:$0xff]  ;;  %v5555_v23 = vld [vmem:[#allocation2 + $0xc] sm:$0xff]  ;;  %v5560_v9 = vld [vmem:[#allocation2 + $0x34] sm:$0xff] }
 0x73c   : > { %v4967_v34 = vadd.f32 %v4957_v5, %v4932_v10  ;;  %7114 = vmatpush3.bf16.msra.mxu0 %v7113_v43  ;;  %v7128_v38 = vpack.c.bf16 %v5062_v45, %v5061_v26  ;;  %v9495_v24 = vld [vmem:[#allocation4 + $0x18] sm:$0xff]  ;;  %v5561_v41 = vld [vmem:[#allocation2 + $0x3c] sm:$0xff] }
 0x73d   : > { %4978 = vst.msk [vmem:[#allocation4 + $0x38] sm:$0xff] %vm1135_vm3, %v4968_v4  ;;  %7115 = vmatprep.subr.bf16.mxu0 %v7981_v27  ;;  %v9499_v48 = vld [vmem:[#allocation4 + $0x10] sm:$0xff]  ;;  %v5064_v25 = vmul.f32 %v9495_v24, %v9495_v24  ;;  %v5559_v45 = vld [vmem:[#allocation2 + $0x2c] sm:$0xff]  ;;  %v5564_v4 = vld [vmem:[#allocation2 + $0x54] sm:$0xff] }
 0x73e   : > { %4977 = vst.msk [vmem:[#allocation4 + $0x30] sm:$0xff] %vm1135_vm3, %v4967_v34  ;;  %v6952_v11 = vpop.f32.mrb[102].mxu1  ;;  %v4960_v30 = vld [vmem:[#allocation4 + $0x48] sm:$0xff]  ;;  %7129 = vmatpush3.bf16.msra.mxu1 %v7128_v38  ;;  %v7116_v35 = vpack.c.bf16 %v9495_v24, %v9499_v48  ;;  %v5063_v42 = vmul.f32 %v9499_v48, %v9499_v48  ;;  %v5562_v43 = vld [vmem:[#allocation2 + $0x44] sm:$0xff]  ;;  %v5563_v26 = vld [vmem:[#allocation2 + $0x4c] sm:$0xff] }
 0x73f   : > { %v4970_v49 = vadd.f32 %v6952_v11, %v4960_v30  ;;  %v4942_v18 = vpop.f32.mrb[103].mxu1  ;;  %v4959_v54 = vld [vmem:[#allocation4 + $0x40] sm:$0xff]  ;;  %7130 = vmatprep.subr.bf16.mxu1 %v7981_v27  ;;  %v3302_v34 = vld [vmem:[#allocation20] sm:$0x1] }
 0x740   : > { %v4969_v57 = vadd.f32 %v4959_v54, %v4942_v18  ;;  %7117 = vmatpush3.bf16.msra.mxu0 %v7116_v35  ;;  %v7131_v50 = vpack.c.bf16 %v5064_v25, %v5063_v42  ;;  %v9509_v59 = vld [vmem:[#allocation4 + $0x28] sm:$0xff]  ;;  %v6241_v54 = vld [vmem:[#allocation22] ss:$0 sm:$0xff] }
 0x741   : > { %4980 = vst.msk [vmem:[#allocation4 + $0x48] sm:$0xff] %vm1135_vm3, %v4970_v49  ;;  %7118 = vmatprep.subr.bf16.mxu0 %v7981_v27  ;;  %v9513_v37 = vld [vmem:[#allocation4 + $0x20] sm:$0xff]  ;;  %v5066_v3 = vmul.f32 %v9509_v59, %v9509_v59 }
 0x742   : > { %4979 = vst.msk [vmem:[#allocation4 + $0x40] sm:$0xff] %vm1135_vm3, %v4969_v57  ;;  %7132 = vmatpush3.bf16.msra.mxu1 %v7131_v50  ;;  %v7119_v51 = vpack.c.bf16 %v9509_v59, %v9513_v37  ;;  %v5065_v28 = vmul.f32 %v9513_v37, %v9513_v37 }
 0x743   : > { %7133 = vmatprep.subr.bf16.mxu1 %v7981_v27 }
 0x744   : > { %7120 = vmatpush3.bf16.msra.mxu0 %v7119_v51  ;;  %v7134_v14 = vpack.c.bf16 %v5066_v3, %v5065_v28  ;;  %v9523_v52 = vld [vmem:[#allocation4 + $0x38] sm:$0xff] }
 0x745   : > { %7121 = vmatprep.subr.bf16.mxu0 %v7981_v27  ;;  %v9526_v12 = vld [vmem:[#allocation4 + $0x30] sm:$0xff]  ;;  %v5068_v55 = vmul.f32 %v9523_v52, %v9523_v52 }
 0x746   : > { %7135 = vmatpush3.bf16.msra.mxu1 %v7134_v14  ;;  %v7122_v1 = vpack.c.bf16 %v9523_v52, %v9526_v12  ;;  %v5067_v46 = vmul.f32 %v9526_v12, %v9526_v12 }
 0x747   : > { %7136 = vmatprep.subr.bf16.mxu1 %v7981_v27 }
 0x748   : > { %7123 = vmatpush3.bf16.msra.mxu0 %v7122_v1  ;;  %v7137_v53 = vpack.c.bf16 %v5068_v55, %v5067_v46  ;;  %v9535_v56 = vld [vmem:[#allocation4 + $0x48] sm:$0xff] }
 0x749   : > { %7124 = vmatprep.subr.bf16.mxu0 %v7981_v27  ;;  %v9538_v58 = vld [vmem:[#allocation4 + $0x40] sm:$0xff]  ;;  %v5070_v7 = vmul.f32 %v9535_v56, %v9535_v56 }
 0x74a   : > { %7138 = vmatpush3.bf16.msra.mxu1 %v7137_v53  ;;  %v7125_v47 = vpack.c.bf16 %v9535_v56, %v9538_v58  ;;  %v5069_v15 = vmul.f32 %v9538_v58, %v9538_v58 }
 0x74b   : > { %7139 = vmatprep.subr.bf16.mxu1 %v7981_v27 }
 0x74c   : > { %7126 = vmatpush3.bf16.msra.mxu0 %v7125_v47  ;;  %v7140_v62 = vpack.c.bf16 %v5070_v7, %v5069_v15 }
 0x74d   : > { %7142 = vmatprep.subr.bf16.mxu0 %v7981_v27 }
 0x74e   : > { %7141 = vmatpush3.bf16.msra.mxu1 %v7140_v62 }
 0x74f   : > { %6974 = vmatmul.mubr.msk.f32.vlgmr.msra.gmra.mrb[88].mxu0 %vm9876_vm13, %v8860_v21 }
 0x750   : > { %7144 = vmatpush3.bf16.msra.mxu0 %v8862_v22  ;;  %7003 = vmatprep.mubr.msk.f32.mxu0 %vm7982_vm4, %v7980_v0 }
 0x751   : > { %6997 = vmatmul.mubr.msk.f32.vlgmr.msra.gmra.mrb[104].mxu1 %vm9877_vm14, %v8860_v21  ;;  %7145 = vmatprep.subr.bf16.mxu0 %v7981_v27 }
 0x822   : > { %v5057_v17 = vpop.f32.mrb[88].mxu0 }
 0x823   : > { %v6975_v2 = vpop.f32.mrb[89].mxu0  ;;  %7004 = vmatmul.mubr.msk.f32.vlgmr.msra.gmra.mrb[90].mxu0 %vm1135_vm3, %v5057_v17 }
 0x824   : > { %7147 = vmatpush3.bf16.msra.mxu0 %v8862_v22  ;;  %v5137_v29 = vpop.f32.mrb[104].mxu1  ;;  %7010 = vmatprep.mubr.msk.f32.mxu0 %vm7982_vm4, %v7980_v0  ;;  %v5565_v22 = vld [vmem:[#allocation26] sm:$0xff] }
 0x825   : > { %v6998_v61 = vpop.f32.mrb[105].mxu1  ;;  %7013 = vmatprep.subr.mxu0 %v7980_v0 }
 0x827   : > { %7011 = vmatmul.mubr.msk.f32.vlgmr.msra.gmra.mrb[92].mxu0 %vm1135_vm3, %v5137_v29 }
 0x828   : > { %7014 = vmatpush3.msra.mxu0 %v7440_v32  ;;  %7015 = vmatprep.mubr.msk.f32.mxu0 %vm7982_vm4, %v7980_v0 }
 0x829   : > { %7018 = vmatprep.subr.mxu0 %v7980_v0 }
 0x8f6   : > { %v5210_v27 = vpop.f32.mrb[90].mxu0 }
 0x8f7   : > { %v5287_v21 = vmul.f32 0.0078125, %v5210_v27  ;;  %v7005_v20 = vpop.f32.mrb[91].mxu0 }
 0x8f9   : > { %7016 = vmatmul.mubr.msk.f32.vlgmr.msra.gmra.mrb[94].mxu0 %vm9878_vm15, %v5287_v21  ;;  %v5289_v8 = vmul.f32 %v5287_v21, %v5287_v21 }
 0x8fa   : > { %v5283_v33 = vpop.f32.mrb[92].mxu0  ;;  %7019 = vmatpush3.msra.mxu0 %v7440_v32  ;;  %7020 = vmatprep.mubr.msk.f32.mxu0 %vm7982_vm4, %v7980_v0  ;;  %vm9882_vm4 = vmmov %vm9879_vm1  ;;  %v5558_v0 = vld [vmem:[#allocation2 + $0x24] sm:$0xff] }
 0x8fb   : > { %v5288_v60 = vmul.f32 0.0078125, %v5283_v33  ;;  %v7012_v13 = vpop.f32.mrb[93].mxu0  ;;  %7023 = vmatprep.subr.mxu0 %v5565_v22 }
 0x8fd   : > { %v5290_v31 = vsub.f32 %v5288_v60, %v5289_v8 }
 0x8ff   : > { %v5291_v36 = vmax.f32 %v5290_v31, 0.0 }
 0x901   : > { %v5292_v40 = vadd.f32 1e-05, %v5291_v36 }
 0x903   : > { %7398 = vrsqrt.f32 %v5292_v40 }
 0x90d   : > { %v7399_v63 = vpop.eup %7398 }
 0x90e   : > { %7021 = vmatmul.mubr.msk.f32.vlgmr.msra.gmra.mrb[96].mxu0 %vm9879_vm1, %v7399_v63 }
 0x90f   : > { %7024 = vmatpush3.msra.mxu0 %v5565_v22  ;;  %7025 = vmatprep.mubr.msk.f32.mxu0 %vm9880_vm5, %v5555_v23 }
 0x912   : > { %7026 = vmatmul.mubr.msk.f32.vlgmr.msra.gmra.mrb[98].mxu0 %vm9881_vm2, %v5556_v39 }
 0x913   : > { %7028 = vmatprep.mubr.msk.f32.mxu0 %vm9882_vm4, %v5557_v44 }
 0x916   : > { %7029 = vmatmul.mubr.msk.f32.gmra.mrb[100].mxu0 %vm9883_vm7, %v5558_v0 }
 0x917   : > { %7031 = vmatprep.mubr.msk.f32.mxu0 %vm9884_vm0, %v5559_v45 }
 0x91a   : > { %7032 = vmatmul.mubr.msk.f32.gmra.mrb[102].mxu0 %vm9885_vm10, %v5560_v9 }
 0x91b   : > { %7034 = vmatprep.mubr.msk.f32.mxu0 %vm9886_vm9, %v5561_v41 }
 0x91e   : > { %7035 = vmatmul.mubr.msk.f32.gmra.mrb[104].mxu0 %vm9887_vm6, %v5562_v43 }
 0x91f   : > { %7037 = vmatprep.mubr.msk.f32.mxu0 %vm9888_vm8, %v5563_v26 }
 0x922   : > { %7038 = vmatmul.mubr.msk.f32.gmra.mrb[106].mxu0 %vm9889_vm11, %v5564_v4 }
 0x9cc   : > { %v5363_v10 = vpop.f32.mrb[94].mxu0 }
 0x9cd   : > { %v7017_v5 = vpop.f32.mrb[95].mxu0  ;;  %v5443_v38 = vrot.slane %v5363_v10, %v8921_v19 }
 0x9cf   : > { %v5445_v42 = vsub.f32 %v9483_v6, %v5443_v38  ;;  %v5444_v49 = vsub.f32 %v9486_v16, %v5443_v38  ;;  %v5447_v18 = vsub.f32 %v9495_v24, %v5443_v38  ;;  %v5446_v50 = vsub.f32 %v9499_v48, %v5443_v38 }
 0x9d0   : > { %v5449_v3 = vsub.f32 %v9509_v59, %v5443_v38  ;;  %v5448_v51 = vsub.f32 %v9513_v37, %v5443_v38  ;;  %v5451_v6 = vsub.f32 %v9523_v52, %v5443_v38  ;;  %v5450_v24 = vsub.f32 %v9526_v12, %v5443_v38 }
 0x9d1   : > { %v5453_v29 = vsub.f32 %v9535_v56, %v5443_v38  ;;  %v5452_v20 = vsub.f32 %v9538_v58, %v5443_v38 }
 0x9e1   : > { %v5436_v25 = vpop.f32.mrb[96].mxu0 }
 0x9e2   : > { %v5454_v11 = vmul.f32 %v5436_v25, %v3302_v34  ;;  %v7022_v30 = vpop.f32.mrb[97].mxu0 }
 0x9e4   : > { %v5458_v35 = vrot.slane %v5454_v11, %v8921_v19 }
 0x9e5   : > { %v9584_v57 = vpop.f32.mrb[98].mxu0 }
 0x9e6   : > { %v5460_v28 = vmul.f32 %v5458_v35, %v5445_v42  ;;  %v5459_v14 = vmul.f32 %v5458_v35, %v5444_v49  ;;  %v9589_v55 = vpop.f32.mrb[99].mxu0  ;;  %v5462_v19 = vmul.f32 %v5458_v35, %v5447_v18  ;;  %v5461_v1 = vmul.f32 %v5458_v35, %v5446_v50 }
 0x9e7   : > { %v5464_v16 = vmul.f32 %v5458_v35, %v5449_v3  ;;  %v5463_v46 = vmul.f32 %v5458_v35, %v5448_v51  ;;  %v5466_v59 = vmul.f32 %v5458_v35, %v5451_v6  ;;  %v5465_v52 = vmul.f32 %v5458_v35, %v5450_v24 }
 0x9e8   : > { %v9593_v53 = vadd.f32 %v6241_v54, %v5460_v28  ;;  %v9595_v7 = vadd.f32 %v6241_v54, %v5459_v14  ;;  %v9597_v48 = vadd.f32 %v6241_v54, %v5462_v19  ;;  %v9601_v47 = vadd.f32 %v6241_v54, %v5461_v1  ;;  %v6252_v28 = vld [vmem:[#allocation28] ss:$0 sm:$0xff] }
 0x9e9   : > { %v9599_v37 = vpop.f32.mrb[100].mxu0  ;;  %v9603_v15 = vadd.f32 %v6241_v54, %v5464_v16  ;;  %v9605_v62 = vadd.f32 %v6241_v54, %v5463_v46  ;;  %v9614_v27 = vadd.f32 %v6241_v54, %v5466_v59  ;;  %v9616_v21 = vadd.f32 %v6241_v54, %v5465_v52 }
 0x9ea   : > { %v6243_v17 = vmul.f32 -1.442695, %v9593_v53  ;;  %v6242_v12 = vmul.f32 -1.442695, %v9595_v7  ;;  %v6245_v2 = vmul.f32 -1.442695, %v9597_v48  ;;  %v5468_v33 = vmul.f32 %v5458_v35, %v5453_v29 }
 0x9eb   : > { %v6244_v61 = vmul.f32 -1.442695, %v9601_v47  ;;  %v9612_v32 = vpop.f32.mrb[101].mxu0  ;;  %v6247_v22 = vmul.f32 -1.442695, %v9603_v15  ;;  %v5467_v56 = vmul.f32 %v5458_v35, %v5452_v20  ;;  %v5675_v1 = vadd.f32 %v9584_v57, %v6252_v28 }
 0x9ec   : > { %7400 = vpow2.f32 %v6243_v17  ;;  %v6246_v60 = vmul.f32 -1.442695, %v9605_v62  ;;  %v6249_v31 = vmul.f32 -1.442695, %v9614_v27  ;;  %v9626_v36 = vadd.f32 %v6241_v54, %v5468_v33 }
 0x9ed   : > { %7402 = vpow2.f32 %v6242_v12  ;;  %v9620_v8 = vpop.f32.mrb[102].mxu0  ;;  %v6248_v58 = vmul.f32 -1.442695, %v9616_v21  ;;  %v9629_v40 = vadd.f32 %v6241_v54, %v5467_v56  ;;  %v5670_v24 = vadd.f32 %v6252_v28, %v9589_v55 }
 0x9ee   : > { %7404 = vpow2.f32 %v6245_v2  ;;  %v9623_v13 = vpop.f32.mrb[103].mxu0  ;;  %v6251_v23 = vmul.f32 -1.442695, %v9626_v36  ;;  %v5685_v12 = vadd.f32 %v9599_v37, %v6252_v28  ;;  %v5680_v20 = vadd.f32 %v6252_v28, %v9612_v32 }
 0x9ef   : > { %7406 = vpow2.f32 %v6244_v61  ;;  %v6250_v39 = vmul.f32 -1.442695, %v9629_v40  ;;  %v5695_v55 = vadd.f32 %v9620_v8, %v6252_v28  ;;  %v5690_v33 = vadd.f32 %v6252_v28, %v9623_v13 }
 0x9f0   : > { %7408 = vpow2.f32 %v6247_v22 }
 0x9f1   : > { %7410 = vpow2.f32 %v6246_v60  ;;  %v9632_v63 = vpop.f32.mrb[104].mxu0 }
 0x9f2   : > { %7412 = vpow2.f32 %v6249_v31  ;;  %v9635_v44 = vpop.f32.mrb[105].mxu0  ;;  %v5705_v56 = vadd.f32 %v9632_v63, %v6252_v28 }
 0x9f3   : > { %7414 = vpow2.f32 %v6248_v58 }
 0x9f4   : > { %7416 = vpow2.f32 %v6251_v23 }
 0x9f5   : > { %v9637_v0 = vpop.f32.mrb[106].mxu0  ;;  %7418 = vpow2.f32 %v6250_v39 }
 0x9f6   : > { %v7401_v45 = vpop.eup %7400  ;;  %v9639_v9 = vpop.f32.mrb[107].mxu0 }
 0x9f7   : > { %v7403_v41 = vpop.eup %7402  ;;  %v5516_v43 = vadd.f32 1.0, %v7401_v45  ;;  %v5710_v13 = vadd.f32 %v6252_v28, %v9639_v9 }
 0x9f8   : > { %v7405_v26 = vpop.eup %7404  ;;  %v5515_v4 = vadd.f32 1.0, %v7403_v41 }
 0x9f9   : > { %v7407_v10 = vpop.eup %7406  ;;  %7420 = vrcp.f32 %v5516_v43  ;;  %v5518_v5 = vadd.f32 1.0, %v7405_v26 }
 0x9fa   : > { %v7409_v34 = vpop.eup %7408  ;;  %7422 = vrcp.f32 %v5515_v4  ;;  %v5517_v38 = vadd.f32 1.0, %v7407_v10 }
 0x9fb   : > { %v7411_v25 = vpop.eup %7410  ;;  %7424 = vrcp.f32 %v5518_v5  ;;  %v5520_v11 = vadd.f32 1.0, %v7409_v34 }
 0x9fc   : > { %v7413_v30 = vpop.eup %7412  ;;  %7426 = vrcp.f32 %v5517_v38  ;;  %v5519_v35 = vadd.f32 1.0, %v7411_v25 }
 0x9fd   : > { %v7415_v42 = vpop.eup %7414  ;;  %7428 = vrcp.f32 %v5520_v11  ;;  %v5522_v49 = vadd.f32 1.0, %v7413_v30 }
 0x9fe   : > { %v7417_v18 = vpop.eup %7416  ;;  %7430 = vrcp.f32 %v5519_v35  ;;  %v5521_v54 = vadd.f32 1.0, %v7415_v42 }
 0x9ff   : > { %v7419_v50 = vpop.eup %7418  ;;  %7432 = vrcp.f32 %v5522_v49  ;;  %v5524_v3 = vadd.f32 1.0, %v7417_v18 }
 0xa00   : > { %7434 = vrcp.f32 %v5521_v54  ;;  %v5523_v51 = vadd.f32 1.0, %v7419_v50 }
 0xa01   : > { %7436 = vrcp.f32 %v5524_v3 }
 0xa02   : > { %7438 = vrcp.f32 %v5523_v51 }
 0xa03   : > { %v7421_v14 = vpop.eup %7420 }
 0xa04   : > { %v7423_v19 = vpop.eup %7422  ;;  %v5546_v6 = vmul.f32 %v7421_v14, %v9593_v53 }
 0xa05   : > { %v7425_v16 = vpop.eup %7424  ;;  %v5545_v46 = vmul.f32 %v7423_v19, %v9595_v7 }
 0xa06   : > { %v7427_v59 = vpop.eup %7426  ;;  %v5719_v52 = vadd.f32 %v5675_v1, %v5546_v6  ;;  %v5548_v17 = vmul.f32 %v7425_v16, %v9597_v48 }
 0xa07   : > { %v7429_v2 = vpop.eup %7428  ;;  %v5718_v29 = vadd.f32 %v5670_v24, %v5545_v46  ;;  %v5547_v61 = vmul.f32 %v7427_v59, %v9601_v47 }
 0xa08   : > { %v7431_v53 = vpop.eup %7430  ;;  %5729 = vst.msk [vmem:[#allocation4 + $0x8] sm:$0xff] %vm1135_vm3, %v5719_v52  ;;  %v5721_v57 = vadd.f32 %v5685_v12, %v5548_v17  ;;  %v5550_v7 = vmul.f32 %v7429_v2, %v9603_v15  ;;  %v5715_v15 = vadd.f32 %v9637_v0, %v6252_v28 }
 0xa09   : > { %v7433_v22 = vpop.eup %7432  ;;  %5728 = vst.msk [vmem:[#allocation4] sm:$0xff] %vm1135_vm3, %v5718_v29  ;;  %v5720_v48 = vadd.f32 %v5680_v20, %v5547_v61  ;;  %v5549_v37 = vmul.f32 %v7431_v53, %v9605_v62  ;;  %v5700_v62 = vadd.f32 %v6252_v28, %v9635_v44 }
 0xa0a   : > { %v7435_v60 = vpop.eup %7434  ;;  %5731 = vst.msk [vmem:[#allocation4 + $0x18] sm:$0xff] %vm1135_vm3, %v5721_v57  ;;  %v5723_v47 = vadd.f32 %v5695_v55, %v5550_v7  ;;  %v5552_v32 = vmul.f32 %v7433_v22, %v9614_v27 }
 0xa0b   : > { %v7437_v31 = vpop.eup %7436  ;;  %5730 = vst.msk [vmem:[#allocation4 + $0x10] sm:$0xff] %vm1135_vm3, %v5720_v48  ;;  %v5722_v8 = vadd.f32 %v5690_v33, %v5549_v37  ;;  %v5551_v58 = vmul.f32 %v7435_v60, %v9616_v21 }
 0xa0c   : > { %v7439_v23 = vpop.eup %7438  ;;  %5733 = vst.msk [vmem:[#allocation4 + $0x28] sm:$0xff] %vm1135_vm3, %v5723_v47  ;;  %v5725_v39 = vadd.f32 %v5705_v56, %v5552_v32  ;;  %v5554_v27 = vmul.f32 %v7437_v31, %v9626_v36 }
 0xa0d   : > { %5732 = vst.msk [vmem:[#allocation4 + $0x20] sm:$0xff] %vm1135_vm3, %v5722_v8  ;;  %v5724_v63 = vadd.f32 %v5700_v62, %v5551_v58  ;;  %v5553_v0 = vmul.f32 %v7439_v23, %v9629_v40 }
 0xa0e   : > { %5735 = vst.msk [vmem:[#allocation4 + $0x38] sm:$0xff] %vm1135_vm3, %v5725_v39  ;;  %v5727_v21 = vadd.f32 %v5715_v15, %v5554_v27 }
 0xa0f   : > { %5734 = vst.msk [vmem:[#allocation4 + $0x30] sm:$0xff] %vm1135_vm3, %v5724_v63  ;;  %v5726_v44 = vadd.f32 %v5710_v13, %v5553_v0 }
 0xa10   : > { %v5738_v45 = vld [vmem:[#allocation4] sm:$0xff]  ;;  %5737 = vst.msk [vmem:[#allocation4 + $0x48] sm:$0xff] %vm1135_vm3, %v5727_v21 }
 0xa11   : > { %5736 = vst.msk [vmem:[#allocation4 + $0x40] sm:$0xff] %vm1135_vm3, %v5726_v44  ;;  %5739 = vst.msk [vmem:[%s733_s15] sm:$0xff] %vm1135_vm3, %v5738_v45 }
 0xa12   : > { %v5740_v36 = vld [vmem:[#allocation4 + $0xa] sm:$0xff]  ;;  %v5743_v9 = vld [vmem:[#allocation4 + $0x14] sm:$0xff] }
 0xa13   : > { %v5749_v41 = vld [vmem:[#allocation4 + $0x28] sm:$0xff]  ;;  %6263 = vst.msk [vmem:[%s733_s15 + $0x8] sm:$0xff] %vm1135_vm3, %v5740_v36  ;;  %6264 = vst.msk [vmem:[%s733_s15 + $0x10] sm:$0xff] %vm1135_vm3, %v5743_v9 }
 0xa14   : > { %v5746_v40 = vld [vmem:[#allocation4 + $0x1e] sm:$0xff]  ;;  %6266 = vst.msk [vmem:[%s733_s15 + $0x20] sm:$0xff] %vm1135_vm3, %v5749_v41 }
 0xa15   : > { %6265 = vst.msk [vmem:[%s733_s15 + $0x18] sm:$0xff] %vm1135_vm3, %v5746_v40 }
 0xa16   : > { %v5752_v43 = vld [vmem:[#allocation4 + $0x32] sm:$0xff] }
 0xa17   : > { %6267 = vst.msk [vmem:[%s733_s15 + $0x28] sm:$0xff] %vm1135_vm3, %v5752_v43 }
 0xa18   : > { %v5755_v26 = vld [vmem:[#allocation4 + $0x3c] sm:$0xff]  ;;  %v5758_v4 = vld [vmem:[#allocation4 + $0x46] sm:$0xff] }
 0xa19   : > { %6268 = vst.msk [vmem:[%s733_s15 + $0x30] sm:$0xff] %vm1135_vm3, %v5755_v26  ;;  %6269 = vst.msk [vmem:[%s733_s15 + $0x38] sm:$0xff] %vm1135_vm3, %v5758_v4 }
 0xa1a   : > { %7880 = shalt.err (!%p7877_p8)
}
 0xa1b   : > { %s7881_s4 = scalar_lea.hbm %s9682_s16, 1024  ;;  %s7885_s7 = scalar_lea.hbm %s9890_s0, 2048 }
 0xa1c   : > { %p7882_p6 = scmp.ne.s32.totalorder %s9682_s16, %s7881_s4  ;;  %p7886_p2 = scmp.lt.u32.totalorder %s9682_s16, %s9890_s0 }
 0xa1d   : > { %p7887_p0 = scmp.lt.u32.totalorder %s7885_s7, %s7881_s4  ;;  %p7889_p4 = scmp.lt.u32.totalorder %s7881_s4, %s9682_s16 }
 0xa1e   : > { %p7883_p13 = pnand %p7882_p6, %p9891_p11 }
 0xa1f   : > { %p7888_p10 = por %p7887_p0, %p7886_p2 }
 0xa20   : > { %p7884_p1 = pneg %p7883_p13 }
 0xa21   : > { %p7890_p12 = por %p7889_p4, %p7888_p10 }
 0xa23   : > { %p7891_p3 = pnand %p7890_p12, %p7884_p1 }
 0xa25   : > { %7894 = shalt.err (!%p7891_p3)
}
 0xa26   : > { %s7984_s5 = smov 128   ;;  %s7985_s15 = smov 8  }
 0xa27   : > { %7226 = dma.vmem_to_hbm [thread:$0]  (%p9891_p11), %s9684_s26, 1024, %s9682_s16, %s5762_s24, %s7984_s5, %s7984_s5, %s7985_s15  }
 0xa28 PF: > { %s5790_s29 = sand.u32 1, %s7949_s18   ;;  %p9892_p5 = scmp.ne.s32.totalorder %s9801_s27, 0 }
 0xa29   : > { %p9893_p9 = scmp.ge.s32.totalorder %s7961_s21, 2  ;;  %s5791_s2 = scalar_lea.sflag [#allocation7], %s5790_s29 }
 0xa2b   : > { %p7276_p7 = pnand %p9893_p9, %p9892_p5 }
 0xa2d   : > { %7944 = dma.done.wait (!%p7276_p7), %s5791_s2, 1024  }
 0xa2e   : > { %7946 = vsyncadd (!%p7276_p7), %s5791_s2, 4294966272  ;;  %s9894_s28 = sld [smem:[#allocation40_spill]]  ;;  %p37_p8 = scmp.ge.s32.totalorder %s8252_s10, 4  }
 0xa2f   : > { %s9895_s18 = smov %s7953_s19  ;;  %s9896_s19 = smov %s7957_s20 }
 0xa30   : > { %s9898_s21 = smov %s8252_s10  ;;  %39 = sbr.rel (!%p37_p8) target bundleno = 29 (0x1d), region = 220 }
 0xa34   : > { %s9897_s20 = smov %s9894_s28 }
 0xa37   :  { %5796 = vsyncpa [#allocation6], 1 }
 0xa38   :  { %5798 = vsyncpa [#allocation6 + $0x1], 1 }
 0xa39   :  { %5799 = vsyncpa [#allocation9], 1 }
 0xa3a   :  { %5800 = vsyncpa [#allocation12], 1 }
 0xa3b   :  { %5801 = vsyncpa [#allocation15], 1 }
 0xa3c   :  { %5803 = vsyncpa [#allocation15 + $0x1], 1 }
 0xa3d   :  { %5804 = vsyncpa [#allocation18], 1 }
 0xa3e   :  { %5805 = vsyncpa [#allocation21], 1 }
 0xa3f   :  { %5806 = vsyncpa [#allocation24], 1 }
 0xa40   :  { %5807 = vsyncpa [#allocation27], 1 }
 0xa41   :  { %5808 = vsyncpa [#allocation7], 1 }
 0xa42   :  { %5810 = vsyncpa [#allocation7 + $0x1], 1 }

</bundles_post_ra>
